<compile_context>
chip_gen: v7x
topology: tpu7x:2x2x1
jax: 0.10.0
libtpu: 0.0.40
codegen_flags: <defaults>
</compile_context>

<pallas_src>
import jax
import jax.numpy as jnp
from jax.experimental import pallas as pl
from jax.experimental.pallas import tpu as pltpu

_EPS = 1e-5  # nn.BatchNorm2d default


def _pick_row_tile(num_rows: int, cap: int = 64) -> int:
    """Rows (of 128 lanes) per block: a multiple of 8 dividing num_rows, or the full extent."""
    if num_rows <= cap:
        return num_rows
    cap -= cap % 8
    for r in range(cap, 7, -8):
        if num_rows % r == 0:
            return r
    return num_rows  # no nice divisor: fall back to one block per image


# --------------------------- pass 1: input moments ---------------------------
def _moments_kernel(g_ref, x_ref, sg_ref, sx_ref):
    """Per-tile channel sums and Gram matrices, reduced over sublanes only.

    Output rows (per branch, each a (1, L) lane vector):
      [0:C]        sum over tile rows of channel c
      [C + i*C + j] sum over tile rows of (channel i * channel j)
    The remaining lane reduction + conversion to per-F_int BN statistics is
    tiny and happens in the wrapper between pallas_calls.
    """
    def one(src_ref, o_ref):
        c = src_ref.shape[0]
        for i in range(c):
            ri = src_ref[i]                                   # (r_t, L)
            o_ref[pl.ds(i, 1), :] = jnp.sum(ri, axis=0, keepdims=True)
            for j in range(c):
                rj = src_ref[j]
                o_ref[pl.ds(c + i * c + j, 1), :] = jnp.sum(ri * rj, axis=0, keepdims=True)

    one(g_ref, sg_ref)
    one(x_ref, sx_ref)


# ---------------------- pass 2: psi_pre + its statistics ---------------------
def _psi_pre_kernel(g_ref, x_ref, wg_ref, wx_ref, wp_ref, sh_ref, p_ref, ps_ref):
    """psi_pre = sum_co wp[co] * relu( conv_eff_g[co] + conv_eff_x[co] + shift[co] ).

    wg/wx already carry the branch-BN scale (folded in the wrapper), sh carries
    the combined branch-BN shifts; conv biases are exactly cancelled by BN.
    Also emits sublane-reduced sum / sum-of-squares partials of psi_pre.
    """
    f_l = g_ref.shape[0]
    f_g = x_ref.shape[0]
    f_int = wp_ref.shape[0]

    p = None
    for co in range(f_int):                                   # static unroll, F_int small
        acc = g_ref[0] * wg_ref[co, 0]
        for ci in range(1, f_l):
            acc = acc + g_ref[ci] * wg_ref[co, ci]
        for ci in range(f_g):
            acc = acc + x_ref[ci] * wx_ref[co, ci]
        s = jnp.maximum(acc + sh_ref[co], 0.0)                # ReLU(g1 + x1)
        term = s * wp_ref[co]
        p = term if p is None else p + term

    p_ref[...] = p
    ps_ref[pl.ds(0, 1), :] = jnp.sum(p, axis=0, keepdims=True)
    ps_ref[pl.ds(1, 1), :] = jnp.sum(p * p, axis=0, keepdims=True)


# -------------------------- pass 3: normalize + gate -------------------------
def _gate_kernel(x_ref, p_ref, sp_ref, out_ref):
    z = p_ref[...] * sp_ref[0] + sp_ref[1]                    # folded psi BatchNorm
    psi = 0.5 * jnp.tanh(0.5 * z) + 0.5                       # == sigmoid(z), single EUP op
    for c in range(x_ref.shape[0]):
        out_ref[c] = x_ref[c] * psi


# --------------------------------- wrapper -----------------------------------
def attention_block_forward(g_nchw, x_nchw, params, *, row_tile_cap=64):
    """Forward of Attention_block (training-mode BN). Inputs/outputs are NCHW f32."""
    N, F_l, H, W = g_nchw.shape
    F_g = x_nchw.shape[1]
    F_int = params["wg"].shape[0]
    HW = H * W
    f32 = jnp.float32

    # Lane-dense factorization of the spatial axis (free reshape, no transpose).
    if HW % 128 == 0:
        L, R = 128, HW // 128
    else:
        L, R = HW, 1
    r_t = _pick_row_tile(R, row_tile_cap)
    T = R // r_t
    grid = (N, T)
    cnt = float(N * HW)

    g4 = g_nchw.reshape(N, F_l, R, L)
    x4 = x_nchw.reshape(N, F_g, R, L)

    cparams = pltpu.CompilerParams(
        dimension_semantics=("parallel", "parallel"),     # per-tile outputs -> fully parallel
        vmem_limit_bytes=64 * 1024 * 1024,                # explicit budget; blocks sized well below
    )

    def smem():
        return pl.BlockSpec(memory_space=pltpu.MemorySpace.SMEM)

    g_spec = pl.BlockSpec((None, F_l, r_t, L), lambda n, t: (n, 0, t, 0))
    x_spec = pl.BlockSpec((None, F_g, r_t, L), lambda n, t: (n, 0, t, 0))
    p_spec = pl.BlockSpec((None, r_t, L), lambda n, t: (n, t, 0))

    # ---- pass 1: per-tile channel sums + Gram matrices --------------------
    QG = F_l * (F_l + 1)
    QX = F_g * (F_g + 1)
    sg, sx = pl.pallas_call(
        _moments_kernel,
        grid=grid,
        in_specs=[g_spec, x_spec],
        out_specs=(
            pl.BlockSpec((None, None, QG, L), lambda n, t: (n, t, 0, 0)),
            pl.BlockSpec((None, None, QX, L), lambda n, t: (n, t, 0, 0)),
        ),
        out_shape=(
            jax.ShapeDtypeStruct((N, T, QG, L), f32),
            jax.ShapeDtypeStruct((N, T, QX, L), f32),
        ),
        compiler_params=cparams,
    )(g4, x4)

    # Tiny wrapper math: derive branch-BN scale/shift per F_int channel via conv
    # linearity (conv biases cancel against the training-mode batch mean).
    wg2 = params["wg"].reshape(F_int, F_l).astype(f32)
    wx2 = params["wx"].reshape(F_int, F_g).astype(f32)
    wp1 = params["wp"].reshape(F_int).astype(f32)

    def fold_bn(tot, w2, gamma, beta, c_in):
        ssum = tot[:c_in]                                   # (c_in,)
        gram = tot[c_in:].reshape(c_in, c_in)               # (c_in, c_in)
        mean = (w2 @ ssum) / cnt                            # (F_int,)
        ex2 = jnp.einsum("oi,ij,oj->o", w2, gram, w2) / cnt
        var = jnp.maximum(ex2 - mean * mean, 0.0)           # biased variance
        scale = gamma.astype(f32) * jax.lax.rsqrt(var + _EPS)
        shift = beta.astype(f32) - mean * scale
        return scale, shift

    tot_g = jnp.sum(sg, axis=(0, 1, 3))                     # (QG,)
    tot_x = jnp.sum(sx, axis=(0, 1, 3))                     # (QX,)
    scale_g, shift_g = fold_bn(tot_g, wg2, params["gamma_g"], params["beta_g"], F_l)
    scale_x, shift_x = fold_bn(tot_x, wx2, params["gamma_x"], params["beta_x"], F_g)

    wg_eff = wg2 * scale_g[:, None]                         # BN scale folded into weights
    wx_eff = wx2 * scale_x[:, None]
    shift_s = (shift_g + shift_x).astype(f32)               # combined per-channel shift

    # ---- pass 2: psi_pre = W_psi · ReLU(g1 + x1)  (+ its stats) ------------
    psi_pre, pstats = pl.pallas_call(
        _psi_pre_kernel,
        grid=grid,
        in_specs=[g_spec, x_spec, smem(), smem(), smem(), smem()],
        out_specs=(
            p_spec,
            pl.BlockSpec((None, None, 2, L), lambda n, t: (n, t, 0, 0)),
        ),
        out_shape=(
            jax.ShapeDtypeStruct((N, R, L), f32),
            jax.ShapeDtypeStruct((N, T, 2, L), f32),
        ),
        compiler_params=cparams,
    )(g4, x4, wg_eff, wx_eff, wp1, shift_s)

    tot_p = jnp.sum(pstats, axis=(0, 1, 3))                 # (2,)
    mean_p = tot_p[0] / cnt
    var_p = jnp.maximum(tot_p[1] / cnt - mean_p * mean_p, 0.0)
    scale_p = params["gamma_p"].astype(f32) * jax.lax.rsqrt(var_p + _EPS)   # (1,)
    shift_p = params["beta_p"].astype(f32) - mean_p * scale_p               # (1,)
    sp = jnp.concatenate([scale_p, shift_p])                                # (2,)

    # ---- pass 3: psi = sigmoid(BN(psi_pre)), out = x * psi -----------------
    out4 = pl.pallas_call(
        _gate_kernel,
        grid=grid,
        in_specs=[x_spec, p_spec, smem()],
        out_specs=pl.BlockSpec((None, F_g, r_t, L), lambda n, t: (n, 0, t, 0)),
        out_shape=jax.ShapeDtypeStruct((N, F_g, R, L), f32),
        compiler_params=cparams,
    )(x4, psi_pre, sp)

    return out4.reshape(N, F_g, H, W)                       # free reshape back to NCHW


# -------------------------------- reference ----------------------------------
def _reference(g, x, p, eps=_EPS):
    """Pure-JAX reference matching the PyTorch forward (training-mode BN, with biases)."""
    def conv1x1(t, w, b):
        y = jnp.einsum("oi,nihw->nohw", w[:, :, 0, 0], t,
                       precision=jax.lax.Precision.HIGHEST)
        return y + b[None, :, None, None]

    def bn_train(t, gamma, beta):
        m = jnp.mean(t, axis=(0, 2, 3), keepdims=True)
        v = jnp.mean(jnp.square(t - m), axis=(0, 2, 3), keepdims=True)
        return (t - m) / jnp.sqrt(v + eps) * gamma[None, :, None, None] \
            + beta[None, :, None, None]

    g1 = bn_train(conv1x1(g, p["wg"], p["bg"]), p["gamma_g"], p["beta_g"])
    x1 = bn_train(conv1x1(x, p["wx"], p["bx"]), p["gamma_x"], p["beta_x"])
    s = jnp.maximum(g1 + x1, 0.0)
    ps = bn_train(conv1x1(s, p["wp"], p["bp"]), p["gamma_p"], p["beta_p"])
    ps = jax.nn.sigmoid(ps)
    return x * ps


if __name__ == "__main__":
    key = jax.random.PRNGKey(0)
    ks = jax.random.split(key, 14)

    N, F_g, F_l, F_int, H, W = 2, 4, 4, 8, 16, 16   # H*W = 256 (lane-aligned)

    g = jax.random.normal(ks[0], (N, F_l, H, W), dtype=jnp.float32)
    x = jax.random.normal(ks[1], (N, F_g, H, W), dtype=jnp.float32)

    def uinit(k, shape, fan_in):                     # nn.Conv2d-style init bound
        b = 1.0 / (fan_in ** 0.5)
        return jax.random.uniform(k, shape, jnp.float32, -b, b)

    params = dict(
        wg=uinit(ks[2], (F_int, F_l, 1, 1), F_l),
        bg=uinit(ks[3], (F_int,), F_l),
        wx=uinit(ks[4], (F_int, F_g, 1, 1), F_g),
        bx=uinit(ks[5], (F_int,), F_g),
        wp=uinit(ks[6], (1, F_int, 1, 1), F_int),
        bp=uinit(ks[7], (1,), F_int),
        # non-trivial BN affine params to exercise the full wiring
        gamma_g=jax.random.uniform(ks[8], (F_int,), jnp.float32, 0.5, 1.5),
        beta_g=jax.random.uniform(ks[9], (F_int,), jnp.float32, -0.5, 0.5),
        gamma_x=jax.random.uniform(ks[10], (F_int,), jnp.float32, 0.5, 1.5),
        beta_x=jax.random.uniform(ks[11], (F_int,), jnp.float32, -0.5, 0.5),
        gamma_p=jax.random.uniform(ks[12], (1,), jnp.float32, 0.5, 1.5),
        beta_p=jax.random.uniform(ks[13], (1,), jnp.float32, -0.5, 0.5),
    )

    fwd = jax.jit(attention_block_forward)
    out = jax.block_until_ready(fwd(g, x, params))
    assert out.shape == (N, F_g, H, W), out.shape

    ref = _reference(g, x, params)
    max_err = float(jnp.max(jnp.abs(out - ref)))
    assert jnp.allclose(out, ref, atol=1e-4, rtol=1e-4), f"max_err={max_err}"

    print("KERNEL_OK")
</pallas_src>

<mosaic_0001>
module attributes {stable_mosaic.version = 11 : i64} {
  func.func @_moments_kernel(%arg0: i32, %arg1: i32, %arg2: memref<1x4x2x128xf32, #tpu.memory_space<vmem>>, %arg3: memref<1x4x2x128xf32, #tpu.memory_space<vmem>>, %arg4: memref<1x1x20x128xf32, #tpu.memory_space<vmem>>, %arg5: memref<1x1x20x128xf32, #tpu.memory_space<vmem>>) attributes {dimension_semantics = [#tpu.dimension_semantics<parallel>, #tpu.dimension_semantics<parallel>], iteration_bounds = array<i64: 2, 1>, scalar_prefetch = 0 : i64, scratch_operands = 0 : i64, tpu.core_type = #tpu.core_type<tc>, window_params = [{transform_indices = @transform_0, window_bounds = array<i64: 1, 4, 2, 128>}, {transform_indices = @transform_1, window_bounds = array<i64: 1, 4, 2, 128>}, {transform_indices = @transform_2, window_bounds = array<i64: 1, 1, 20, 128>}, {transform_indices = @transform_3, window_bounds = array<i64: 1, 1, 20, 128>}]} {
    %c0 = arith.constant 0 : index
    %c0_0 = arith.constant 0 : index
    %c0_1 = arith.constant 0 : index
    %c0_2 = arith.constant 0 : index
    %0 = vector.load %arg2[%c0, %c0_0, %c0_1, %c0_2] : memref<1x4x2x128xf32, #tpu.memory_space<vmem>>, vector<1x1x2x128xf32>
    %1 = vector.shape_cast %0 : vector<1x1x2x128xf32> to vector<2x128xf32>
    %cst = arith.constant dense<0.000000e+00> : vector<128xf32>
    %2 = vector.multi_reduction <add>, %1, %cst [0] : vector<2x128xf32> to vector<128xf32>
    %3 = vector.shape_cast %2 : vector<128xf32> to vector<1x128xf32>
    %c0_3 = arith.constant 0 : index
    %c0_4 = arith.constant 0 : index
    %c0_5 = arith.constant 0 : index
    %c0_6 = arith.constant 0 : index
    %4 = vector.load %arg4[%c0_3, %c0_4, %c0_5, %c0_6] : memref<1x1x20x128xf32, #tpu.memory_space<vmem>>, vector<1x1x1x128xf32>
    %5 = vector.shape_cast %4 : vector<1x1x1x128xf32> to vector<1x128xf32>
    %6 = vector.shape_cast %3 : vector<1x128xf32> to vector<1x1x1x128xf32>
    tpu.vector_store %arg4[%c0_3, %c0_4, %c0_5, %c0_6], %6 {strides = array<i32>} : memref<1x1x20x128xf32, #tpu.memory_space<vmem>>, vector<1x1x1x128xf32>,
    %c0_7 = arith.constant 0 : index
    %c0_8 = arith.constant 0 : index
    %c0_9 = arith.constant 0 : index
    %c0_10 = arith.constant 0 : index
    %7 = vector.load %arg2[%c0_7, %c0_8, %c0_9, %c0_10] : memref<1x4x2x128xf32, #tpu.memory_space<vmem>>, vector<1x1x2x128xf32>
    %8 = vector.shape_cast %7 : vector<1x1x2x128xf32> to vector<2x128xf32>
    %9 = arith.mulf %1, %8 : vector<2x128xf32>
    %cst_11 = arith.constant dense<0.000000e+00> : vector<128xf32>
    %10 = vector.multi_reduction <add>, %9, %cst_11 [0] : vector<2x128xf32> to vector<128xf32>
    %11 = vector.shape_cast %10 : vector<128xf32> to vector<1x128xf32>
    %c0_12 = arith.constant 0 : index
    %c0_13 = arith.constant 0 : index
    %c4 = arith.constant 4 : index
    %c0_14 = arith.constant 0 : index
    %12 = vector.load %arg4[%c0_12, %c0_13, %c4, %c0_14] : memref<1x1x20x128xf32, #tpu.memory_space<vmem>>, vector<1x1x1x128xf32>
    %13 = vector.shape_cast %12 : vector<1x1x1x128xf32> to vector<1x128xf32>
    %14 = vector.shape_cast %11 : vector<1x128xf32> to vector<1x1x1x128xf32>
    tpu.vector_store %arg4[%c0_12, %c0_13, %c4, %c0_14], %14 {strides = array<i32>} : memref<1x1x20x128xf32, #tpu.memory_space<vmem>>, vector<1x1x1x128xf32>,
    %c0_15 = arith.constant 0 : index
    %c1 = arith.constant 1 : index
    %c0_16 = arith.constant 0 : index
    %c0_17 = arith.constant 0 : index
    %15 = vector.load %arg2[%c0_15, %c1, %c0_16, %c0_17] : memref<1x4x2x128xf32, #tpu.memory_space<vmem>>, vector<1x1x2x128xf32>
    %16 = vector.shape_cast %15 : vector<1x1x2x128xf32> to vector<2x128xf32>
    %17 = arith.mulf %1, %16 : vector<2x128xf32>
    %cst_18 = arith.constant dense<0.000000e+00> : vector<128xf32>
    %18 = vector.multi_reduction <add>, %17, %cst_18 [0] : vector<2x128xf32> to vector<128xf32>
    %19 = vector.shape_cast %18 : vector<128xf32> to vector<1x128xf32>
    %c0_19 = arith.constant 0 : index
    %c0_20 = arith.constant 0 : index
    %c5 = arith.constant 5 : index
    %c0_21 = arith.constant 0 : index
    %20 = vector.load %arg4[%c0_19, %c0_20, %c5, %c0_21] : memref<1x1x20x128xf32, #tpu.memory_space<vmem>>, vector<1x1x1x128xf32>
    %21 = vector.shape_cast %20 : vector<1x1x1x128xf32> to vector<1x128xf32>
    %22 = vector.shape_cast %19 : vector<1x128xf32> to vector<1x1x1x128xf32>
    tpu.vector_store %arg4[%c0_19, %c0_20, %c5, %c0_21], %22 {strides = array<i32>} : memref<1x1x20x128xf32, #tpu.memory_space<vmem>>, vector<1x1x1x128xf32>,
    %c0_22 = arith.constant 0 : index
    %c2 = arith.constant 2 : index
    %c0_23 = arith.constant 0 : index
    %c0_24 = arith.constant 0 : index
    %23 = vector.load %arg2[%c0_22, %c2, %c0_23, %c0_24] : memref<1x4x2x128xf32, #tpu.memory_space<vmem>>, vector<1x1x2x128xf32>
    %24 = vector.shape_cast %23 : vector<1x1x2x128xf32> to vector<2x128xf32>
    %25 = arith.mulf %1, %24 : vector<2x128xf32>
    %cst_25 = arith.constant dense<0.000000e+00> : vector<128xf32>
    %26 = vector.multi_reduction <add>, %25, %cst_25 [0] : vector<2x128xf32> to vector<128xf32>
    %27 = vector.shape_cast %26 : vector<128xf32> to vector<1x128xf32>
    %c0_26 = arith.constant 0 : index
    %c0_27 = arith.constant 0 : index
    %c6 = arith.constant 6 : index
    %c0_28 = arith.constant 0 : index
    %28 = vector.load %arg4[%c0_26, %c0_27, %c6, %c0_28] : memref<1x1x20x128xf32, #tpu.memory_space<vmem>>, vector<1x1x1x128xf32>
    %29 = vector.shape_cast %28 : vector<1x1x1x128xf32> to vector<1x128xf32>
    %30 = vector.shape_cast %27 : vector<1x128xf32> to vector<1x1x1x128xf32>
    tpu.vector_store %arg4[%c0_26, %c0_27, %c6, %c0_28], %30 {strides = array<i32>} : memref<1x1x20x128xf32, #tpu.memory_space<vmem>>, vector<1x1x1x128xf32>,
    %c0_29 = arith.constant 0 : index
    %c3 = arith.constant 3 : index
    %c0_30 = arith.constant 0 : index
    %c0_31 = arith.constant 0 : index
    %31 = vector.load %arg2[%c0_29, %c3, %c0_30, %c0_31] : memref<1x4x2x128xf32, #tpu.memory_space<vmem>>, vector<1x1x2x128xf32>
    %32 = vector.shape_cast %31 : vector<1x1x2x128xf32> to vector<2x128xf32>
    %33 = arith.mulf %1, %32 : vector<2x128xf32>
    %cst_32 = arith.constant dense<0.000000e+00> : vector<128xf32>
    %34 = vector.multi_reduction <add>, %33, %cst_32 [0] : vector<2x128xf32> to vector<128xf32>
    %35 = vector.shape_cast %34 : vector<128xf32> to vector<1x128xf32>
    %c0_33 = arith.constant 0 : index
    %c0_34 = arith.constant 0 : index
    %c7 = arith.constant 7 : index
    %c0_35 = arith.constant 0 : index
    %36 = vector.load %arg4[%c0_33, %c0_34, %c7, %c0_35] : memref<1x1x20x128xf32, #tpu.memory_space<vmem>>, vector<1x1x1x128xf32>
    %37 = vector.shape_cast %36 : vector<1x1x1x128xf32> to vector<1x128xf32>
    %38 = vector.shape_cast %35 : vector<1x128xf32> to vector<1x1x1x128xf32>
    tpu.vector_store %arg4[%c0_33, %c0_34, %c7, %c0_35], %38 {strides = array<i32>} : memref<1x1x20x128xf32, #tpu.memory_space<vmem>>, vector<1x1x1x128xf32>,
    %c0_36 = arith.constant 0 : index
    %c1_37 = arith.constant 1 : index
    %c0_38 = arith.constant 0 : index
    %c0_39 = arith.constant 0 : index
    %39 = vector.load %arg2[%c0_36, %c1_37, %c0_38, %c0_39] : memref<1x4x2x128xf32, #tpu.memory_space<vmem>>, vector<1x1x2x128xf32>
    %40 = vector.shape_cast %39 : vector<1x1x2x128xf32> to vector<2x128xf32>
    %cst_40 = arith.constant dense<0.000000e+00> : vector<128xf32>
    %41 = vector.multi_reduction <add>, %40, %cst_40 [0] : vector<2x128xf32> to vector<128xf32>
    %42 = vector.shape_cast %41 : vector<128xf32> to vector<1x128xf32>
    %c0_41 = arith.constant 0 : index
    %c0_42 = arith.constant 0 : index
    %c1_43 = arith.constant 1 : index
    %c0_44 = arith.constant 0 : index
    %43 = vector.load %arg4[%c0_41, %c0_42, %c1_43, %c0_44] : memref<1x1x20x128xf32, #tpu.memory_space<vmem>>, vector<1x1x1x128xf32>
    %44 = vector.shape_cast %43 : vector<1x1x1x128xf32> to vector<1x128xf32>
    %45 = vector.shape_cast %42 : vector<1x128xf32> to vector<1x1x1x128xf32>
    tpu.vector_store %arg4[%c0_41, %c0_42, %c1_43, %c0_44], %45 {strides = array<i32>} : memref<1x1x20x128xf32, #tpu.memory_space<vmem>>, vector<1x1x1x128xf32>,
    %c0_45 = arith.constant 0 : index
    %c0_46 = arith.constant 0 : index
    %c0_47 = arith.constant 0 : index
    %c0_48 = arith.constant 0 : index
    %46 = vector.load %arg2[%c0_45, %c0_46, %c0_47, %c0_48] : memref<1x4x2x128xf32, #tpu.memory_space<vmem>>, vector<1x1x2x128xf32>
    %47 = vector.shape_cast %46 : vector<1x1x2x128xf32> to vector<2x128xf32>
    %48 = arith.mulf %40, %47 : vector<2x128xf32>
    %cst_49 = arith.constant dense<0.000000e+00> : vector<128xf32>
    %49 = vector.multi_reduction <add>, %48, %cst_49 [0] : vector<2x128xf32> to vector<128xf32>
    %50 = vector.shape_cast %49 : vector<128xf32> to vector<1x128xf32>
    %c0_50 = arith.constant 0 : index
    %c0_51 = arith.constant 0 : index
    %c8 = arith.constant 8 : index
    %c0_52 = arith.constant 0 : index
    %51 = vector.load %arg4[%c0_50, %c0_51, %c8, %c0_52] : memref<1x1x20x128xf32, #tpu.memory_space<vmem>>, vector<1x1x1x128xf32>
    %52 = vector.shape_cast %51 : vector<1x1x1x128xf32> to vector<1x128xf32>
    %53 = vector.shape_cast %50 : vector<1x128xf32> to vector<1x1x1x128xf32>
    tpu.vector_store %arg4[%c0_50, %c0_51, %c8, %c0_52], %53 {strides = array<i32>} : memref<1x1x20x128xf32, #tpu.memory_space<vmem>>, vector<1x1x1x128xf32>,
    %c0_53 = arith.constant 0 : index
    %c1_54 = arith.constant 1 : index
    %c0_55 = arith.constant 0 : index
    %c0_56 = arith.constant 0 : index
    %54 = vector.load %arg2[%c0_53, %c1_54, %c0_55, %c0_56] : memref<1x4x2x128xf32, #tpu.memory_space<vmem>>, vector<1x1x2x128xf32>
    %55 = vector.shape_cast %54 : vector<1x1x2x128xf32> to vector<2x128xf32>
    %56 = arith.mulf %40, %55 : vector<2x128xf32>
    %cst_57 = arith.constant dense<0.000000e+00> : vector<128xf32>
    %57 = vector.multi_reduction <add>, %56, %cst_57 [0] : vector<2x128xf32> to vector<128xf32>
    %58 = vector.shape_cast %57 : vector<128xf32> to vector<1x128xf32>
    %c0_58 = arith.constant 0 : index
    %c0_59 = arith.constant 0 : index
    %c9 = arith.constant 9 : index
    %c0_60 = arith.constant 0 : index
    %59 = vector.load %arg4[%c0_58, %c0_59, %c9, %c0_60] : memref<1x1x20x128xf32, #tpu.memory_space<vmem>>, vector<1x1x1x128xf32>
    %60 = vector.shape_cast %59 : vector<1x1x1x128xf32> to vector<1x128xf32>
    %61 = vector.shape_cast %58 : vector<1x128xf32> to vector<1x1x1x128xf32>
    tpu.vector_store %arg4[%c0_58, %c0_59, %c9, %c0_60], %61 {strides = array<i32>} : memref<1x1x20x128xf32, #tpu.memory_space<vmem>>, vector<1x1x1x128xf32>,
    %c0_61 = arith.constant 0 : index
    %c2_62 = arith.constant 2 : index
    %c0_63 = arith.constant 0 : index
    %c0_64 = arith.constant 0 : index
    %62 = vector.load %arg2[%c0_61, %c2_62, %c0_63, %c0_64] : memref<1x4x2x128xf32, #tpu.memory_space<vmem>>, vector<1x1x2x128xf32>
    %63 = vector.shape_cast %62 : vector<1x1x2x128xf32> to vector<2x128xf32>
    %64 = arith.mulf %40, %63 : vector<2x128xf32>
    %cst_65 = arith.constant dense<0.000000e+00> : vector<128xf32>
    %65 = vector.multi_reduction <add>, %64, %cst_65 [0] : vector<2x128xf32> to vector<128xf32>
    %66 = vector.shape_cast %65 : vector<128xf32> to vector<1x128xf32>
    %c0_66 = arith.constant 0 : index
    %c0_67 = arith.constant 0 : index
    %c10 = arith.constant 10 : index
    %c0_68 = arith.constant 0 : index
    %67 = vector.load %arg4[%c0_66, %c0_67, %c10, %c0_68] : memref<1x1x20x128xf32, #tpu.memory_space<vmem>>, vector<1x1x1x128xf32>
    %68 = vector.shape_cast %67 : vector<1x1x1x128xf32> to vector<1x128xf32>
    %69 = vector.shape_cast %66 : vector<1x128xf32> to vector<1x1x1x128xf32>
    tpu.vector_store %arg4[%c0_66, %c0_67, %c10, %c0_68], %69 {strides = array<i32>} : memref<1x1x20x128xf32, #tpu.memory_space<vmem>>, vector<1x1x1x128xf32>,
    %c0_69 = arith.constant 0 : index
    %c3_70 = arith.constant 3 : index
    %c0_71 = arith.constant 0 : index
    %c0_72 = arith.constant 0 : index
    %70 = vector.load %arg2[%c0_69, %c3_70, %c0_71, %c0_72] : memref<1x4x2x128xf32, #tpu.memory_space<vmem>>, vector<1x1x2x128xf32>
    %71 = vector.shape_cast %70 : vector<1x1x2x128xf32> to vector<2x128xf32>
    %72 = arith.mulf %40, %71 : vector<2x128xf32>
    %cst_73 = arith.constant dense<0.000000e+00> : vector<128xf32>
    %73 = vector.multi_reduction <add>, %72, %cst_73 [0] : vector<2x128xf32> to vector<128xf32>
    %74 = vector.shape_cast %73 : vector<128xf32> to vector<1x128xf32>
    %c0_74 = arith.constant 0 : index
    %c0_75 = arith.constant 0 : index
    %c11 = arith.constant 11 : index
    %c0_76 = arith.constant 0 : index
    %75 = vector.load %arg4[%c0_74, %c0_75, %c11, %c0_76] : memref<1x1x20x128xf32, #tpu.memory_space<vmem>>, vector<1x1x1x128xf32>
    %76 = vector.shape_cast %75 : vector<1x1x1x128xf32> to vector<1x128xf32>
    %77 = vector.shape_cast %74 : vector<1x128xf32> to vector<1x1x1x128xf32>
    tpu.vector_store %arg4[%c0_74, %c0_75, %c11, %c0_76], %77 {strides = array<i32>} : memref<1x1x20x128xf32, #tpu.memory_space<vmem>>, vector<1x1x1x128xf32>,
    %c0_77 = arith.constant 0 : index
    %c2_78 = arith.constant 2 : index
    %c0_79 = arith.constant 0 : index
    %c0_80 = arith.constant 0 : index
    %78 = vector.load %arg2[%c0_77, %c2_78, %c0_79, %c0_80] : memref<1x4x2x128xf32, #tpu.memory_space<vmem>>, vector<1x1x2x128xf32>
    %79 = vector.shape_cast %78 : vector<1x1x2x128xf32> to vector<2x128xf32>
    %cst_81 = arith.constant dense<0.000000e+00> : vector<128xf32>
    %80 = vector.multi_reduction <add>, %79, %cst_81 [0] : vector<2x128xf32> to vector<128xf32>
    %81 = vector.shape_cast %80 : vector<128xf32> to vector<1x128xf32>
    %c0_82 = arith.constant 0 : index
    %c0_83 = arith.constant 0 : index
    %c2_84 = arith.constant 2 : index
    %c0_85 = arith.constant 0 : index
    %82 = vector.load %arg4[%c0_82, %c0_83, %c2_84, %c0_85] : memref<1x1x20x128xf32, #tpu.memory_space<vmem>>, vector<1x1x1x128xf32>
    %83 = vector.shape_cast %82 : vector<1x1x1x128xf32> to vector<1x128xf32>
    %84 = vector.shape_cast %81 : vector<1x128xf32> to vector<1x1x1x128xf32>
    tpu.vector_store %arg4[%c0_82, %c0_83, %c2_84, %c0_85], %84 {strides = array<i32>} : memref<1x1x20x128xf32, #tpu.memory_space<vmem>>, vector<1x1x1x128xf32>,
    %c0_86 = arith.constant 0 : index
    %c0_87 = arith.constant 0 : index
    %c0_88 = arith.constant 0 : index
    %c0_89 = arith.constant 0 : index
    %85 = vector.load %arg2[%c0_86, %c0_87, %c0_88, %c0_89] : memref<1x4x2x128xf32, #tpu.memory_space<vmem>>, vector<1x1x2x128xf32>
    %86 = vector.shape_cast %85 : vector<1x1x2x128xf32> to vector<2x128xf32>
    %87 = arith.mulf %79, %86 : vector<2x128xf32>
    %cst_90 = arith.constant dense<0.000000e+00> : vector<128xf32>
    %88 = vector.multi_reduction <add>, %87, %cst_90 [0] : vector<2x128xf32> to vector<128xf32>
    %89 = vector.shape_cast %88 : vector<128xf32> to vector<1x128xf32>
    %c0_91 = arith.constant 0 : index
    %c0_92 = arith.constant 0 : index
    %c12 = arith.constant 12 : index
    %c0_93 = arith.constant 0 : index
    %90 = vector.load %arg4[%c0_91, %c0_92, %c12, %c0_93] : memref<1x1x20x128xf32, #tpu.memory_space<vmem>>, vector<1x1x1x128xf32>
    %91 = vector.shape_cast %90 : vector<1x1x1x128xf32> to vector<1x128xf32>
    %92 = vector.shape_cast %89 : vector<1x128xf32> to vector<1x1x1x128xf32>
    tpu.vector_store %arg4[%c0_91, %c0_92, %c12, %c0_93], %92 {strides = array<i32>} : memref<1x1x20x128xf32, #tpu.memory_space<vmem>>, vector<1x1x1x128xf32>,
    %c0_94 = arith.constant 0 : index
    %c1_95 = arith.constant 1 : index
    %c0_96 = arith.constant 0 : index
    %c0_97 = arith.constant 0 : index
    %93 = vector.load %arg2[%c0_94, %c1_95, %c0_96, %c0_97] : memref<1x4x2x128xf32, #tpu.memory_space<vmem>>, vector<1x1x2x128xf32>
    %94 = vector.shape_cast %93 : vector<1x1x2x128xf32> to vector<2x128xf32>
    %95 = arith.mulf %79, %94 : vector<2x128xf32>
    %cst_98 = arith.constant dense<0.000000e+00> : vector<128xf32>
    %96 = vector.multi_reduction <add>, %95, %cst_98 [0] : vector<2x128xf32> to vector<128xf32>
    %97 = vector.shape_cast %96 : vector<128xf32> to vector<1x128xf32>
    %c0_99 = arith.constant 0 : index
    %c0_100 = arith.constant 0 : index
    %c13 = arith.constant 13 : index
    %c0_101 = arith.constant 0 : index
    %98 = vector.load %arg4[%c0_99, %c0_100, %c13, %c0_101] : memref<1x1x20x128xf32, #tpu.memory_space<vmem>>, vector<1x1x1x128xf32>
    %99 = vector.shape_cast %98 : vector<1x1x1x128xf32> to vector<1x128xf32>
    %100 = vector.shape_cast %97 : vector<1x128xf32> to vector<1x1x1x128xf32>
    tpu.vector_store %arg4[%c0_99, %c0_100, %c13, %c0_101], %100 {strides = array<i32>} : memref<1x1x20x128xf32, #tpu.memory_space<vmem>>, vector<1x1x1x128xf32>,
    %c0_102 = arith.constant 0 : index
    %c2_103 = arith.constant 2 : index
    %c0_104 = arith.constant 0 : index
    %c0_105 = arith.constant 0 : index
    %101 = vector.load %arg2[%c0_102, %c2_103, %c0_104, %c0_105] : memref<1x4x2x128xf32, #tpu.memory_space<vmem>>, vector<1x1x2x128xf32>
    %102 = vector.shape_cast %101 : vector<1x1x2x128xf32> to vector<2x128xf32>
    %103 = arith.mulf %79, %102 : vector<2x128xf32>
    %cst_106 = arith.constant dense<0.000000e+00> : vector<128xf32>
    %104 = vector.multi_reduction <add>, %103, %cst_106 [0] : vector<2x128xf32> to vector<128xf32>
    %105 = vector.shape_cast %104 : vector<128xf32> to vector<1x128xf32>
    %c0_107 = arith.constant 0 : index
    %c0_108 = arith.constant 0 : index
    %c14 = arith.constant 14 : index
    %c0_109 = arith.constant 0 : index
    %106 = vector.load %arg4[%c0_107, %c0_108, %c14, %c0_109] : memref<1x1x20x128xf32, #tpu.memory_space<vmem>>, vector<1x1x1x128xf32>
    %107 = vector.shape_cast %106 : vector<1x1x1x128xf32> to vector<1x128xf32>
    %108 = vector.shape_cast %105 : vector<1x128xf32> to vector<1x1x1x128xf32>
    tpu.vector_store %arg4[%c0_107, %c0_108, %c14, %c0_109], %108 {strides = array<i32>} : memref<1x1x20x128xf32, #tpu.memory_space<vmem>>, vector<1x1x1x128xf32>,
    %c0_110 = arith.constant 0 : index
    %c3_111 = arith.constant 3 : index
    %c0_112 = arith.constant 0 : index
    %c0_113 = arith.constant 0 : index
    %109 = vector.load %arg2[%c0_110, %c3_111, %c0_112, %c0_113] : memref<1x4x2x128xf32, #tpu.memory_space<vmem>>, vector<1x1x2x128xf32>
    %110 = vector.shape_cast %109 : vector<1x1x2x128xf32> to vector<2x128xf32>
    %111 = arith.mulf %79, %110 : vector<2x128xf32>
    %cst_114 = arith.constant dense<0.000000e+00> : vector<128xf32>
    %112 = vector.multi_reduction <add>, %111, %cst_114 [0] : vector<2x128xf32> to vector<128xf32>
    %113 = vector.shape_cast %112 : vector<128xf32> to vector<1x128xf32>
    %c0_115 = arith.constant 0 : index
    %c0_116 = arith.constant 0 : index
    %c15 = arith.constant 15 : index
    %c0_117 = arith.constant 0 : index
    %114 = vector.load %arg4[%c0_115, %c0_116, %c15, %c0_117] : memref<1x1x20x128xf32, #tpu.memory_space<vmem>>, vector<1x1x1x128xf32>
    %115 = vector.shape_cast %114 : vector<1x1x1x128xf32> to vector<1x128xf32>
    %116 = vector.shape_cast %113 : vector<1x128xf32> to vector<1x1x1x128xf32>
    tpu.vector_store %arg4[%c0_115, %c0_116, %c15, %c0_117], %116 {strides = array<i32>} : memref<1x1x20x128xf32, #tpu.memory_space<vmem>>, vector<1x1x1x128xf32>,
    %c0_118 = arith.constant 0 : index
    %c3_119 = arith.constant 3 : index
    %c0_120 = arith.constant 0 : index
    %c0_121 = arith.constant 0 : index
    %117 = vector.load %arg2[%c0_118, %c3_119, %c0_120, %c0_121] : memref<1x4x2x128xf32, #tpu.memory_space<vmem>>, vector<1x1x2x128xf32>
    %118 = vector.shape_cast %117 : vector<1x1x2x128xf32> to vector<2x128xf32>
    %cst_122 = arith.constant dense<0.000000e+00> : vector<128xf32>
    %119 = vector.multi_reduction <add>, %118, %cst_122 [0] : vector<2x128xf32> to vector<128xf32>
    %120 = vector.shape_cast %119 : vector<128xf32> to vector<1x128xf32>
    %c0_123 = arith.constant 0 : index
    %c0_124 = arith.constant 0 : index
    %c3_125 = arith.constant 3 : index
    %c0_126 = arith.constant 0 : index
    %121 = vector.load %arg4[%c0_123, %c0_124, %c3_125, %c0_126] : memref<1x1x20x128xf32, #tpu.memory_space<vmem>>, vector<1x1x1x128xf32>
    %122 = vector.shape_cast %121 : vector<1x1x1x128xf32> to vector<1x128xf32>
    %123 = vector.shape_cast %120 : vector<1x128xf32> to vector<1x1x1x128xf32>
    tpu.vector_store %arg4[%c0_123, %c0_124, %c3_125, %c0_126], %123 {strides = array<i32>} : memref<1x1x20x128xf32, #tpu.memory_space<vmem>>, vector<1x1x1x128xf32>,
    %c0_127 = arith.constant 0 : index
    %c0_128 = arith.constant 0 : index
    %c0_129 = arith.constant 0 : index
    %c0_130 = arith.constant 0 : index
    %124 = vector.load %arg2[%c0_127, %c0_128, %c0_129, %c0_130] : memref<1x4x2x128xf32, #tpu.memory_space<vmem>>, vector<1x1x2x128xf32>
    %125 = vector.shape_cast %124 : vector<1x1x2x128xf32> to vector<2x128xf32>
    %126 = arith.mulf %118, %125 : vector<2x128xf32>
    %cst_131 = arith.constant dense<0.000000e+00> : vector<128xf32>
    %127 = vector.multi_reduction <add>, %126, %cst_131 [0] : vector<2x128xf32> to vector<128xf32>
    %128 = vector.shape_cast %127 : vector<128xf32> to vector<1x128xf32>
    %c0_132 = arith.constant 0 : index
    %c0_133 = arith.constant 0 : index
    %c16 = arith.constant 16 : index
    %c0_134 = arith.constant 0 : index
    %129 = vector.load %arg4[%c0_132, %c0_133, %c16, %c0_134] : memref<1x1x20x128xf32, #tpu.memory_space<vmem>>, vector<1x1x1x128xf32>
    %130 = vector.shape_cast %129 : vector<1x1x1x128xf32> to vector<1x128xf32>
    %131 = vector.shape_cast %128 : vector<1x128xf32> to vector<1x1x1x128xf32>
    tpu.vector_store %arg4[%c0_132, %c0_133, %c16, %c0_134], %131 {strides = array<i32>} : memref<1x1x20x128xf32, #tpu.memory_space<vmem>>, vector<1x1x1x128xf32>,
    %c0_135 = arith.constant 0 : index
    %c1_136 = arith.constant 1 : index
    %c0_137 = arith.constant 0 : index
    %c0_138 = arith.constant 0 : index
    %132 = vector.load %arg2[%c0_135, %c1_136, %c0_137, %c0_138] : memref<1x4x2x128xf32, #tpu.memory_space<vmem>>, vector<1x1x2x128xf32>
    %133 = vector.shape_cast %132 : vector<1x1x2x128xf32> to vector<2x128xf32>
    %134 = arith.mulf %118, %133 : vector<2x128xf32>
    %cst_139 = arith.constant dense<0.000000e+00> : vector<128xf32>
    %135 = vector.multi_reduction <add>, %134, %cst_139 [0] : vector<2x128xf32> to vector<128xf32>
    %136 = vector.shape_cast %135 : vector<128xf32> to vector<1x128xf32>
    %c0_140 = arith.constant 0 : index
    %c0_141 = arith.constant 0 : index
    %c17 = arith.constant 17 : index
    %c0_142 = arith.constant 0 : index
    %137 = vector.load %arg4[%c0_140, %c0_141, %c17, %c0_142] : memref<1x1x20x128xf32, #tpu.memory_space<vmem>>, vector<1x1x1x128xf32>
    %138 = vector.shape_cast %137 : vector<1x1x1x128xf32> to vector<1x128xf32>
    %139 = vector.shape_cast %136 : vector<1x128xf32> to vector<1x1x1x128xf32>
    tpu.vector_store %arg4[%c0_140, %c0_141, %c17, %c0_142], %139 {strides = array<i32>} : memref<1x1x20x128xf32, #tpu.memory_space<vmem>>, vector<1x1x1x128xf32>,
    %c0_143 = arith.constant 0 : index
    %c2_144 = arith.constant 2 : index
    %c0_145 = arith.constant 0 : index
    %c0_146 = arith.constant 0 : index
    %140 = vector.load %arg2[%c0_143, %c2_144, %c0_145, %c0_146] : memref<1x4x2x128xf32, #tpu.memory_space<vmem>>, vector<1x1x2x128xf32>
    %141 = vector.shape_cast %140 : vector<1x1x2x128xf32> to vector<2x128xf32>
    %142 = arith.mulf %118, %141 : vector<2x128xf32>
    %cst_147 = arith.constant dense<0.000000e+00> : vector<128xf32>
    %143 = vector.multi_reduction <add>, %142, %cst_147 [0] : vector<2x128xf32> to vector<128xf32>
    %144 = vector.shape_cast %143 : vector<128xf32> to vector<1x128xf32>
    %c0_148 = arith.constant 0 : index
    %c0_149 = arith.constant 0 : index
    %c18 = arith.constant 18 : index
    %c0_150 = arith.constant 0 : index
    %145 = vector.load %arg4[%c0_148, %c0_149, %c18, %c0_150] : memref<1x1x20x128xf32, #tpu.memory_space<vmem>>, vector<1x1x1x128xf32>
    %146 = vector.shape_cast %145 : vector<1x1x1x128xf32> to vector<1x128xf32>
    %147 = vector.shape_cast %144 : vector<1x128xf32> to vector<1x1x1x128xf32>
    tpu.vector_store %arg4[%c0_148, %c0_149, %c18, %c0_150], %147 {strides = array<i32>} : memref<1x1x20x128xf32, #tpu.memory_space<vmem>>, vector<1x1x1x128xf32>,
    %c0_151 = arith.constant 0 : index
    %c3_152 = arith.constant 3 : index
    %c0_153 = arith.constant 0 : index
    %c0_154 = arith.constant 0 : index
    %148 = vector.load %arg2[%c0_151, %c3_152, %c0_153, %c0_154] : memref<1x4x2x128xf32, #tpu.memory_space<vmem>>, vector<1x1x2x128xf32>
    %149 = vector.shape_cast %148 : vector<1x1x2x128xf32> to vector<2x128xf32>
    %150 = arith.mulf %118, %149 : vector<2x128xf32>
    %cst_155 = arith.constant dense<0.000000e+00> : vector<128xf32>
    %151 = vector.multi_reduction <add>, %150, %cst_155 [0] : vector<2x128xf32> to vector<128xf32>
    %152 = vector.shape_cast %151 : vector<128xf32> to vector<1x128xf32>
    %c0_156 = arith.constant 0 : index
    %c0_157 = arith.constant 0 : index
    %c19 = arith.constant 19 : index
    %c0_158 = arith.constant 0 : index
    %153 = vector.load %arg4[%c0_156, %c0_157, %c19, %c0_158] : memref<1x1x20x128xf32, #tpu.memory_space<vmem>>, vector<1x1x1x128xf32>
    %154 = vector.shape_cast %153 : vector<1x1x1x128xf32> to vector<1x128xf32>
    %155 = vector.shape_cast %152 : vector<1x128xf32> to vector<1x1x1x128xf32>
    tpu.vector_store %arg4[%c0_156, %c0_157, %c19, %c0_158], %155 {strides = array<i32>} : memref<1x1x20x128xf32, #tpu.memory_space<vmem>>, vector<1x1x1x128xf32>,
    %c0_159 = arith.constant 0 : index
    %c0_160 = arith.constant 0 : index
    %c0_161 = arith.constant 0 : index
    %c0_162 = arith.constant 0 : index
    %156 = vector.load %arg3[%c0_159, %c0_160, %c0_161, %c0_162] : memref<1x4x2x128xf32, #tpu.memory_space<vmem>>, vector<1x1x2x128xf32>
    %157 = vector.shape_cast %156 : vector<1x1x2x128xf32> to vector<2x128xf32>
    %cst_163 = arith.constant dense<0.000000e+00> : vector<128xf32>
    %158 = vector.multi_reduction <add>, %157, %cst_163 [0] : vector<2x128xf32> to vector<128xf32>
    %159 = vector.shape_cast %158 : vector<128xf32> to vector<1x128xf32>
    %c0_164 = arith.constant 0 : index
    %c0_165 = arith.constant 0 : index
    %c0_166 = arith.constant 0 : index
    %c0_167 = arith.constant 0 : index
    %160 = vector.load %arg5[%c0_164, %c0_165, %c0_166, %c0_167] : memref<1x1x20x128xf32, #tpu.memory_space<vmem>>, vector<1x1x1x128xf32>
    %161 = vector.shape_cast %160 : vector<1x1x1x128xf32> to vector<1x128xf32>
    %162 = vector.shape_cast %159 : vector<1x128xf32> to vector<1x1x1x128xf32>
    tpu.vector_store %arg5[%c0_164, %c0_165, %c0_166, %c0_167], %162 {strides = array<i32>} : memref<1x1x20x128xf32, #tpu.memory_space<vmem>>, vector<1x1x1x128xf32>,
    %c0_168 = arith.constant 0 : index
    %c0_169 = arith.constant 0 : index
    %c0_170 = arith.constant 0 : index
    %c0_171 = arith.constant 0 : index
    %163 = vector.load %arg3[%c0_168, %c0_169, %c0_170, %c0_171] : memref<1x4x2x128xf32, #tpu.memory_space<vmem>>, vector<1x1x2x128xf32>
    %164 = vector.shape_cast %163 : vector<1x1x2x128xf32> to vector<2x128xf32>
    %165 = arith.mulf %157, %164 : vector<2x128xf32>
    %cst_172 = arith.constant dense<0.000000e+00> : vector<128xf32>
    %166 = vector.multi_reduction <add>, %165, %cst_172 [0] : vector<2x128xf32> to vector<128xf32>
    %167 = vector.shape_cast %166 : vector<128xf32> to vector<1x128xf32>
    %c0_173 = arith.constant 0 : index
    %c0_174 = arith.constant 0 : index
    %c4_175 = arith.constant 4 : index
    %c0_176 = arith.constant 0 : index
    %168 = vector.load %arg5[%c0_173, %c0_174, %c4_175, %c0_176] : memref<1x1x20x128xf32, #tpu.memory_space<vmem>>, vector<1x1x1x128xf32>
    %169 = vector.shape_cast %168 : vector<1x1x1x128xf32> to vector<1x128xf32>
    %170 = vector.shape_cast %167 : vector<1x128xf32> to vector<1x1x1x128xf32>
    tpu.vector_store %arg5[%c0_173, %c0_174, %c4_175, %c0_176], %170 {strides = array<i32>} : memref<1x1x20x128xf32, #tpu.memory_space<vmem>>, vector<1x1x1x128xf32>,
    %c0_177 = arith.constant 0 : index
    %c1_178 = arith.constant 1 : index
    %c0_179 = arith.constant 0 : index
    %c0_180 = arith.constant 0 : index
    %171 = vector.load %arg3[%c0_177, %c1_178, %c0_179, %c0_180] : memref<1x4x2x128xf32, #tpu.memory_space<vmem>>, vector<1x1x2x128xf32>
    %172 = vector.shape_cast %171 : vector<1x1x2x128xf32> to vector<2x128xf32>
    %173 = arith.mulf %157, %172 : vector<2x128xf32>
    %cst_181 = arith.constant dense<0.000000e+00> : vector<128xf32>
    %174 = vector.multi_reduction <add>, %173, %cst_181 [0] : vector<2x128xf32> to vector<128xf32>
    %175 = vector.shape_cast %174 : vector<128xf32> to vector<1x128xf32>
    %c0_182 = arith.constant 0 : index
    %c0_183 = arith.constant 0 : index
    %c5_184 = arith.constant 5 : index
    %c0_185 = arith.constant 0 : index
    %176 = vector.load %arg5[%c0_182, %c0_183, %c5_184, %c0_185] : memref<1x1x20x128xf32, #tpu.memory_space<vmem>>, vector<1x1x1x128xf32>
    %177 = vector.shape_cast %176 : vector<1x1x1x128xf32> to vector<1x128xf32>
    %178 = vector.shape_cast %175 : vector<1x128xf32> to vector<1x1x1x128xf32>
    tpu.vector_store %arg5[%c0_182, %c0_183, %c5_184, %c0_185], %178 {strides = array<i32>} : memref<1x1x20x128xf32, #tpu.memory_space<vmem>>, vector<1x1x1x128xf32>,
    %c0_186 = arith.constant 0 : index
    %c2_187 = arith.constant 2 : index
    %c0_188 = arith.constant 0 : index
    %c0_189 = arith.constant 0 : index
    %179 = vector.load %arg3[%c0_186, %c2_187, %c0_188, %c0_189] : memref<1x4x2x128xf32, #tpu.memory_space<vmem>>, vector<1x1x2x128xf32>
    %180 = vector.shape_cast %179 : vector<1x1x2x128xf32> to vector<2x128xf32>
    %181 = arith.mulf %157, %180 : vector<2x128xf32>
    %cst_190 = arith.constant dense<0.000000e+00> : vector<128xf32>
    %182 = vector.multi_reduction <add>, %181, %cst_190 [0] : vector<2x128xf32> to vector<128xf32>
    %183 = vector.shape_cast %182 : vector<128xf32> to vector<1x128xf32>
    %c0_191 = arith.constant 0 : index
    %c0_192 = arith.constant 0 : index
    %c6_193 = arith.constant 6 : index
    %c0_194 = arith.constant 0 : index
    %184 = vector.load %arg5[%c0_191, %c0_192, %c6_193, %c0_194] : memref<1x1x20x128xf32, #tpu.memory_space<vmem>>, vector<1x1x1x128xf32>
    %185 = vector.shape_cast %184 : vector<1x1x1x128xf32> to vector<1x128xf32>
    %186 = vector.shape_cast %183 : vector<1x128xf32> to vector<1x1x1x128xf32>
    tpu.vector_store %arg5[%c0_191, %c0_192, %c6_193, %c0_194], %186 {strides = array<i32>} : memref<1x1x20x128xf32, #tpu.memory_space<vmem>>, vector<1x1x1x128xf32>,
    %c0_195 = arith.constant 0 : index
    %c3_196 = arith.constant 3 : index
    %c0_197 = arith.constant 0 : index
    %c0_198 = arith.constant 0 : index
    %187 = vector.load %arg3[%c0_195, %c3_196, %c0_197, %c0_198] : memref<1x4x2x128xf32, #tpu.memory_space<vmem>>, vector<1x1x2x128xf32>
    %188 = vector.shape_cast %187 : vector<1x1x2x128xf32> to vector<2x128xf32>
    %189 = arith.mulf %157, %188 : vector<2x128xf32>
    %cst_199 = arith.constant dense<0.000000e+00> : vector<128xf32>
    %190 = vector.multi_reduction <add>, %189, %cst_199 [0] : vector<2x128xf32> to vector<128xf32>
    %191 = vector.shape_cast %190 : vector<128xf32> to vector<1x128xf32>
    %c0_200 = arith.constant 0 : index
    %c0_201 = arith.constant 0 : index
    %c7_202 = arith.constant 7 : index
    %c0_203 = arith.constant 0 : index
    %192 = vector.load %arg5[%c0_200, %c0_201, %c7_202, %c0_203] : memref<1x1x20x128xf32, #tpu.memory_space<vmem>>, vector<1x1x1x128xf32>
    %193 = vector.shape_cast %192 : vector<1x1x1x128xf32> to vector<1x128xf32>
    %194 = vector.shape_cast %191 : vector<1x128xf32> to vector<1x1x1x128xf32>
    tpu.vector_store %arg5[%c0_200, %c0_201, %c7_202, %c0_203], %194 {strides = array<i32>} : memref<1x1x20x128xf32, #tpu.memory_space<vmem>>, vector<1x1x1x128xf32>,
    %c0_204 = arith.constant 0 : index
    %c1_205 = arith.constant 1 : index
    %c0_206 = arith.constant 0 : index
    %c0_207 = arith.constant 0 : index
    %195 = vector.load %arg3[%c0_204, %c1_205, %c0_206, %c0_207] : memref<1x4x2x128xf32, #tpu.memory_space<vmem>>, vector<1x1x2x128xf32>
    %196 = vector.shape_cast %195 : vector<1x1x2x128xf32> to vector<2x128xf32>
    %cst_208 = arith.constant dense<0.000000e+00> : vector<128xf32>
    %197 = vector.multi_reduction <add>, %196, %cst_208 [0] : vector<2x128xf32> to vector<128xf32>
    %198 = vector.shape_cast %197 : vector<128xf32> to vector<1x128xf32>
    %c0_209 = arith.constant 0 : index
    %c0_210 = arith.constant 0 : index
    %c1_211 = arith.constant 1 : index
    %c0_212 = arith.constant 0 : index
    %199 = vector.load %arg5[%c0_209, %c0_210, %c1_211, %c0_212] : memref<1x1x20x128xf32, #tpu.memory_space<vmem>>, vector<1x1x1x128xf32>
    %200 = vector.shape_cast %199 : vector<1x1x1x128xf32> to vector<1x128xf32>
    %201 = vector.shape_cast %198 : vector<1x128xf32> to vector<1x1x1x128xf32>
    tpu.vector_store %arg5[%c0_209, %c0_210, %c1_211, %c0_212], %201 {strides = array<i32>} : memref<1x1x20x128xf32, #tpu.memory_space<vmem>>, vector<1x1x1x128xf32>,
    %c0_213 = arith.constant 0 : index
    %c0_214 = arith.constant 0 : index
    %c0_215 = arith.constant 0 : index
    %c0_216 = arith.constant 0 : index
    %202 = vector.load %arg3[%c0_213, %c0_214, %c0_215, %c0_216] : memref<1x4x2x128xf32, #tpu.memory_space<vmem>>, vector<1x1x2x128xf32>
    %203 = vector.shape_cast %202 : vector<1x1x2x128xf32> to vector<2x128xf32>
    %204 = arith.mulf %196, %203 : vector<2x128xf32>
    %cst_217 = arith.constant dense<0.000000e+00> : vector<128xf32>
    %205 = vector.multi_reduction <add>, %204, %cst_217 [0] : vector<2x128xf32> to vector<128xf32>
    %206 = vector.shape_cast %205 : vector<128xf32> to vector<1x128xf32>
    %c0_218 = arith.constant 0 : index
    %c0_219 = arith.constant 0 : index
    %c8_220 = arith.constant 8 : index
    %c0_221 = arith.constant 0 : index
    %207 = vector.load %arg5[%c0_218, %c0_219, %c8_220, %c0_221] : memref<1x1x20x128xf32, #tpu.memory_space<vmem>>, vector<1x1x1x128xf32>
    %208 = vector.shape_cast %207 : vector<1x1x1x128xf32> to vector<1x128xf32>
    %209 = vector.shape_cast %206 : vector<1x128xf32> to vector<1x1x1x128xf32>
    tpu.vector_store %arg5[%c0_218, %c0_219, %c8_220, %c0_221], %209 {strides = array<i32>} : memref<1x1x20x128xf32, #tpu.memory_space<vmem>>, vector<1x1x1x128xf32>,
    %c0_222 = arith.constant 0 : index
    %c1_223 = arith.constant 1 : index
    %c0_224 = arith.constant 0 : index
    %c0_225 = arith.constant 0 : index
    %210 = vector.load %arg3[%c0_222, %c1_223, %c0_224, %c0_225] : memref<1x4x2x128xf32, #tpu.memory_space<vmem>>, vector<1x1x2x128xf32>
    %211 = vector.shape_cast %210 : vector<1x1x2x128xf32> to vector<2x128xf32>
    %212 = arith.mulf %196, %211 : vector<2x128xf32>
    %cst_226 = arith.constant dense<0.000000e+00> : vector<128xf32>
    %213 = vector.multi_reduction <add>, %212, %cst_226 [0] : vector<2x128xf32> to vector<128xf32>
    %214 = vector.shape_cast %213 : vector<128xf32> to vector<1x128xf32>
    %c0_227 = arith.constant 0 : index
    %c0_228 = arith.constant 0 : index
    %c9_229 = arith.constant 9 : index
    %c0_230 = arith.constant 0 : index
    %215 = vector.load %arg5[%c0_227, %c0_228, %c9_229, %c0_230] : memref<1x1x20x128xf32, #tpu.memory_space<vmem>>, vector<1x1x1x128xf32>
    %216 = vector.shape_cast %215 : vector<1x1x1x128xf32> to vector<1x128xf32>
    %217 = vector.shape_cast %214 : vector<1x128xf32> to vector<1x1x1x128xf32>
    tpu.vector_store %arg5[%c0_227, %c0_228, %c9_229, %c0_230], %217 {strides = array<i32>} : memref<1x1x20x128xf32, #tpu.memory_space<vmem>>, vector<1x1x1x128xf32>,
    %c0_231 = arith.constant 0 : index
    %c2_232 = arith.constant 2 : index
    %c0_233 = arith.constant 0 : index
    %c0_234 = arith.constant 0 : index
    %218 = vector.load %arg3[%c0_231, %c2_232, %c0_233, %c0_234] : memref<1x4x2x128xf32, #tpu.memory_space<vmem>>, vector<1x1x2x128xf32>
    %219 = vector.shape_cast %218 : vector<1x1x2x128xf32> to vector<2x128xf32>
    %220 = arith.mulf %196, %219 : vector<2x128xf32>
    %cst_235 = arith.constant dense<0.000000e+00> : vector<128xf32>
    %221 = vector.multi_reduction <add>, %220, %cst_235 [0] : vector<2x128xf32> to vector<128xf32>
    %222 = vector.shape_cast %221 : vector<128xf32> to vector<1x128xf32>
    %c0_236 = arith.constant 0 : index
    %c0_237 = arith.constant 0 : index
    %c10_238 = arith.constant 10 : index
    %c0_239 = arith.constant 0 : index
    %223 = vector.load %arg5[%c0_236, %c0_237, %c10_238, %c0_239] : memref<1x1x20x128xf32, #tpu.memory_space<vmem>>, vector<1x1x1x128xf32>
    %224 = vector.shape_cast %223 : vector<1x1x1x128xf32> to vector<1x128xf32>
    %225 = vector.shape_cast %222 : vector<1x128xf32> to vector<1x1x1x128xf32>
    tpu.vector_store %arg5[%c0_236, %c0_237, %c10_238, %c0_239], %225 {strides = array<i32>} : memref<1x1x20x128xf32, #tpu.memory_space<vmem>>, vector<1x1x1x128xf32>,
    %c0_240 = arith.constant 0 : index
    %c3_241 = arith.constant 3 : index
    %c0_242 = arith.constant 0 : index
    %c0_243 = arith.constant 0 : index
    %226 = vector.load %arg3[%c0_240, %c3_241, %c0_242, %c0_243] : memref<1x4x2x128xf32, #tpu.memory_space<vmem>>, vector<1x1x2x128xf32>
    %227 = vector.shape_cast %226 : vector<1x1x2x128xf32> to vector<2x128xf32>
    %228 = arith.mulf %196, %227 : vector<2x128xf32>
    %cst_244 = arith.constant dense<0.000000e+00> : vector<128xf32>
    %229 = vector.multi_reduction <add>, %228, %cst_244 [0] : vector<2x128xf32> to vector<128xf32>
    %230 = vector.shape_cast %229 : vector<128xf32> to vector<1x128xf32>
    %c0_245 = arith.constant 0 : index
    %c0_246 = arith.constant 0 : index
    %c11_247 = arith.constant 11 : index
    %c0_248 = arith.constant 0 : index
    %231 = vector.load %arg5[%c0_245, %c0_246, %c11_247, %c0_248] : memref<1x1x20x128xf32, #tpu.memory_space<vmem>>, vector<1x1x1x128xf32>
    %232 = vector.shape_cast %231 : vector<1x1x1x128xf32> to vector<1x128xf32>
    %233 = vector.shape_cast %230 : vector<1x128xf32> to vector<1x1x1x128xf32>
    tpu.vector_store %arg5[%c0_245, %c0_246, %c11_247, %c0_248], %233 {strides = array<i32>} : memref<1x1x20x128xf32, #tpu.memory_space<vmem>>, vector<1x1x1x128xf32>,
    %c0_249 = arith.constant 0 : index
    %c2_250 = arith.constant 2 : index
    %c0_251 = arith.constant 0 : index
    %c0_252 = arith.constant 0 : index
    %234 = vector.load %arg3[%c0_249, %c2_250, %c0_251, %c0_252] : memref<1x4x2x128xf32, #tpu.memory_space<vmem>>, vector<1x1x2x128xf32>
    %235 = vector.shape_cast %234 : vector<1x1x2x128xf32> to vector<2x128xf32>
    %cst_253 = arith.constant dense<0.000000e+00> : vector<128xf32>
    %236 = vector.multi_reduction <add>, %235, %cst_253 [0] : vector<2x128xf32> to vector<128xf32>
    %237 = vector.shape_cast %236 : vector<128xf32> to vector<1x128xf32>
    %c0_254 = arith.constant 0 : index
    %c0_255 = arith.constant 0 : index
    %c2_256 = arith.constant 2 : index
    %c0_257 = arith.constant 0 : index
    %238 = vector.load %arg5[%c0_254, %c0_255, %c2_256, %c0_257] : memref<1x1x20x128xf32, #tpu.memory_space<vmem>>, vector<1x1x1x128xf32>
    %239 = vector.shape_cast %238 : vector<1x1x1x128xf32> to vector<1x128xf32>
    %240 = vector.shape_cast %237 : vector<1x128xf32> to vector<1x1x1x128xf32>
    tpu.vector_store %arg5[%c0_254, %c0_255, %c2_256, %c0_257], %240 {strides = array<i32>} : memref<1x1x20x128xf32, #tpu.memory_space<vmem>>, vector<1x1x1x128xf32>,
    %c0_258 = arith.constant 0 : index
    %c0_259 = arith.constant 0 : index
    %c0_260 = arith.constant 0 : index
    %c0_261 = arith.constant 0 : index
    %241 = vector.load %arg3[%c0_258, %c0_259, %c0_260, %c0_261] : memref<1x4x2x128xf32, #tpu.memory_space<vmem>>, vector<1x1x2x128xf32>
    %242 = vector.shape_cast %241 : vector<1x1x2x128xf32> to vector<2x128xf32>
    %243 = arith.mulf %235, %242 : vector<2x128xf32>
    %cst_262 = arith.constant dense<0.000000e+00> : vector<128xf32>
    %244 = vector.multi_reduction <add>, %243, %cst_262 [0] : vector<2x128xf32> to vector<128xf32>
    %245 = vector.shape_cast %244 : vector<128xf32> to vector<1x128xf32>
    %c0_263 = arith.constant 0 : index
    %c0_264 = arith.constant 0 : index
    %c12_265 = arith.constant 12 : index
    %c0_266 = arith.constant 0 : index
    %246 = vector.load %arg5[%c0_263, %c0_264, %c12_265, %c0_266] : memref<1x1x20x128xf32, #tpu.memory_space<vmem>>, vector<1x1x1x128xf32>
    %247 = vector.shape_cast %246 : vector<1x1x1x128xf32> to vector<1x128xf32>
    %248 = vector.shape_cast %245 : vector<1x128xf32> to vector<1x1x1x128xf32>
    tpu.vector_store %arg5[%c0_263, %c0_264, %c12_265, %c0_266], %248 {strides = array<i32>} : memref<1x1x20x128xf32, #tpu.memory_space<vmem>>, vector<1x1x1x128xf32>,
    %c0_267 = arith.constant 0 : index
    %c1_268 = arith.constant 1 : index
    %c0_269 = arith.constant 0 : index
    %c0_270 = arith.constant 0 : index
    %249 = vector.load %arg3[%c0_267, %c1_268, %c0_269, %c0_270] : memref<1x4x2x128xf32, #tpu.memory_space<vmem>>, vector<1x1x2x128xf32>
    %250 = vector.shape_cast %249 : vector<1x1x2x128xf32> to vector<2x128xf32>
    %251 = arith.mulf %235, %250 : vector<2x128xf32>
    %cst_271 = arith.constant dense<0.000000e+00> : vector<128xf32>
    %252 = vector.multi_reduction <add>, %251, %cst_271 [0] : vector<2x128xf32> to vector<128xf32>
    %253 = vector.shape_cast %252 : vector<128xf32> to vector<1x128xf32>
    %c0_272 = arith.constant 0 : index
    %c0_273 = arith.constant 0 : index
    %c13_274 = arith.constant 13 : index
    %c0_275 = arith.constant 0 : index
    %254 = vector.load %arg5[%c0_272, %c0_273, %c13_274, %c0_275] : memref<1x1x20x128xf32, #tpu.memory_space<vmem>>, vector<1x1x1x128xf32>
    %255 = vector.shape_cast %254 : vector<1x1x1x128xf32> to vector<1x128xf32>
    %256 = vector.shape_cast %253 : vector<1x128xf32> to vector<1x1x1x128xf32>
    tpu.vector_store %arg5[%c0_272, %c0_273, %c13_274, %c0_275], %256 {strides = array<i32>} : memref<1x1x20x128xf32, #tpu.memory_space<vmem>>, vector<1x1x1x128xf32>,
    %c0_276 = arith.constant 0 : index
    %c2_277 = arith.constant 2 : index
    %c0_278 = arith.constant 0 : index
    %c0_279 = arith.constant 0 : index
    %257 = vector.load %arg3[%c0_276, %c2_277, %c0_278, %c0_279] : memref<1x4x2x128xf32, #tpu.memory_space<vmem>>, vector<1x1x2x128xf32>
    %258 = vector.shape_cast %257 : vector<1x1x2x128xf32> to vector<2x128xf32>
    %259 = arith.mulf %235, %258 : vector<2x128xf32>
    %cst_280 = arith.constant dense<0.000000e+00> : vector<128xf32>
    %260 = vector.multi_reduction <add>, %259, %cst_280 [0] : vector<2x128xf32> to vector<128xf32>
    %261 = vector.shape_cast %260 : vector<128xf32> to vector<1x128xf32>
    %c0_281 = arith.constant 0 : index
    %c0_282 = arith.constant 0 : index
    %c14_283 = arith.constant 14 : index
    %c0_284 = arith.constant 0 : index
    %262 = vector.load %arg5[%c0_281, %c0_282, %c14_283, %c0_284] : memref<1x1x20x128xf32, #tpu.memory_space<vmem>>, vector<1x1x1x128xf32>
    %263 = vector.shape_cast %262 : vector<1x1x1x128xf32> to vector<1x128xf32>
    %264 = vector.shape_cast %261 : vector<1x128xf32> to vector<1x1x1x128xf32>
    tpu.vector_store %arg5[%c0_281, %c0_282, %c14_283, %c0_284], %264 {strides = array<i32>} : memref<1x1x20x128xf32, #tpu.memory_space<vmem>>, vector<1x1x1x128xf32>,
    %c0_285 = arith.constant 0 : index
    %c3_286 = arith.constant 3 : index
    %c0_287 = arith.constant 0 : index
    %c0_288 = arith.constant 0 : index
    %265 = vector.load %arg3[%c0_285, %c3_286, %c0_287, %c0_288] : memref<1x4x2x128xf32, #tpu.memory_space<vmem>>, vector<1x1x2x128xf32>
    %266 = vector.shape_cast %265 : vector<1x1x2x128xf32> to vector<2x128xf32>
    %267 = arith.mulf %235, %266 : vector<2x128xf32>
    %cst_289 = arith.constant dense<0.000000e+00> : vector<128xf32>
    %268 = vector.multi_reduction <add>, %267, %cst_289 [0] : vector<2x128xf32> to vector<128xf32>
    %269 = vector.shape_cast %268 : vector<128xf32> to vector<1x128xf32>
    %c0_290 = arith.constant 0 : index
    %c0_291 = arith.constant 0 : index
    %c15_292 = arith.constant 15 : index
    %c0_293 = arith.constant 0 : index
    %270 = vector.load %arg5[%c0_290, %c0_291, %c15_292, %c0_293] : memref<1x1x20x128xf32, #tpu.memory_space<vmem>>, vector<1x1x1x128xf32>
    %271 = vector.shape_cast %270 : vector<1x1x1x128xf32> to vector<1x128xf32>
    %272 = vector.shape_cast %269 : vector<1x128xf32> to vector<1x1x1x128xf32>
    tpu.vector_store %arg5[%c0_290, %c0_291, %c15_292, %c0_293], %272 {strides = array<i32>} : memref<1x1x20x128xf32, #tpu.memory_space<vmem>>, vector<1x1x1x128xf32>,
    %c0_294 = arith.constant 0 : index
    %c3_295 = arith.constant 3 : index
    %c0_296 = arith.constant 0 : index
    %c0_297 = arith.constant 0 : index
    %273 = vector.load %arg3[%c0_294, %c3_295, %c0_296, %c0_297] : memref<1x4x2x128xf32, #tpu.memory_space<vmem>>, vector<1x1x2x128xf32>
    %274 = vector.shape_cast %273 : vector<1x1x2x128xf32> to vector<2x128xf32>
    %cst_298 = arith.constant dense<0.000000e+00> : vector<128xf32>
    %275 = vector.multi_reduction <add>, %274, %cst_298 [0] : vector<2x128xf32> to vector<128xf32>
    %276 = vector.shape_cast %275 : vector<128xf32> to vector<1x128xf32>
    %c0_299 = arith.constant 0 : index
    %c0_300 = arith.constant 0 : index
    %c3_301 = arith.constant 3 : index
    %c0_302 = arith.constant 0 : index
    %277 = vector.load %arg5[%c0_299, %c0_300, %c3_301, %c0_302] : memref<1x1x20x128xf32, #tpu.memory_space<vmem>>, vector<1x1x1x128xf32>
    %278 = vector.shape_cast %277 : vector<1x1x1x128xf32> to vector<1x128xf32>
    %279 = vector.shape_cast %276 : vector<1x128xf32> to vector<1x1x1x128xf32>
    tpu.vector_store %arg5[%c0_299, %c0_300, %c3_301, %c0_302], %279 {strides = array<i32>} : memref<1x1x20x128xf32, #tpu.memory_space<vmem>>, vector<1x1x1x128xf32>,
    %c0_303 = arith.constant 0 : index
    %c0_304 = arith.constant 0 : index
    %c0_305 = arith.constant 0 : index
    %c0_306 = arith.constant 0 : index
    %280 = vector.load %arg3[%c0_303, %c0_304, %c0_305, %c0_306] : memref<1x4x2x128xf32, #tpu.memory_space<vmem>>, vector<1x1x2x128xf32>
    %281 = vector.shape_cast %280 : vector<1x1x2x128xf32> to vector<2x128xf32>
    %282 = arith.mulf %274, %281 : vector<2x128xf32>
    %cst_307 = arith.constant dense<0.000000e+00> : vector<128xf32>
    %283 = vector.multi_reduction <add>, %282, %cst_307 [0] : vector<2x128xf32> to vector<128xf32>
    %284 = vector.shape_cast %283 : vector<128xf32> to vector<1x128xf32>
    %c0_308 = arith.constant 0 : index
    %c0_309 = arith.constant 0 : index
    %c16_310 = arith.constant 16 : index
    %c0_311 = arith.constant 0 : index
    %285 = vector.load %arg5[%c0_308, %c0_309, %c16_310, %c0_311] : memref<1x1x20x128xf32, #tpu.memory_space<vmem>>, vector<1x1x1x128xf32>
    %286 = vector.shape_cast %285 : vector<1x1x1x128xf32> to vector<1x128xf32>
    %287 = vector.shape_cast %284 : vector<1x128xf32> to vector<1x1x1x128xf32>
    tpu.vector_store %arg5[%c0_308, %c0_309, %c16_310, %c0_311], %287 {strides = array<i32>} : memref<1x1x20x128xf32, #tpu.memory_space<vmem>>, vector<1x1x1x128xf32>,
    %c0_312 = arith.constant 0 : index
    %c1_313 = arith.constant 1 : index
    %c0_314 = arith.constant 0 : index
    %c0_315 = arith.constant 0 : index
    %288 = vector.load %arg3[%c0_312, %c1_313, %c0_314, %c0_315] : memref<1x4x2x128xf32, #tpu.memory_space<vmem>>, vector<1x1x2x128xf32>
    %289 = vector.shape_cast %288 : vector<1x1x2x128xf32> to vector<2x128xf32>
    %290 = arith.mulf %274, %289 : vector<2x128xf32>
    %cst_316 = arith.constant dense<0.000000e+00> : vector<128xf32>
    %291 = vector.multi_reduction <add>, %290, %cst_316 [0] : vector<2x128xf32> to vector<128xf32>
    %292 = vector.shape_cast %291 : vector<128xf32> to vector<1x128xf32>
    %c0_317 = arith.constant 0 : index
    %c0_318 = arith.constant 0 : index
    %c17_319 = arith.constant 17 : index
    %c0_320 = arith.constant 0 : index
    %293 = vector.load %arg5[%c0_317, %c0_318, %c17_319, %c0_320] : memref<1x1x20x128xf32, #tpu.memory_space<vmem>>, vector<1x1x1x128xf32>
    %294 = vector.shape_cast %293 : vector<1x1x1x128xf32> to vector<1x128xf32>
    %295 = vector.shape_cast %292 : vector<1x128xf32> to vector<1x1x1x128xf32>
    tpu.vector_store %arg5[%c0_317, %c0_318, %c17_319, %c0_320], %295 {strides = array<i32>} : memref<1x1x20x128xf32, #tpu.memory_space<vmem>>, vector<1x1x1x128xf32>,
    %c0_321 = arith.constant 0 : index
    %c2_322 = arith.constant 2 : index
    %c0_323 = arith.constant 0 : index
    %c0_324 = arith.constant 0 : index
    %296 = vector.load %arg3[%c0_321, %c2_322, %c0_323, %c0_324] : memref<1x4x2x128xf32, #tpu.memory_space<vmem>>, vector<1x1x2x128xf32>
    %297 = vector.shape_cast %296 : vector<1x1x2x128xf32> to vector<2x128xf32>
    %298 = arith.mulf %274, %297 : vector<2x128xf32>
    %cst_325 = arith.constant dense<0.000000e+00> : vector<128xf32>
    %299 = vector.multi_reduction <add>, %298, %cst_325 [0] : vector<2x128xf32> to vector<128xf32>
    %300 = vector.shape_cast %299 : vector<128xf32> to vector<1x128xf32>
    %c0_326 = arith.constant 0 : index
    %c0_327 = arith.constant 0 : index
    %c18_328 = arith.constant 18 : index
    %c0_329 = arith.constant 0 : index
    %301 = vector.load %arg5[%c0_326, %c0_327, %c18_328, %c0_329] : memref<1x1x20x128xf32, #tpu.memory_space<vmem>>, vector<1x1x1x128xf32>
    %302 = vector.shape_cast %301 : vector<1x1x1x128xf32> to vector<1x128xf32>
    %303 = vector.shape_cast %300 : vector<1x128xf32> to vector<1x1x1x128xf32>
    tpu.vector_store %arg5[%c0_326, %c0_327, %c18_328, %c0_329], %303 {strides = array<i32>} : memref<1x1x20x128xf32, #tpu.memory_space<vmem>>, vector<1x1x1x128xf32>,
    %c0_330 = arith.constant 0 : index
    %c3_331 = arith.constant 3 : index
    %c0_332 = arith.constant 0 : index
    %c0_333 = arith.constant 0 : index
    %304 = vector.load %arg3[%c0_330, %c3_331, %c0_332, %c0_333] : memref<1x4x2x128xf32, #tpu.memory_space<vmem>>, vector<1x1x2x128xf32>
    %305 = vector.shape_cast %304 : vector<1x1x2x128xf32> to vector<2x128xf32>
    %306 = arith.mulf %274, %305 : vector<2x128xf32>
    %cst_334 = arith.constant dense<0.000000e+00> : vector<128xf32>
    %307 = vector.multi_reduction <add>, %306, %cst_334 [0] : vector<2x128xf32> to vector<128xf32>
    %308 = vector.shape_cast %307 : vector<128xf32> to vector<1x128xf32>
    %c0_335 = arith.constant 0 : index
    %c0_336 = arith.constant 0 : index
    %c19_337 = arith.constant 19 : index
    %c0_338 = arith.constant 0 : index
    %309 = vector.load %arg5[%c0_335, %c0_336, %c19_337, %c0_338] : memref<1x1x20x128xf32, #tpu.memory_space<vmem>>, vector<1x1x1x128xf32>
    %310 = vector.shape_cast %309 : vector<1x1x1x128xf32> to vector<1x128xf32>
    %311 = vector.shape_cast %308 : vector<1x128xf32> to vector<1x1x1x128xf32>
    tpu.vector_store %arg5[%c0_335, %c0_336, %c19_337, %c0_338], %311 {strides = array<i32>} : memref<1x1x20x128xf32, #tpu.memory_space<vmem>>, vector<1x1x1x128xf32>,
    return
  }
  func.func @transform_0(%arg0: i32, %arg1: i32) -> (i32, i32, i32, i32) {
    %c0_i32 = arith.constant 0 : i32
    %c0_i32_0 = arith.constant 0 : i32
    %c0_i32_1 = arith.constant 0 : i32
    return %arg0, %c0_i32, %arg1, %c0_i32_0 : i32, i32, i32, i32
  }
  func.func @transform_1(%arg0: i32, %arg1: i32) -> (i32, i32, i32, i32) {
    %c0_i32 = arith.constant 0 : i32
    %c0_i32_0 = arith.constant 0 : i32
    %c0_i32_1 = arith.constant 0 : i32
    return %arg0, %c0_i32, %arg1, %c0_i32_0 : i32, i32, i32, i32
  }
  func.func @transform_2(%arg0: i32, %arg1: i32) -> (i32, i32, i32, i32) {
    %c0_i32 = arith.constant 0 : i32
    %c0_i32_0 = arith.constant 0 : i32
    %c0_i32_1 = arith.constant 0 : i32
    return %arg0, %arg1, %c0_i32, %c0_i32_0 : i32, i32, i32, i32
  }
  func.func @transform_3(%arg0: i32, %arg1: i32) -> (i32, i32, i32, i32) {
    %c0_i32 = arith.constant 0 : i32
    %c0_i32_0 = arith.constant 0 : i32
    %c0_i32_1 = arith.constant 0 : i32
    return %arg0, %arg1, %c0_i32, %c0_i32_0 : i32, i32, i32, i32
  }
}

module attributes {stable_mosaic.version = 11 : i64} {
  func.func @_gate_kernel(%arg0: i32, %arg1: i32, %arg2: memref<1x4x2x128xf32, #tpu.memory_space<vmem>>, %arg3: memref<1x2x128xf32, #tpu.memory_space<vmem>>, %arg4: memref<2xf32, #tpu.memory_space<smem>>, %arg5: memref<1x4x2x128xf32, #tpu.memory_space<vmem>>) attributes {dimension_semantics = [#tpu.dimension_semantics<parallel>, #tpu.dimension_semantics<parallel>], iteration_bounds = array<i64: 2, 1>, scalar_prefetch = 0 : i64, scratch_operands = 0 : i64, tpu.core_type = #tpu.core_type<tc>, window_params = [{transform_indices = @transform_0, window_bounds = array<i64: 1, 4, 2, 128>}, {transform_indices = @transform_1, window_bounds = array<i64: 1, 2, 128>}, {transform_indices = @transform_2, window_bounds = array<i64: 2>}, {transform_indices = @transform_3, window_bounds = array<i64: 1, 4, 2, 128>}]} {
    %c0 = arith.constant 0 : index
    %c0_0 = arith.constant 0 : index
    %c0_1 = arith.constant 0 : index
    %0 = vector.load %arg3[%c0, %c0_0, %c0_1] : memref<1x2x128xf32, #tpu.memory_space<vmem>>, vector<1x2x128xf32>
    %1 = vector.shape_cast %0 : vector<1x2x128xf32> to vector<2x128xf32>
    %c0_2 = arith.constant 0 : index
    %2 = memref.load %arg4[%c0_2] : memref<2xf32, #tpu.memory_space<smem>>
    %3 = vector.broadcast %2 : f32 to vector<2x128xf32>
    %4 = arith.mulf %1, %3 : vector<2x128xf32>
    %c1 = arith.constant 1 : index
    %5 = memref.load %arg4[%c1] : memref<2xf32, #tpu.memory_space<smem>>
    %6 = vector.broadcast %5 : f32 to vector<2x128xf32>
    %7 = arith.addf %4, %6 : vector<2x128xf32>
    %cst = arith.constant 5.000000e-01 : f32
    %8 = vector.broadcast %cst : f32 to vector<2x128xf32>
    %9 = arith.mulf %8, %7 : vector<2x128xf32>
    %10 = math.tanh %9 : vector<2x128xf32>
    %cst_3 = arith.constant 5.000000e-01 : f32
    %11 = vector.broadcast %cst_3 : f32 to vector<2x128xf32>
    %12 = arith.mulf %11, %10 : vector<2x128xf32>
    %cst_4 = arith.constant 5.000000e-01 : f32
    %13 = vector.broadcast %cst_4 : f32 to vector<2x128xf32>
    %14 = arith.addf %12, %13 : vector<2x128xf32>
    %c0_5 = arith.constant 0 : index
    %c0_6 = arith.constant 0 : index
    %c0_7 = arith.constant 0 : index
    %c0_8 = arith.constant 0 : index
    %15 = vector.load %arg2[%c0_5, %c0_6, %c0_7, %c0_8] : memref<1x4x2x128xf32, #tpu.memory_space<vmem>>, vector<1x1x2x128xf32>
    %16 = vector.shape_cast %15 : vector<1x1x2x128xf32> to vector<2x128xf32>
    %17 = arith.mulf %16, %14 : vector<2x128xf32>
    %c0_9 = arith.constant 0 : index
    %c0_10 = arith.constant 0 : index
    %c0_11 = arith.constant 0 : index
    %c0_12 = arith.constant 0 : index
    %18 = vector.load %arg5[%c0_9, %c0_10, %c0_11, %c0_12] : memref<1x4x2x128xf32, #tpu.memory_space<vmem>>, vector<1x1x2x128xf32>
    %19 = vector.shape_cast %18 : vector<1x1x2x128xf32> to vector<2x128xf32>
    %20 = vector.shape_cast %17 : vector<2x128xf32> to vector<1x1x2x128xf32>
    tpu.vector_store %arg5[%c0_9, %c0_10, %c0_11, %c0_12], %20 {strides = array<i32>} : memref<1x4x2x128xf32, #tpu.memory_space<vmem>>, vector<1x1x2x128xf32>,
    %c0_13 = arith.constant 0 : index
    %c1_14 = arith.constant 1 : index
    %c0_15 = arith.constant 0 : index
    %c0_16 = arith.constant 0 : index
    %21 = vector.load %arg2[%c0_13, %c1_14, %c0_15, %c0_16] : memref<1x4x2x128xf32, #tpu.memory_space<vmem>>, vector<1x1x2x128xf32>
    %22 = vector.shape_cast %21 : vector<1x1x2x128xf32> to vector<2x128xf32>
    %23 = arith.mulf %22, %14 : vector<2x128xf32>
    %c0_17 = arith.constant 0 : index
    %c1_18 = arith.constant 1 : index
    %c0_19 = arith.constant 0 : index
    %c0_20 = arith.constant 0 : index
    %24 = vector.load %arg5[%c0_17, %c1_18, %c0_19, %c0_20] : memref<1x4x2x128xf32, #tpu.memory_space<vmem>>, vector<1x1x2x128xf32>
    %25 = vector.shape_cast %24 : vector<1x1x2x128xf32> to vector<2x128xf32>
    %26 = vector.shape_cast %23 : vector<2x128xf32> to vector<1x1x2x128xf32>
    tpu.vector_store %arg5[%c0_17, %c1_18, %c0_19, %c0_20], %26 {strides = array<i32>} : memref<1x4x2x128xf32, #tpu.memory_space<vmem>>, vector<1x1x2x128xf32>,
    %c0_21 = arith.constant 0 : index
    %c2 = arith.constant 2 : index
    %c0_22 = arith.constant 0 : index
    %c0_23 = arith.constant 0 : index
    %27 = vector.load %arg2[%c0_21, %c2, %c0_22, %c0_23] : memref<1x4x2x128xf32, #tpu.memory_space<vmem>>, vector<1x1x2x128xf32>
    %28 = vector.shape_cast %27 : vector<1x1x2x128xf32> to vector<2x128xf32>
    %29 = arith.mulf %28, %14 : vector<2x128xf32>
    %c0_24 = arith.constant 0 : index
    %c2_25 = arith.constant 2 : index
    %c0_26 = arith.constant 0 : index
    %c0_27 = arith.constant 0 : index
    %30 = vector.load %arg5[%c0_24, %c2_25, %c0_26, %c0_27] : memref<1x4x2x128xf32, #tpu.memory_space<vmem>>, vector<1x1x2x128xf32>
    %31 = vector.shape_cast %30 : vector<1x1x2x128xf32> to vector<2x128xf32>
    %32 = vector.shape_cast %29 : vector<2x128xf32> to vector<1x1x2x128xf32>
    tpu.vector_store %arg5[%c0_24, %c2_25, %c0_26, %c0_27], %32 {strides = array<i32>} : memref<1x4x2x128xf32, #tpu.memory_space<vmem>>, vector<1x1x2x128xf32>,
    %c0_28 = arith.constant 0 : index
    %c3 = arith.constant 3 : index
    %c0_29 = arith.constant 0 : index
    %c0_30 = arith.constant 0 : index
    %33 = vector.load %arg2[%c0_28, %c3, %c0_29, %c0_30] : memref<1x4x2x128xf32, #tpu.memory_space<vmem>>, vector<1x1x2x128xf32>
    %34 = vector.shape_cast %33 : vector<1x1x2x128xf32> to vector<2x128xf32>
    %35 = arith.mulf %34, %14 : vector<2x128xf32>
    %c0_31 = arith.constant 0 : index
    %c3_32 = arith.constant 3 : index
    %c0_33 = arith.constant 0 : index
    %c0_34 = arith.constant 0 : index
    %36 = vector.load %arg5[%c0_31, %c3_32, %c0_33, %c0_34] : memref<1x4x2x128xf32, #tpu.memory_space<vmem>>, vector<1x1x2x128xf32>
    %37 = vector.shape_cast %36 : vector<1x1x2x128xf32> to vector<2x128xf32>
    %38 = vector.shape_cast %35 : vector<2x128xf32> to vector<1x1x2x128xf32>
    tpu.vector_store %arg5[%c0_31, %c3_32, %c0_33, %c0_34], %38 {strides = array<i32>} : memref<1x4x2x128xf32, #tpu.memory_space<vmem>>, vector<1x1x2x128xf32>,
    return
  }
  func.func @transform_0(%arg0: i32, %arg1: i32) -> (i32, i32, i32, i32) {
    %c0_i32 = arith.constant 0 : i32
    %c0_i32_0 = arith.constant 0 : i32
    %c0_i32_1 = arith.constant 0 : i32
    return %arg0, %c0_i32, %arg1, %c0_i32_0 : i32, i32, i32, i32
  }
  func.func @transform_1(%arg0: i32, %arg1: i32) -> (i32, i32, i32) {
    %c0_i32 = arith.constant 0 : i32
    %c0_i32_0 = arith.constant 0 : i32
    return %arg0, %arg1, %c0_i32 : i32, i32, i32
  }
  func.func @transform_2(%arg0: i32, %arg1: i32) -> i32 {
    %c0_i32 = arith.constant 0 : i32
    %c0_i32_0 = arith.constant 0 : i32
    return %c0_i32 : i32
  }
  func.func @transform_3(%arg0: i32, %arg1: i32) -> (i32, i32, i32, i32) {
    %c0_i32 = arith.constant 0 : i32
    %c0_i32_0 = arith.constant 0 : i32
    %c0_i32_1 = arith.constant 0 : i32
    return %arg0, %c0_i32, %arg1, %c0_i32_0 : i32, i32, i32, i32
  }
}

module attributes {stable_mosaic.version = 11 : i64} {
  func.func @_psi_pre_kernel(%arg0: i32, %arg1: i32, %arg2: memref<1x4x2x128xf32, #tpu.memory_space<vmem>>, %arg3: memref<1x4x2x128xf32, #tpu.memory_space<vmem>>, %arg4: memref<8x4xf32, #tpu.memory_space<smem>>, %arg5: memref<8x4xf32, #tpu.memory_space<smem>>, %arg6: memref<8xf32, #tpu.memory_space<smem>>, %arg7: memref<8xf32, #tpu.memory_space<smem>>, %arg8: memref<1x2x128xf32, #tpu.memory_space<vmem>>, %arg9: memref<1x1x2x128xf32, #tpu.memory_space<vmem>>) attributes {dimension_semantics = [#tpu.dimension_semantics<parallel>, #tpu.dimension_semantics<parallel>], iteration_bounds = array<i64: 2, 1>, scalar_prefetch = 0 : i64, scratch_operands = 0 : i64, tpu.core_type = #tpu.core_type<tc>, window_params = [{transform_indices = @transform_0, window_bounds = array<i64: 1, 4, 2, 128>}, {transform_indices = @transform_1, window_bounds = array<i64: 1, 4, 2, 128>}, {transform_indices = @transform_2, window_bounds = array<i64: 8, 4>}, {transform_indices = @transform_3, window_bounds = array<i64: 8, 4>}, {transform_indices = @transform_4, window_bounds = array<i64: 8>}, {transform_indices = @transform_5, window_bounds = array<i64: 8>}, {transform_indices = @transform_6, window_bounds = array<i64: 1, 2, 128>}, {transform_indices = @transform_7, window_bounds = array<i64: 1, 1, 2, 128>}]} {
    %c0 = arith.constant 0 : index
    %c0_0 = arith.constant 0 : index
    %c0_1 = arith.constant 0 : index
    %c0_2 = arith.constant 0 : index
    %0 = vector.load %arg2[%c0, %c0_0, %c0_1, %c0_2] : memref<1x4x2x128xf32, #tpu.memory_space<vmem>>, vector<1x1x2x128xf32>
    %1 = vector.shape_cast %0 : vector<1x1x2x128xf32> to vector<2x128xf32>
    %c0_3 = arith.constant 0 : index
    %c0_4 = arith.constant 0 : index
    %2 = memref.load %arg4[%c0_3, %c0_4] : memref<8x4xf32, #tpu.memory_space<smem>>
    %3 = vector.broadcast %2 : f32 to vector<2x128xf32>
    %4 = arith.mulf %1, %3 : vector<2x128xf32>
    %c0_5 = arith.constant 0 : index
    %c1 = arith.constant 1 : index
    %c0_6 = arith.constant 0 : index
    %c0_7 = arith.constant 0 : index
    %5 = vector.load %arg2[%c0_5, %c1, %c0_6, %c0_7] : memref<1x4x2x128xf32, #tpu.memory_space<vmem>>, vector<1x1x2x128xf32>
    %6 = vector.shape_cast %5 : vector<1x1x2x128xf32> to vector<2x128xf32>
    %c0_8 = arith.constant 0 : index
    %c1_9 = arith.constant 1 : index
    %7 = memref.load %arg4[%c0_8, %c1_9] : memref<8x4xf32, #tpu.memory_space<smem>>
    %8 = vector.broadcast %7 : f32 to vector<2x128xf32>
    %9 = arith.mulf %6, %8 : vector<2x128xf32>
    %10 = arith.addf %4, %9 : vector<2x128xf32>
    %c0_10 = arith.constant 0 : index
    %c2 = arith.constant 2 : index
    %c0_11 = arith.constant 0 : index
    %c0_12 = arith.constant 0 : index
    %11 = vector.load %arg2[%c0_10, %c2, %c0_11, %c0_12] : memref<1x4x2x128xf32, #tpu.memory_space<vmem>>, vector<1x1x2x128xf32>
    %12 = vector.shape_cast %11 : vector<1x1x2x128xf32> to vector<2x128xf32>
    %c0_13 = arith.constant 0 : index
    %c2_14 = arith.constant 2 : index
    %13 = memref.load %arg4[%c0_13, %c2_14] : memref<8x4xf32, #tpu.memory_space<smem>>
    %14 = vector.broadcast %13 : f32 to vector<2x128xf32>
    %15 = arith.mulf %12, %14 : vector<2x128xf32>
    %16 = arith.addf %10, %15 : vector<2x128xf32>
    %c0_15 = arith.constant 0 : index
    %c3 = arith.constant 3 : index
    %c0_16 = arith.constant 0 : index
    %c0_17 = arith.constant 0 : index
    %17 = vector.load %arg2[%c0_15, %c3, %c0_16, %c0_17] : memref<1x4x2x128xf32, #tpu.memory_space<vmem>>, vector<1x1x2x128xf32>
    %18 = vector.shape_cast %17 : vector<1x1x2x128xf32> to vector<2x128xf32>
    %c0_18 = arith.constant 0 : index
    %c3_19 = arith.constant 3 : index
    %19 = memref.load %arg4[%c0_18, %c3_19] : memref<8x4xf32, #tpu.memory_space<smem>>
    %20 = vector.broadcast %19 : f32 to vector<2x128xf32>
    %21 = arith.mulf %18, %20 : vector<2x128xf32>
    %22 = arith.addf %16, %21 : vector<2x128xf32>
    %c0_20 = arith.constant 0 : index
    %c0_21 = arith.constant 0 : index
    %c0_22 = arith.constant 0 : index
    %c0_23 = arith.constant 0 : index
    %23 = vector.load %arg3[%c0_20, %c0_21, %c0_22, %c0_23] : memref<1x4x2x128xf32, #tpu.memory_space<vmem>>, vector<1x1x2x128xf32>
    %24 = vector.shape_cast %23 : vector<1x1x2x128xf32> to vector<2x128xf32>
    %c0_24 = arith.constant 0 : index
    %c0_25 = arith.constant 0 : index
    %25 = memref.load %arg5[%c0_24, %c0_25] : memref<8x4xf32, #tpu.memory_space<smem>>
    %26 = vector.broadcast %25 : f32 to vector<2x128xf32>
    %27 = arith.mulf %24, %26 : vector<2x128xf32>
    %28 = arith.addf %22, %27 : vector<2x128xf32>
    %c0_26 = arith.constant 0 : index
    %c1_27 = arith.constant 1 : index
    %c0_28 = arith.constant 0 : index
    %c0_29 = arith.constant 0 : index
    %29 = vector.load %arg3[%c0_26, %c1_27, %c0_28, %c0_29] : memref<1x4x2x128xf32, #tpu.memory_space<vmem>>, vector<1x1x2x128xf32>
    %30 = vector.shape_cast %29 : vector<1x1x2x128xf32> to vector<2x128xf32>
    %c0_30 = arith.constant 0 : index
    %c1_31 = arith.constant 1 : index
    %31 = memref.load %arg5[%c0_30, %c1_31] : memref<8x4xf32, #tpu.memory_space<smem>>
    %32 = vector.broadcast %31 : f32 to vector<2x128xf32>
    %33 = arith.mulf %30, %32 : vector<2x128xf32>
    %34 = arith.addf %28, %33 : vector<2x128xf32>
    %c0_32 = arith.constant 0 : index
    %c2_33 = arith.constant 2 : index
    %c0_34 = arith.constant 0 : index
    %c0_35 = arith.constant 0 : index
    %35 = vector.load %arg3[%c0_32, %c2_33, %c0_34, %c0_35] : memref<1x4x2x128xf32, #tpu.memory_space<vmem>>, vector<1x1x2x128xf32>
    %36 = vector.shape_cast %35 : vector<1x1x2x128xf32> to vector<2x128xf32>
    %c0_36 = arith.constant 0 : index
    %c2_37 = arith.constant 2 : index
    %37 = memref.load %arg5[%c0_36, %c2_37] : memref<8x4xf32, #tpu.memory_space<smem>>
    %38 = vector.broadcast %37 : f32 to vector<2x128xf32>
    %39 = arith.mulf %36, %38 : vector<2x128xf32>
    %40 = arith.addf %34, %39 : vector<2x128xf32>
    %c0_38 = arith.constant 0 : index
    %c3_39 = arith.constant 3 : index
    %c0_40 = arith.constant 0 : index
    %c0_41 = arith.constant 0 : index
    %41 = vector.load %arg3[%c0_38, %c3_39, %c0_40, %c0_41] : memref<1x4x2x128xf32, #tpu.memory_space<vmem>>, vector<1x1x2x128xf32>
    %42 = vector.shape_cast %41 : vector<1x1x2x128xf32> to vector<2x128xf32>
    %c0_42 = arith.constant 0 : index
    %c3_43 = arith.constant 3 : index
    %43 = memref.load %arg5[%c0_42, %c3_43] : memref<8x4xf32, #tpu.memory_space<smem>>
    %44 = vector.broadcast %43 : f32 to vector<2x128xf32>
    %45 = arith.mulf %42, %44 : vector<2x128xf32>
    %46 = arith.addf %40, %45 : vector<2x128xf32>
    %c0_44 = arith.constant 0 : index
    %47 = memref.load %arg7[%c0_44] : memref<8xf32, #tpu.memory_space<smem>>
    %48 = vector.broadcast %47 : f32 to vector<2x128xf32>
    %49 = arith.addf %46, %48 : vector<2x128xf32>
    %cst = arith.constant 0.000000e+00 : f32
    %50 = vector.broadcast %cst : f32 to vector<2x128xf32>
    %51 = arith.maximumf %49, %50 : vector<2x128xf32>
    %c0_45 = arith.constant 0 : index
    %52 = memref.load %arg6[%c0_45] : memref<8xf32, #tpu.memory_space<smem>>
    %53 = vector.broadcast %52 : f32 to vector<2x128xf32>
    %54 = arith.mulf %51, %53 : vector<2x128xf32>
    %c0_46 = arith.constant 0 : index
    %c0_47 = arith.constant 0 : index
    %c0_48 = arith.constant 0 : index
    %c0_49 = arith.constant 0 : index
    %55 = vector.load %arg2[%c0_46, %c0_47, %c0_48, %c0_49] : memref<1x4x2x128xf32, #tpu.memory_space<vmem>>, vector<1x1x2x128xf32>
    %56 = vector.shape_cast %55 : vector<1x1x2x128xf32> to vector<2x128xf32>
    %c1_50 = arith.constant 1 : index
    %c0_51 = arith.constant 0 : index
    %57 = memref.load %arg4[%c1_50, %c0_51] : memref<8x4xf32, #tpu.memory_space<smem>>
    %58 = vector.broadcast %57 : f32 to vector<2x128xf32>
    %59 = arith.mulf %56, %58 : vector<2x128xf32>
    %c0_52 = arith.constant 0 : index
    %c1_53 = arith.constant 1 : index
    %c0_54 = arith.constant 0 : index
    %c0_55 = arith.constant 0 : index
    %60 = vector.load %arg2[%c0_52, %c1_53, %c0_54, %c0_55] : memref<1x4x2x128xf32, #tpu.memory_space<vmem>>, vector<1x1x2x128xf32>
    %61 = vector.shape_cast %60 : vector<1x1x2x128xf32> to vector<2x128xf32>
    %c1_56 = arith.constant 1 : index
    %c1_57 = arith.constant 1 : index
    %62 = memref.load %arg4[%c1_56, %c1_57] : memref<8x4xf32, #tpu.memory_space<smem>>
    %63 = vector.broadcast %62 : f32 to vector<2x128xf32>
    %64 = arith.mulf %61, %63 : vector<2x128xf32>
    %65 = arith.addf %59, %64 : vector<2x128xf32>
    %c0_58 = arith.constant 0 : index
    %c2_59 = arith.constant 2 : index
    %c0_60 = arith.constant 0 : index
    %c0_61 = arith.constant 0 : index
    %66 = vector.load %arg2[%c0_58, %c2_59, %c0_60, %c0_61] : memref<1x4x2x128xf32, #tpu.memory_space<vmem>>, vector<1x1x2x128xf32>
    %67 = vector.shape_cast %66 : vector<1x1x2x128xf32> to vector<2x128xf32>
    %c1_62 = arith.constant 1 : index
    %c2_63 = arith.constant 2 : index
    %68 = memref.load %arg4[%c1_62, %c2_63] : memref<8x4xf32, #tpu.memory_space<smem>>
    %69 = vector.broadcast %68 : f32 to vector<2x128xf32>
    %70 = arith.mulf %67, %69 : vector<2x128xf32>
    %71 = arith.addf %65, %70 : vector<2x128xf32>
    %c0_64 = arith.constant 0 : index
    %c3_65 = arith.constant 3 : index
    %c0_66 = arith.constant 0 : index
    %c0_67 = arith.constant 0 : index
    %72 = vector.load %arg2[%c0_64, %c3_65, %c0_66, %c0_67] : memref<1x4x2x128xf32, #tpu.memory_space<vmem>>, vector<1x1x2x128xf32>
    %73 = vector.shape_cast %72 : vector<1x1x2x128xf32> to vector<2x128xf32>
    %c1_68 = arith.constant 1 : index
    %c3_69 = arith.constant 3 : index
    %74 = memref.load %arg4[%c1_68, %c3_69] : memref<8x4xf32, #tpu.memory_space<smem>>
    %75 = vector.broadcast %74 : f32 to vector<2x128xf32>
    %76 = arith.mulf %73, %75 : vector<2x128xf32>
    %77 = arith.addf %71, %76 : vector<2x128xf32>
    %c0_70 = arith.constant 0 : index
    %c0_71 = arith.constant 0 : index
    %c0_72 = arith.constant 0 : index
    %c0_73 = arith.constant 0 : index
    %78 = vector.load %arg3[%c0_70, %c0_71, %c0_72, %c0_73] : memref<1x4x2x128xf32, #tpu.memory_space<vmem>>, vector<1x1x2x128xf32>
    %79 = vector.shape_cast %78 : vector<1x1x2x128xf32> to vector<2x128xf32>
    %c1_74 = arith.constant 1 : index
    %c0_75 = arith.constant 0 : index
    %80 = memref.load %arg5[%c1_74, %c0_75] : memref<8x4xf32, #tpu.memory_space<smem>>
    %81 = vector.broadcast %80 : f32 to vector<2x128xf32>
    %82 = arith.mulf %79, %81 : vector<2x128xf32>
    %83 = arith.addf %77, %82 : vector<2x128xf32>
    %c0_76 = arith.constant 0 : index
    %c1_77 = arith.constant 1 : index
    %c0_78 = arith.constant 0 : index
    %c0_79 = arith.constant 0 : index
    %84 = vector.load %arg3[%c0_76, %c1_77, %c0_78, %c0_79] : memref<1x4x2x128xf32, #tpu.memory_space<vmem>>, vector<1x1x2x128xf32>
    %85 = vector.shape_cast %84 : vector<1x1x2x128xf32> to vector<2x128xf32>
    %c1_80 = arith.constant 1 : index
    %c1_81 = arith.constant 1 : index
    %86 = memref.load %arg5[%c1_80, %c1_81] : memref<8x4xf32, #tpu.memory_space<smem>>
    %87 = vector.broadcast %86 : f32 to vector<2x128xf32>
    %88 = arith.mulf %85, %87 : vector<2x128xf32>
    %89 = arith.addf %83, %88 : vector<2x128xf32>
    %c0_82 = arith.constant 0 : index
    %c2_83 = arith.constant 2 : index
    %c0_84 = arith.constant 0 : index
    %c0_85 = arith.constant 0 : index
    %90 = vector.load %arg3[%c0_82, %c2_83, %c0_84, %c0_85] : memref<1x4x2x128xf32, #tpu.memory_space<vmem>>, vector<1x1x2x128xf32>
    %91 = vector.shape_cast %90 : vector<1x1x2x128xf32> to vector<2x128xf32>
    %c1_86 = arith.constant 1 : index
    %c2_87 = arith.constant 2 : index
    %92 = memref.load %arg5[%c1_86, %c2_87] : memref<8x4xf32, #tpu.memory_space<smem>>
    %93 = vector.broadcast %92 : f32 to vector<2x128xf32>
    %94 = arith.mulf %91, %93 : vector<2x128xf32>
    %95 = arith.addf %89, %94 : vector<2x128xf32>
    %c0_88 = arith.constant 0 : index
    %c3_89 = arith.constant 3 : index
    %c0_90 = arith.constant 0 : index
    %c0_91 = arith.constant 0 : index
    %96 = vector.load %arg3[%c0_88, %c3_89, %c0_90, %c0_91] : memref<1x4x2x128xf32, #tpu.memory_space<vmem>>, vector<1x1x2x128xf32>
    %97 = vector.shape_cast %96 : vector<1x1x2x128xf32> to vector<2x128xf32>
    %c1_92 = arith.constant 1 : index
    %c3_93 = arith.constant 3 : index
    %98 = memref.load %arg5[%c1_92, %c3_93] : memref<8x4xf32, #tpu.memory_space<smem>>
    %99 = vector.broadcast %98 : f32 to vector<2x128xf32>
    %100 = arith.mulf %97, %99 : vector<2x128xf32>
    %101 = arith.addf %95, %100 : vector<2x128xf32>
    %c1_94 = arith.constant 1 : index
    %102 = memref.load %arg7[%c1_94] : memref<8xf32, #tpu.memory_space<smem>>
    %103 = vector.broadcast %102 : f32 to vector<2x128xf32>
    %104 = arith.addf %101, %103 : vector<2x128xf32>
    %cst_95 = arith.constant 0.000000e+00 : f32
    %105 = vector.broadcast %cst_95 : f32 to vector<2x128xf32>
    %106 = arith.maximumf %104, %105 : vector<2x128xf32>
    %c1_96 = arith.constant 1 : index
    %107 = memref.load %arg6[%c1_96] : memref<8xf32, #tpu.memory_space<smem>>
    %108 = vector.broadcast %107 : f32 to vector<2x128xf32>
    %109 = arith.mulf %106, %108 : vector<2x128xf32>
    %110 = arith.addf %54, %109 : vector<2x128xf32>
    %c0_97 = arith.constant 0 : index
    %c0_98 = arith.constant 0 : index
    %c0_99 = arith.constant 0 : index
    %c0_100 = arith.constant 0 : index
    %111 = vector.load %arg2[%c0_97, %c0_98, %c0_99, %c0_100] : memref<1x4x2x128xf32, #tpu.memory_space<vmem>>, vector<1x1x2x128xf32>
    %112 = vector.shape_cast %111 : vector<1x1x2x128xf32> to vector<2x128xf32>
    %c2_101 = arith.constant 2 : index
    %c0_102 = arith.constant 0 : index
    %113 = memref.load %arg4[%c2_101, %c0_102] : memref<8x4xf32, #tpu.memory_space<smem>>
    %114 = vector.broadcast %113 : f32 to vector<2x128xf32>
    %115 = arith.mulf %112, %114 : vector<2x128xf32>
    %c0_103 = arith.constant 0 : index
    %c1_104 = arith.constant 1 : index
    %c0_105 = arith.constant 0 : index
    %c0_106 = arith.constant 0 : index
    %116 = vector.load %arg2[%c0_103, %c1_104, %c0_105, %c0_106] : memref<1x4x2x128xf32, #tpu.memory_space<vmem>>, vector<1x1x2x128xf32>
    %117 = vector.shape_cast %116 : vector<1x1x2x128xf32> to vector<2x128xf32>
    %c2_107 = arith.constant 2 : index
    %c1_108 = arith.constant 1 : index
    %118 = memref.load %arg4[%c2_107, %c1_108] : memref<8x4xf32, #tpu.memory_space<smem>>
    %119 = vector.broadcast %118 : f32 to vector<2x128xf32>
    %120 = arith.mulf %117, %119 : vector<2x128xf32>
    %121 = arith.addf %115, %120 : vector<2x128xf32>
    %c0_109 = arith.constant 0 : index
    %c2_110 = arith.constant 2 : index
    %c0_111 = arith.constant 0 : index
    %c0_112 = arith.constant 0 : index
    %122 = vector.load %arg2[%c0_109, %c2_110, %c0_111, %c0_112] : memref<1x4x2x128xf32, #tpu.memory_space<vmem>>, vector<1x1x2x128xf32>
    %123 = vector.shape_cast %122 : vector<1x1x2x128xf32> to vector<2x128xf32>
    %c2_113 = arith.constant 2 : index
    %c2_114 = arith.constant 2 : index
    %124 = memref.load %arg4[%c2_113, %c2_114] : memref<8x4xf32, #tpu.memory_space<smem>>
    %125 = vector.broadcast %124 : f32 to vector<2x128xf32>
    %126 = arith.mulf %123, %125 : vector<2x128xf32>
    %127 = arith.addf %121, %126 : vector<2x128xf32>
    %c0_115 = arith.constant 0 : index
    %c3_116 = arith.constant 3 : index
    %c0_117 = arith.constant 0 : index
    %c0_118 = arith.constant 0 : index
    %128 = vector.load %arg2[%c0_115, %c3_116, %c0_117, %c0_118] : memref<1x4x2x128xf32, #tpu.memory_space<vmem>>, vector<1x1x2x128xf32>
    %129 = vector.shape_cast %128 : vector<1x1x2x128xf32> to vector<2x128xf32>
    %c2_119 = arith.constant 2 : index
    %c3_120 = arith.constant 3 : index
    %130 = memref.load %arg4[%c2_119, %c3_120] : memref<8x4xf32, #tpu.memory_space<smem>>
    %131 = vector.broadcast %130 : f32 to vector<2x128xf32>
    %132 = arith.mulf %129, %131 : vector<2x128xf32>
    %133 = arith.addf %127, %132 : vector<2x128xf32>
    %c0_121 = arith.constant 0 : index
    %c0_122 = arith.constant 0 : index
    %c0_123 = arith.constant 0 : index
    %c0_124 = arith.constant 0 : index
    %134 = vector.load %arg3[%c0_121, %c0_122, %c0_123, %c0_124] : memref<1x4x2x128xf32, #tpu.memory_space<vmem>>, vector<1x1x2x128xf32>
    %135 = vector.shape_cast %134 : vector<1x1x2x128xf32> to vector<2x128xf32>
    %c2_125 = arith.constant 2 : index
    %c0_126 = arith.constant 0 : index
    %136 = memref.load %arg5[%c2_125, %c0_126] : memref<8x4xf32, #tpu.memory_space<smem>>
    %137 = vector.broadcast %136 : f32 to vector<2x128xf32>
    %138 = arith.mulf %135, %137 : vector<2x128xf32>
    %139 = arith.addf %133, %138 : vector<2x128xf32>
    %c0_127 = arith.constant 0 : index
    %c1_128 = arith.constant 1 : index
    %c0_129 = arith.constant 0 : index
    %c0_130 = arith.constant 0 : index
    %140 = vector.load %arg3[%c0_127, %c1_128, %c0_129, %c0_130] : memref<1x4x2x128xf32, #tpu.memory_space<vmem>>, vector<1x1x2x128xf32>
    %141 = vector.shape_cast %140 : vector<1x1x2x128xf32> to vector<2x128xf32>
    %c2_131 = arith.constant 2 : index
    %c1_132 = arith.constant 1 : index
    %142 = memref.load %arg5[%c2_131, %c1_132] : memref<8x4xf32, #tpu.memory_space<smem>>
    %143 = vector.broadcast %142 : f32 to vector<2x128xf32>
    %144 = arith.mulf %141, %143 : vector<2x128xf32>
    %145 = arith.addf %139, %144 : vector<2x128xf32>
    %c0_133 = arith.constant 0 : index
    %c2_134 = arith.constant 2 : index
    %c0_135 = arith.constant 0 : index
    %c0_136 = arith.constant 0 : index
    %146 = vector.load %arg3[%c0_133, %c2_134, %c0_135, %c0_136] : memref<1x4x2x128xf32, #tpu.memory_space<vmem>>, vector<1x1x2x128xf32>
    %147 = vector.shape_cast %146 : vector<1x1x2x128xf32> to vector<2x128xf32>
    %c2_137 = arith.constant 2 : index
    %c2_138 = arith.constant 2 : index
    %148 = memref.load %arg5[%c2_137, %c2_138] : memref<8x4xf32, #tpu.memory_space<smem>>
    %149 = vector.broadcast %148 : f32 to vector<2x128xf32>
    %150 = arith.mulf %147, %149 : vector<2x128xf32>
    %151 = arith.addf %145, %150 : vector<2x128xf32>
    %c0_139 = arith.constant 0 : index
    %c3_140 = arith.constant 3 : index
    %c0_141 = arith.constant 0 : index
    %c0_142 = arith.constant 0 : index
    %152 = vector.load %arg3[%c0_139, %c3_140, %c0_141, %c0_142] : memref<1x4x2x128xf32, #tpu.memory_space<vmem>>, vector<1x1x2x128xf32>
    %153 = vector.shape_cast %152 : vector<1x1x2x128xf32> to vector<2x128xf32>
    %c2_143 = arith.constant 2 : index
    %c3_144 = arith.constant 3 : index
    %154 = memref.load %arg5[%c2_143, %c3_144] : memref<8x4xf32, #tpu.memory_space<smem>>
    %155 = vector.broadcast %154 : f32 to vector<2x128xf32>
    %156 = arith.mulf %153, %155 : vector<2x128xf32>
    %157 = arith.addf %151, %156 : vector<2x128xf32>
    %c2_145 = arith.constant 2 : index
    %158 = memref.load %arg7[%c2_145] : memref<8xf32, #tpu.memory_space<smem>>
    %159 = vector.broadcast %158 : f32 to vector<2x128xf32>
    %160 = arith.addf %157, %159 : vector<2x128xf32>
    %cst_146 = arith.constant 0.000000e+00 : f32
    %161 = vector.broadcast %cst_146 : f32 to vector<2x128xf32>
    %162 = arith.maximumf %160, %161 : vector<2x128xf32>
    %c2_147 = arith.constant 2 : index
    %163 = memref.load %arg6[%c2_147] : memref<8xf32, #tpu.memory_space<smem>>
    %164 = vector.broadcast %163 : f32 to vector<2x128xf32>
    %165 = arith.mulf %162, %164 : vector<2x128xf32>
    %166 = arith.addf %110, %165 : vector<2x128xf32>
    %c0_148 = arith.constant 0 : index
    %c0_149 = arith.constant 0 : index
    %c0_150 = arith.constant 0 : index
    %c0_151 = arith.constant 0 : index
    %167 = vector.load %arg2[%c0_148, %c0_149, %c0_150, %c0_151] : memref<1x4x2x128xf32, #tpu.memory_space<vmem>>, vector<1x1x2x128xf32>
    %168 = vector.shape_cast %167 : vector<1x1x2x128xf32> to vector<2x128xf32>
    %c3_152 = arith.constant 3 : index
    %c0_153 = arith.constant 0 : index
    %169 = memref.load %arg4[%c3_152, %c0_153] : memref<8x4xf32, #tpu.memory_space<smem>>
    %170 = vector.broadcast %169 : f32 to vector<2x128xf32>
    %171 = arith.mulf %168, %170 : vector<2x128xf32>
    %c0_154 = arith.constant 0 : index
    %c1_155 = arith.constant 1 : index
    %c0_156 = arith.constant 0 : index
    %c0_157 = arith.constant 0 : index
    %172 = vector.load %arg2[%c0_154, %c1_155, %c0_156, %c0_157] : memref<1x4x2x128xf32, #tpu.memory_space<vmem>>, vector<1x1x2x128xf32>
    %173 = vector.shape_cast %172 : vector<1x1x2x128xf32> to vector<2x128xf32>
    %c3_158 = arith.constant 3 : index
    %c1_159 = arith.constant 1 : index
    %174 = memref.load %arg4[%c3_158, %c1_159] : memref<8x4xf32, #tpu.memory_space<smem>>
    %175 = vector.broadcast %174 : f32 to vector<2x128xf32>
    %176 = arith.mulf %173, %175 : vector<2x128xf32>
    %177 = arith.addf %171, %176 : vector<2x128xf32>
    %c0_160 = arith.constant 0 : index
    %c2_161 = arith.constant 2 : index
    %c0_162 = arith.constant 0 : index
    %c0_163 = arith.constant 0 : index
    %178 = vector.load %arg2[%c0_160, %c2_161, %c0_162, %c0_163] : memref<1x4x2x128xf32, #tpu.memory_space<vmem>>, vector<1x1x2x128xf32>
    %179 = vector.shape_cast %178 : vector<1x1x2x128xf32> to vector<2x128xf32>
    %c3_164 = arith.constant 3 : index
    %c2_165 = arith.constant 2 : index
    %180 = memref.load %arg4[%c3_164, %c2_165] : memref<8x4xf32, #tpu.memory_space<smem>>
    %181 = vector.broadcast %180 : f32 to vector<2x128xf32>
    %182 = arith.mulf %179, %181 : vector<2x128xf32>
    %183 = arith.addf %177, %182 : vector<2x128xf32>
    %c0_166 = arith.constant 0 : index
    %c3_167 = arith.constant 3 : index
    %c0_168 = arith.constant 0 : index
    %c0_169 = arith.constant 0 : index
    %184 = vector.load %arg2[%c0_166, %c3_167, %c0_168, %c0_169] : memref<1x4x2x128xf32, #tpu.memory_space<vmem>>, vector<1x1x2x128xf32>
    %185 = vector.shape_cast %184 : vector<1x1x2x128xf32> to vector<2x128xf32>
    %c3_170 = arith.constant 3 : index
    %c3_171 = arith.constant 3 : index
    %186 = memref.load %arg4[%c3_170, %c3_171] : memref<8x4xf32, #tpu.memory_space<smem>>
    %187 = vector.broadcast %186 : f32 to vector<2x128xf32>
    %188 = arith.mulf %185, %187 : vector<2x128xf32>
    %189 = arith.addf %183, %188 : vector<2x128xf32>
    %c0_172 = arith.constant 0 : index
    %c0_173 = arith.constant 0 : index
    %c0_174 = arith.constant 0 : index
    %c0_175 = arith.constant 0 : index
    %190 = vector.load %arg3[%c0_172, %c0_173, %c0_174, %c0_175] : memref<1x4x2x128xf32, #tpu.memory_space<vmem>>, vector<1x1x2x128xf32>
    %191 = vector.shape_cast %190 : vector<1x1x2x128xf32> to vector<2x128xf32>
    %c3_176 = arith.constant 3 : index
    %c0_177 = arith.constant 0 : index
    %192 = memref.load %arg5[%c3_176, %c0_177] : memref<8x4xf32, #tpu.memory_space<smem>>
    %193 = vector.broadcast %192 : f32 to vector<2x128xf32>
    %194 = arith.mulf %191, %193 : vector<2x128xf32>
    %195 = arith.addf %189, %194 : vector<2x128xf32>
    %c0_178 = arith.constant 0 : index
    %c1_179 = arith.constant 1 : index
    %c0_180 = arith.constant 0 : index
    %c0_181 = arith.constant 0 : index
    %196 = vector.load %arg3[%c0_178, %c1_179, %c0_180, %c0_181] : memref<1x4x2x128xf32, #tpu.memory_space<vmem>>, vector<1x1x2x128xf32>
    %197 = vector.shape_cast %196 : vector<1x1x2x128xf32> to vector<2x128xf32>
    %c3_182 = arith.constant 3 : index
    %c1_183 = arith.constant 1 : index
    %198 = memref.load %arg5[%c3_182, %c1_183] : memref<8x4xf32, #tpu.memory_space<smem>>
    %199 = vector.broadcast %198 : f32 to vector<2x128xf32>
    %200 = arith.mulf %197, %199 : vector<2x128xf32>
    %201 = arith.addf %195, %200 : vector<2x128xf32>
    %c0_184 = arith.constant 0 : index
    %c2_185 = arith.constant 2 : index
    %c0_186 = arith.constant 0 : index
    %c0_187 = arith.constant 0 : index
    %202 = vector.load %arg3[%c0_184, %c2_185, %c0_186, %c0_187] : memref<1x4x2x128xf32, #tpu.memory_space<vmem>>, vector<1x1x2x128xf32>
    %203 = vector.shape_cast %202 : vector<1x1x2x128xf32> to vector<2x128xf32>
    %c3_188 = arith.constant 3 : index
    %c2_189 = arith.constant 2 : index
    %204 = memref.load %arg5[%c3_188, %c2_189] : memref<8x4xf32, #tpu.memory_space<smem>>
    %205 = vector.broadcast %204 : f32 to vector<2x128xf32>
    %206 = arith.mulf %203, %205 : vector<2x128xf32>
    %207 = arith.addf %201, %206 : vector<2x128xf32>
    %c0_190 = arith.constant 0 : index
    %c3_191 = arith.constant 3 : index
    %c0_192 = arith.constant 0 : index
    %c0_193 = arith.constant 0 : index
    %208 = vector.load %arg3[%c0_190, %c3_191, %c0_192, %c0_193] : memref<1x4x2x128xf32, #tpu.memory_space<vmem>>, vector<1x1x2x128xf32>
    %209 = vector.shape_cast %208 : vector<1x1x2x128xf32> to vector<2x128xf32>
    %c3_194 = arith.constant 3 : index
    %c3_195 = arith.constant 3 : index
    %210 = memref.load %arg5[%c3_194, %c3_195] : memref<8x4xf32, #tpu.memory_space<smem>>
    %211 = vector.broadcast %210 : f32 to vector<2x128xf32>
    %212 = arith.mulf %209, %211 : vector<2x128xf32>
    %213 = arith.addf %207, %212 : vector<2x128xf32>
    %c3_196 = arith.constant 3 : index
    %214 = memref.load %arg7[%c3_196] : memref<8xf32, #tpu.memory_space<smem>>
    %215 = vector.broadcast %214 : f32 to vector<2x128xf32>
    %216 = arith.addf %213, %215 : vector<2x128xf32>
    %cst_197 = arith.constant 0.000000e+00 : f32
    %217 = vector.broadcast %cst_197 : f32 to vector<2x128xf32>
    %218 = arith.maximumf %216, %217 : vector<2x128xf32>
    %c3_198 = arith.constant 3 : index
    %219 = memref.load %arg6[%c3_198] : memref<8xf32, #tpu.memory_space<smem>>
    %220 = vector.broadcast %219 : f32 to vector<2x128xf32>
    %221 = arith.mulf %218, %220 : vector<2x128xf32>
    %222 = arith.addf %166, %221 : vector<2x128xf32>
    %c0_199 = arith.constant 0 : index
    %c0_200 = arith.constant 0 : index
    %c0_201 = arith.constant 0 : index
    %c0_202 = arith.constant 0 : index
    %223 = vector.load %arg2[%c0_199, %c0_200, %c0_201, %c0_202] : memref<1x4x2x128xf32, #tpu.memory_space<vmem>>, vector<1x1x2x128xf32>
    %224 = vector.shape_cast %223 : vector<1x1x2x128xf32> to vector<2x128xf32>
    %c4 = arith.constant 4 : index
    %c0_203 = arith.constant 0 : index
    %225 = memref.load %arg4[%c4, %c0_203] : memref<8x4xf32, #tpu.memory_space<smem>>
    %226 = vector.broadcast %225 : f32 to vector<2x128xf32>
    %227 = arith.mulf %224, %226 : vector<2x128xf32>
    %c0_204 = arith.constant 0 : index
    %c1_205 = arith.constant 1 : index
    %c0_206 = arith.constant 0 : index
    %c0_207 = arith.constant 0 : index
    %228 = vector.load %arg2[%c0_204, %c1_205, %c0_206, %c0_207] : memref<1x4x2x128xf32, #tpu.memory_space<vmem>>, vector<1x1x2x128xf32>
    %229 = vector.shape_cast %228 : vector<1x1x2x128xf32> to vector<2x128xf32>
    %c4_208 = arith.constant 4 : index
    %c1_209 = arith.constant 1 : index
    %230 = memref.load %arg4[%c4_208, %c1_209] : memref<8x4xf32, #tpu.memory_space<smem>>
    %231 = vector.broadcast %230 : f32 to vector<2x128xf32>
    %232 = arith.mulf %229, %231 : vector<2x128xf32>
    %233 = arith.addf %227, %232 : vector<2x128xf32>
    %c0_210 = arith.constant 0 : index
    %c2_211 = arith.constant 2 : index
    %c0_212 = arith.constant 0 : index
    %c0_213 = arith.constant 0 : index
    %234 = vector.load %arg2[%c0_210, %c2_211, %c0_212, %c0_213] : memref<1x4x2x128xf32, #tpu.memory_space<vmem>>, vector<1x1x2x128xf32>
    %235 = vector.shape_cast %234 : vector<1x1x2x128xf32> to vector<2x128xf32>
    %c4_214 = arith.constant 4 : index
    %c2_215 = arith.constant 2 : index
    %236 = memref.load %arg4[%c4_214, %c2_215] : memref<8x4xf32, #tpu.memory_space<smem>>
    %237 = vector.broadcast %236 : f32 to vector<2x128xf32>
    %238 = arith.mulf %235, %237 : vector<2x128xf32>
    %239 = arith.addf %233, %238 : vector<2x128xf32>
    %c0_216 = arith.constant 0 : index
    %c3_217 = arith.constant 3 : index
    %c0_218 = arith.constant 0 : index
    %c0_219 = arith.constant 0 : index
    %240 = vector.load %arg2[%c0_216, %c3_217, %c0_218, %c0_219] : memref<1x4x2x128xf32, #tpu.memory_space<vmem>>, vector<1x1x2x128xf32>
    %241 = vector.shape_cast %240 : vector<1x1x2x128xf32> to vector<2x128xf32>
    %c4_220 = arith.constant 4 : index
    %c3_221 = arith.constant 3 : index
    %242 = memref.load %arg4[%c4_220, %c3_221] : memref<8x4xf32, #tpu.memory_space<smem>>
    %243 = vector.broadcast %242 : f32 to vector<2x128xf32>
    %244 = arith.mulf %241, %243 : vector<2x128xf32>
    %245 = arith.addf %239, %244 : vector<2x128xf32>
    %c0_222 = arith.constant 0 : index
    %c0_223 = arith.constant 0 : index
    %c0_224 = arith.constant 0 : index
    %c0_225 = arith.constant 0 : index
    %246 = vector.load %arg3[%c0_222, %c0_223, %c0_224, %c0_225] : memref<1x4x2x128xf32, #tpu.memory_space<vmem>>, vector<1x1x2x128xf32>
    %247 = vector.shape_cast %246 : vector<1x1x2x128xf32> to vector<2x128xf32>
    %c4_226 = arith.constant 4 : index
    %c0_227 = arith.constant 0 : index
    %248 = memref.load %arg5[%c4_226, %c0_227] : memref<8x4xf32, #tpu.memory_space<smem>>
    %249 = vector.broadcast %248 : f32 to vector<2x128xf32>
    %250 = arith.mulf %247, %249 : vector<2x128xf32>
    %251 = arith.addf %245, %250 : vector<2x128xf32>
    %c0_228 = arith.constant 0 : index
    %c1_229 = arith.constant 1 : index
    %c0_230 = arith.constant 0 : index
    %c0_231 = arith.constant 0 : index
    %252 = vector.load %arg3[%c0_228, %c1_229, %c0_230, %c0_231] : memref<1x4x2x128xf32, #tpu.memory_space<vmem>>, vector<1x1x2x128xf32>
    %253 = vector.shape_cast %252 : vector<1x1x2x128xf32> to vector<2x128xf32>
    %c4_232 = arith.constant 4 : index
    %c1_233 = arith.constant 1 : index
    %254 = memref.load %arg5[%c4_232, %c1_233] : memref<8x4xf32, #tpu.memory_space<smem>>
    %255 = vector.broadcast %254 : f32 to vector<2x128xf32>
    %256 = arith.mulf %253, %255 : vector<2x128xf32>
    %257 = arith.addf %251, %256 : vector<2x128xf32>
    %c0_234 = arith.constant 0 : index
    %c2_235 = arith.constant 2 : index
    %c0_236 = arith.constant 0 : index
    %c0_237 = arith.constant 0 : index
    %258 = vector.load %arg3[%c0_234, %c2_235, %c0_236, %c0_237] : memref<1x4x2x128xf32, #tpu.memory_space<vmem>>, vector<1x1x2x128xf32>
    %259 = vector.shape_cast %258 : vector<1x1x2x128xf32> to vector<2x128xf32>
    %c4_238 = arith.constant 4 : index
    %c2_239 = arith.constant 2 : index
    %260 = memref.load %arg5[%c4_238, %c2_239] : memref<8x4xf32, #tpu.memory_space<smem>>
    %261 = vector.broadcast %260 : f32 to vector<2x128xf32>
    %262 = arith.mulf %259, %261 : vector<2x128xf32>
    %263 = arith.addf %257, %262 : vector<2x128xf32>
    %c0_240 = arith.constant 0 : index
    %c3_241 = arith.constant 3 : index
    %c0_242 = arith.constant 0 : index
    %c0_243 = arith.constant 0 : index
    %264 = vector.load %arg3[%c0_240, %c3_241, %c0_242, %c0_243] : memref<1x4x2x128xf32, #tpu.memory_space<vmem>>, vector<1x1x2x128xf32>
    %265 = vector.shape_cast %264 : vector<1x1x2x128xf32> to vector<2x128xf32>
    %c4_244 = arith.constant 4 : index
    %c3_245 = arith.constant 3 : index
    %266 = memref.load %arg5[%c4_244, %c3_245] : memref<8x4xf32, #tpu.memory_space<smem>>
    %267 = vector.broadcast %266 : f32 to vector<2x128xf32>
    %268 = arith.mulf %265, %267 : vector<2x128xf32>
    %269 = arith.addf %263, %268 : vector<2x128xf32>
    %c4_246 = arith.constant 4 : index
    %270 = memref.load %arg7[%c4_246] : memref<8xf32, #tpu.memory_space<smem>>
    %271 = vector.broadcast %270 : f32 to vector<2x128xf32>
    %272 = arith.addf %269, %271 : vector<2x128xf32>
    %cst_247 = arith.constant 0.000000e+00 : f32
    %273 = vector.broadcast %cst_247 : f32 to vector<2x128xf32>
    %274 = arith.maximumf %272, %273 : vector<2x128xf32>
    %c4_248 = arith.constant 4 : index
    %275 = memref.load %arg6[%c4_248] : memref<8xf32, #tpu.memory_space<smem>>
    %276 = vector.broadcast %275 : f32 to vector<2x128xf32>
    %277 = arith.mulf %274, %276 : vector<2x128xf32>
    %278 = arith.addf %222, %277 : vector<2x128xf32>
    %c0_249 = arith.constant 0 : index
    %c0_250 = arith.constant 0 : index
    %c0_251 = arith.constant 0 : index
    %c0_252 = arith.constant 0 : index
    %279 = vector.load %arg2[%c0_249, %c0_250, %c0_251, %c0_252] : memref<1x4x2x128xf32, #tpu.memory_space<vmem>>, vector<1x1x2x128xf32>
    %280 = vector.shape_cast %279 : vector<1x1x2x128xf32> to vector<2x128xf32>
    %c5 = arith.constant 5 : index
    %c0_253 = arith.constant 0 : index
    %281 = memref.load %arg4[%c5, %c0_253] : memref<8x4xf32, #tpu.memory_space<smem>>
    %282 = vector.broadcast %281 : f32 to vector<2x128xf32>
    %283 = arith.mulf %280, %282 : vector<2x128xf32>
    %c0_254 = arith.constant 0 : index
    %c1_255 = arith.constant 1 : index
    %c0_256 = arith.constant 0 : index
    %c0_257 = arith.constant 0 : index
    %284 = vector.load %arg2[%c0_254, %c1_255, %c0_256, %c0_257] : memref<1x4x2x128xf32, #tpu.memory_space<vmem>>, vector<1x1x2x128xf32>
    %285 = vector.shape_cast %284 : vector<1x1x2x128xf32> to vector<2x128xf32>
    %c5_258 = arith.constant 5 : index
    %c1_259 = arith.constant 1 : index
    %286 = memref.load %arg4[%c5_258, %c1_259] : memref<8x4xf32, #tpu.memory_space<smem>>
    %287 = vector.broadcast %286 : f32 to vector<2x128xf32>
    %288 = arith.mulf %285, %287 : vector<2x128xf32>
    %289 = arith.addf %283, %288 : vector<2x128xf32>
    %c0_260 = arith.constant 0 : index
    %c2_261 = arith.constant 2 : index
    %c0_262 = arith.constant 0 : index
    %c0_263 = arith.constant 0 : index
    %290 = vector.load %arg2[%c0_260, %c2_261, %c0_262, %c0_263] : memref<1x4x2x128xf32, #tpu.memory_space<vmem>>, vector<1x1x2x128xf32>
    %291 = vector.shape_cast %290 : vector<1x1x2x128xf32> to vector<2x128xf32>
    %c5_264 = arith.constant 5 : index
    %c2_265 = arith.constant 2 : index
    %292 = memref.load %arg4[%c5_264, %c2_265] : memref<8x4xf32, #tpu.memory_space<smem>>
    %293 = vector.broadcast %292 : f32 to vector<2x128xf32>
    %294 = arith.mulf %291, %293 : vector<2x128xf32>
    %295 = arith.addf %289, %294 : vector<2x128xf32>
    %c0_266 = arith.constant 0 : index
    %c3_267 = arith.constant 3 : index
    %c0_268 = arith.constant 0 : index
    %c0_269 = arith.constant 0 : index
    %296 = vector.load %arg2[%c0_266, %c3_267, %c0_268, %c0_269] : memref<1x4x2x128xf32, #tpu.memory_space<vmem>>, vector<1x1x2x128xf32>
    %297 = vector.shape_cast %296 : vector<1x1x2x128xf32> to vector<2x128xf32>
    %c5_270 = arith.constant 5 : index
    %c3_271 = arith.constant 3 : index
    %298 = memref.load %arg4[%c5_270, %c3_271] : memref<8x4xf32, #tpu.memory_space<smem>>
    %299 = vector.broadcast %298 : f32 to vector<2x128xf32>
    %300 = arith.mulf %297, %299 : vector<2x128xf32>
    %301 = arith.addf %295, %300 : vector<2x128xf32>
    %c0_272 = arith.constant 0 : index
    %c0_273 = arith.constant 0 : index
    %c0_274 = arith.constant 0 : index
    %c0_275 = arith.constant 0 : index
    %302 = vector.load %arg3[%c0_272, %c0_273, %c0_274, %c0_275] : memref<1x4x2x128xf32, #tpu.memory_space<vmem>>, vector<1x1x2x128xf32>
    %303 = vector.shape_cast %302 : vector<1x1x2x128xf32> to vector<2x128xf32>
    %c5_276 = arith.constant 5 : index
    %c0_277 = arith.constant 0 : index
    %304 = memref.load %arg5[%c5_276, %c0_277] : memref<8x4xf32, #tpu.memory_space<smem>>
    %305 = vector.broadcast %304 : f32 to vector<2x128xf32>
    %306 = arith.mulf %303, %305 : vector<2x128xf32>
    %307 = arith.addf %301, %306 : vector<2x128xf32>
    %c0_278 = arith.constant 0 : index
    %c1_279 = arith.constant 1 : index
    %c0_280 = arith.constant 0 : index
    %c0_281 = arith.constant 0 : index
    %308 = vector.load %arg3[%c0_278, %c1_279, %c0_280, %c0_281] : memref<1x4x2x128xf32, #tpu.memory_space<vmem>>, vector<1x1x2x128xf32>
    %309 = vector.shape_cast %308 : vector<1x1x2x128xf32> to vector<2x128xf32>
    %c5_282 = arith.constant 5 : index
    %c1_283 = arith.constant 1 : index
    %310 = memref.load %arg5[%c5_282, %c1_283] : memref<8x4xf32, #tpu.memory_space<smem>>
    %311 = vector.broadcast %310 : f32 to vector<2x128xf32>
    %312 = arith.mulf %309, %311 : vector<2x128xf32>
    %313 = arith.addf %307, %312 : vector<2x128xf32>
    %c0_284 = arith.constant 0 : index
    %c2_285 = arith.constant 2 : index
    %c0_286 = arith.constant 0 : index
    %c0_287 = arith.constant 0 : index
    %314 = vector.load %arg3[%c0_284, %c2_285, %c0_286, %c0_287] : memref<1x4x2x128xf32, #tpu.memory_space<vmem>>, vector<1x1x2x128xf32>
    %315 = vector.shape_cast %314 : vector<1x1x2x128xf32> to vector<2x128xf32>
    %c5_288 = arith.constant 5 : index
    %c2_289 = arith.constant 2 : index
    %316 = memref.load %arg5[%c5_288, %c2_289] : memref<8x4xf32, #tpu.memory_space<smem>>
    %317 = vector.broadcast %316 : f32 to vector<2x128xf32>
    %318 = arith.mulf %315, %317 : vector<2x128xf32>
    %319 = arith.addf %313, %318 : vector<2x128xf32>
    %c0_290 = arith.constant 0 : index
    %c3_291 = arith.constant 3 : index
    %c0_292 = arith.constant 0 : index
    %c0_293 = arith.constant 0 : index
    %320 = vector.load %arg3[%c0_290, %c3_291, %c0_292, %c0_293] : memref<1x4x2x128xf32, #tpu.memory_space<vmem>>, vector<1x1x2x128xf32>
    %321 = vector.shape_cast %320 : vector<1x1x2x128xf32> to vector<2x128xf32>
    %c5_294 = arith.constant 5 : index
    %c3_295 = arith.constant 3 : index
    %322 = memref.load %arg5[%c5_294, %c3_295] : memref<8x4xf32, #tpu.memory_space<smem>>
    %323 = vector.broadcast %322 : f32 to vector<2x128xf32>
    %324 = arith.mulf %321, %323 : vector<2x128xf32>
    %325 = arith.addf %319, %324 : vector<2x128xf32>
    %c5_296 = arith.constant 5 : index
    %326 = memref.load %arg7[%c5_296] : memref<8xf32, #tpu.memory_space<smem>>
    %327 = vector.broadcast %326 : f32 to vector<2x128xf32>
    %328 = arith.addf %325, %327 : vector<2x128xf32>
    %cst_297 = arith.constant 0.000000e+00 : f32
    %329 = vector.broadcast %cst_297 : f32 to vector<2x128xf32>
    %330 = arith.maximumf %328, %329 : vector<2x128xf32>
    %c5_298 = arith.constant 5 : index
    %331 = memref.load %arg6[%c5_298] : memref<8xf32, #tpu.memory_space<smem>>
    %332 = vector.broadcast %331 : f32 to vector<2x128xf32>
    %333 = arith.mulf %330, %332 : vector<2x128xf32>
    %334 = arith.addf %278, %333 : vector<2x128xf32>
    %c0_299 = arith.constant 0 : index
    %c0_300 = arith.constant 0 : index
    %c0_301 = arith.constant 0 : index
    %c0_302 = arith.constant 0 : index
    %335 = vector.load %arg2[%c0_299, %c0_300, %c0_301, %c0_302] : memref<1x4x2x128xf32, #tpu.memory_space<vmem>>, vector<1x1x2x128xf32>
    %336 = vector.shape_cast %335 : vector<1x1x2x128xf32> to vector<2x128xf32>
    %c6 = arith.constant 6 : index
    %c0_303 = arith.constant 0 : index
    %337 = memref.load %arg4[%c6, %c0_303] : memref<8x4xf32, #tpu.memory_space<smem>>
    %338 = vector.broadcast %337 : f32 to vector<2x128xf32>
    %339 = arith.mulf %336, %338 : vector<2x128xf32>
    %c0_304 = arith.constant 0 : index
    %c1_305 = arith.constant 1 : index
    %c0_306 = arith.constant 0 : index
    %c0_307 = arith.constant 0 : index
    %340 = vector.load %arg2[%c0_304, %c1_305, %c0_306, %c0_307] : memref<1x4x2x128xf32, #tpu.memory_space<vmem>>, vector<1x1x2x128xf32>
    %341 = vector.shape_cast %340 : vector<1x1x2x128xf32> to vector<2x128xf32>
    %c6_308 = arith.constant 6 : index
    %c1_309 = arith.constant 1 : index
    %342 = memref.load %arg4[%c6_308, %c1_309] : memref<8x4xf32, #tpu.memory_space<smem>>
    %343 = vector.broadcast %342 : f32 to vector<2x128xf32>
    %344 = arith.mulf %341, %343 : vector<2x128xf32>
    %345 = arith.addf %339, %344 : vector<2x128xf32>
    %c0_310 = arith.constant 0 : index
    %c2_311 = arith.constant 2 : index
    %c0_312 = arith.constant 0 : index
    %c0_313 = arith.constant 0 : index
    %346 = vector.load %arg2[%c0_310, %c2_311, %c0_312, %c0_313] : memref<1x4x2x128xf32, #tpu.memory_space<vmem>>, vector<1x1x2x128xf32>
    %347 = vector.shape_cast %346 : vector<1x1x2x128xf32> to vector<2x128xf32>
    %c6_314 = arith.constant 6 : index
    %c2_315 = arith.constant 2 : index
    %348 = memref.load %arg4[%c6_314, %c2_315] : memref<8x4xf32, #tpu.memory_space<smem>>
    %349 = vector.broadcast %348 : f32 to vector<2x128xf32>
    %350 = arith.mulf %347, %349 : vector<2x128xf32>
    %351 = arith.addf %345, %350 : vector<2x128xf32>
    %c0_316 = arith.constant 0 : index
    %c3_317 = arith.constant 3 : index
    %c0_318 = arith.constant 0 : index
    %c0_319 = arith.constant 0 : index
    %352 = vector.load %arg2[%c0_316, %c3_317, %c0_318, %c0_319] : memref<1x4x2x128xf32, #tpu.memory_space<vmem>>, vector<1x1x2x128xf32>
    %353 = vector.shape_cast %352 : vector<1x1x2x128xf32> to vector<2x128xf32>
    %c6_320 = arith.constant 6 : index
    %c3_321 = arith.constant 3 : index
    %354 = memref.load %arg4[%c6_320, %c3_321] : memref<8x4xf32, #tpu.memory_space<smem>>
    %355 = vector.broadcast %354 : f32 to vector<2x128xf32>
    %356 = arith.mulf %353, %355 : vector<2x128xf32>
    %357 = arith.addf %351, %356 : vector<2x128xf32>
    %c0_322 = arith.constant 0 : index
    %c0_323 = arith.constant 0 : index
    %c0_324 = arith.constant 0 : index
    %c0_325 = arith.constant 0 : index
    %358 = vector.load %arg3[%c0_322, %c0_323, %c0_324, %c0_325] : memref<1x4x2x128xf32, #tpu.memory_space<vmem>>, vector<1x1x2x128xf32>
    %359 = vector.shape_cast %358 : vector<1x1x2x128xf32> to vector<2x128xf32>
    %c6_326 = arith.constant 6 : index
    %c0_327 = arith.constant 0 : index
    %360 = memref.load %arg5[%c6_326, %c0_327] : memref<8x4xf32, #tpu.memory_space<smem>>
    %361 = vector.broadcast %360 : f32 to vector<2x128xf32>
    %362 = arith.mulf %359, %361 : vector<2x128xf32>
    %363 = arith.addf %357, %362 : vector<2x128xf32>
    %c0_328 = arith.constant 0 : index
    %c1_329 = arith.constant 1 : index
    %c0_330 = arith.constant 0 : index
    %c0_331 = arith.constant 0 : index
    %364 = vector.load %arg3[%c0_328, %c1_329, %c0_330, %c0_331] : memref<1x4x2x128xf32, #tpu.memory_space<vmem>>, vector<1x1x2x128xf32>
    %365 = vector.shape_cast %364 : vector<1x1x2x128xf32> to vector<2x128xf32>
    %c6_332 = arith.constant 6 : index
    %c1_333 = arith.constant 1 : index
    %366 = memref.load %arg5[%c6_332, %c1_333] : memref<8x4xf32, #tpu.memory_space<smem>>
    %367 = vector.broadcast %366 : f32 to vector<2x128xf32>
    %368 = arith.mulf %365, %367 : vector<2x128xf32>
    %369 = arith.addf %363, %368 : vector<2x128xf32>
    %c0_334 = arith.constant 0 : index
    %c2_335 = arith.constant 2 : index
    %c0_336 = arith.constant 0 : index
    %c0_337 = arith.constant 0 : index
    %370 = vector.load %arg3[%c0_334, %c2_335, %c0_336, %c0_337] : memref<1x4x2x128xf32, #tpu.memory_space<vmem>>, vector<1x1x2x128xf32>
    %371 = vector.shape_cast %370 : vector<1x1x2x128xf32> to vector<2x128xf32>
    %c6_338 = arith.constant 6 : index
    %c2_339 = arith.constant 2 : index
    %372 = memref.load %arg5[%c6_338, %c2_339] : memref<8x4xf32, #tpu.memory_space<smem>>
    %373 = vector.broadcast %372 : f32 to vector<2x128xf32>
    %374 = arith.mulf %371, %373 : vector<2x128xf32>
    %375 = arith.addf %369, %374 : vector<2x128xf32>
    %c0_340 = arith.constant 0 : index
    %c3_341 = arith.constant 3 : index
    %c0_342 = arith.constant 0 : index
    %c0_343 = arith.constant 0 : index
    %376 = vector.load %arg3[%c0_340, %c3_341, %c0_342, %c0_343] : memref<1x4x2x128xf32, #tpu.memory_space<vmem>>, vector<1x1x2x128xf32>
    %377 = vector.shape_cast %376 : vector<1x1x2x128xf32> to vector<2x128xf32>
    %c6_344 = arith.constant 6 : index
    %c3_345 = arith.constant 3 : index
    %378 = memref.load %arg5[%c6_344, %c3_345] : memref<8x4xf32, #tpu.memory_space<smem>>
    %379 = vector.broadcast %378 : f32 to vector<2x128xf32>
    %380 = arith.mulf %377, %379 : vector<2x128xf32>
    %381 = arith.addf %375, %380 : vector<2x128xf32>
    %c6_346 = arith.constant 6 : index
    %382 = memref.load %arg7[%c6_346] : memref<8xf32, #tpu.memory_space<smem>>
    %383 = vector.broadcast %382 : f32 to vector<2x128xf32>
    %384 = arith.addf %381, %383 : vector<2x128xf32>
    %cst_347 = arith.constant 0.000000e+00 : f32
    %385 = vector.broadcast %cst_347 : f32 to vector<2x128xf32>
    %386 = arith.maximumf %384, %385 : vector<2x128xf32>
    %c6_348 = arith.constant 6 : index
    %387 = memref.load %arg6[%c6_348] : memref<8xf32, #tpu.memory_space<smem>>
    %388 = vector.broadcast %387 : f32 to vector<2x128xf32>
    %389 = arith.mulf %386, %388 : vector<2x128xf32>
    %390 = arith.addf %334, %389 : vector<2x128xf32>
    %c0_349 = arith.constant 0 : index
    %c0_350 = arith.constant 0 : index
    %c0_351 = arith.constant 0 : index
    %c0_352 = arith.constant 0 : index
    %391 = vector.load %arg2[%c0_349, %c0_350, %c0_351, %c0_352] : memref<1x4x2x128xf32, #tpu.memory_space<vmem>>, vector<1x1x2x128xf32>
    %392 = vector.shape_cast %391 : vector<1x1x2x128xf32> to vector<2x128xf32>
    %c7 = arith.constant 7 : index
    %c0_353 = arith.constant 0 : index
    %393 = memref.load %arg4[%c7, %c0_353] : memref<8x4xf32, #tpu.memory_space<smem>>
    %394 = vector.broadcast %393 : f32 to vector<2x128xf32>
    %395 = arith.mulf %392, %394 : vector<2x128xf32>
    %c0_354 = arith.constant 0 : index
    %c1_355 = arith.constant 1 : index
    %c0_356 = arith.constant 0 : index
    %c0_357 = arith.constant 0 : index
    %396 = vector.load %arg2[%c0_354, %c1_355, %c0_356, %c0_357] : memref<1x4x2x128xf32, #tpu.memory_space<vmem>>, vector<1x1x2x128xf32>
    %397 = vector.shape_cast %396 : vector<1x1x2x128xf32> to vector<2x128xf32>
    %c7_358 = arith.constant 7 : index
    %c1_359 = arith.constant 1 : index
    %398 = memref.load %arg4[%c7_358, %c1_359] : memref<8x4xf32, #tpu.memory_space<smem>>
    %399 = vector.broadcast %398 : f32 to vector<2x128xf32>
    %400 = arith.mulf %397, %399 : vector<2x128xf32>
    %401 = arith.addf %395, %400 : vector<2x128xf32>
    %c0_360 = arith.constant 0 : index
    %c2_361 = arith.constant 2 : index
    %c0_362 = arith.constant 0 : index
    %c0_363 = arith.constant 0 : index
    %402 = vector.load %arg2[%c0_360, %c2_361, %c0_362, %c0_363] : memref<1x4x2x128xf32, #tpu.memory_space<vmem>>, vector<1x1x2x128xf32>
    %403 = vector.shape_cast %402 : vector<1x1x2x128xf32> to vector<2x128xf32>
    %c7_364 = arith.constant 7 : index
    %c2_365 = arith.constant 2 : index
    %404 = memref.load %arg4[%c7_364, %c2_365] : memref<8x4xf32, #tpu.memory_space<smem>>
    %405 = vector.broadcast %404 : f32 to vector<2x128xf32>
    %406 = arith.mulf %403, %405 : vector<2x128xf32>
    %407 = arith.addf %401, %406 : vector<2x128xf32>
    %c0_366 = arith.constant 0 : index
    %c3_367 = arith.constant 3 : index
    %c0_368 = arith.constant 0 : index
    %c0_369 = arith.constant 0 : index
    %408 = vector.load %arg2[%c0_366, %c3_367, %c0_368, %c0_369] : memref<1x4x2x128xf32, #tpu.memory_space<vmem>>, vector<1x1x2x128xf32>
    %409 = vector.shape_cast %408 : vector<1x1x2x128xf32> to vector<2x128xf32>
    %c7_370 = arith.constant 7 : index
    %c3_371 = arith.constant 3 : index
    %410 = memref.load %arg4[%c7_370, %c3_371] : memref<8x4xf32, #tpu.memory_space<smem>>
    %411 = vector.broadcast %410 : f32 to vector<2x128xf32>
    %412 = arith.mulf %409, %411 : vector<2x128xf32>
    %413 = arith.addf %407, %412 : vector<2x128xf32>
    %c0_372 = arith.constant 0 : index
    %c0_373 = arith.constant 0 : index
    %c0_374 = arith.constant 0 : index
    %c0_375 = arith.constant 0 : index
    %414 = vector.load %arg3[%c0_372, %c0_373, %c0_374, %c0_375] : memref<1x4x2x128xf32, #tpu.memory_space<vmem>>, vector<1x1x2x128xf32>
    %415 = vector.shape_cast %414 : vector<1x1x2x128xf32> to vector<2x128xf32>
    %c7_376 = arith.constant 7 : index
    %c0_377 = arith.constant 0 : index
    %416 = memref.load %arg5[%c7_376, %c0_377] : memref<8x4xf32, #tpu.memory_space<smem>>
    %417 = vector.broadcast %416 : f32 to vector<2x128xf32>
    %418 = arith.mulf %415, %417 : vector<2x128xf32>
    %419 = arith.addf %413, %418 : vector<2x128xf32>
    %c0_378 = arith.constant 0 : index
    %c1_379 = arith.constant 1 : index
    %c0_380 = arith.constant 0 : index
    %c0_381 = arith.constant 0 : index
    %420 = vector.load %arg3[%c0_378, %c1_379, %c0_380, %c0_381] : memref<1x4x2x128xf32, #tpu.memory_space<vmem>>, vector<1x1x2x128xf32>
    %421 = vector.shape_cast %420 : vector<1x1x2x128xf32> to vector<2x128xf32>
    %c7_382 = arith.constant 7 : index
    %c1_383 = arith.constant 1 : index
    %422 = memref.load %arg5[%c7_382, %c1_383] : memref<8x4xf32, #tpu.memory_space<smem>>
    %423 = vector.broadcast %422 : f32 to vector<2x128xf32>
    %424 = arith.mulf %421, %423 : vector<2x128xf32>
    %425 = arith.addf %419, %424 : vector<2x128xf32>
    %c0_384 = arith.constant 0 : index
    %c2_385 = arith.constant 2 : index
    %c0_386 = arith.constant 0 : index
    %c0_387 = arith.constant 0 : index
    %426 = vector.load %arg3[%c0_384, %c2_385, %c0_386, %c0_387] : memref<1x4x2x128xf32, #tpu.memory_space<vmem>>, vector<1x1x2x128xf32>
    %427 = vector.shape_cast %426 : vector<1x1x2x128xf32> to vector<2x128xf32>
    %c7_388 = arith.constant 7 : index
    %c2_389 = arith.constant 2 : index
    %428 = memref.load %arg5[%c7_388, %c2_389] : memref<8x4xf32, #tpu.memory_space<smem>>
    %429 = vector.broadcast %428 : f32 to vector<2x128xf32>
    %430 = arith.mulf %427, %429 : vector<2x128xf32>
    %431 = arith.addf %425, %430 : vector<2x128xf32>
    %c0_390 = arith.constant 0 : index
    %c3_391 = arith.constant 3 : index
    %c0_392 = arith.constant 0 : index
    %c0_393 = arith.constant 0 : index
    %432 = vector.load %arg3[%c0_390, %c3_391, %c0_392, %c0_393] : memref<1x4x2x128xf32, #tpu.memory_space<vmem>>, vector<1x1x2x128xf32>
    %433 = vector.shape_cast %432 : vector<1x1x2x128xf32> to vector<2x128xf32>
    %c7_394 = arith.constant 7 : index
    %c3_395 = arith.constant 3 : index
    %434 = memref.load %arg5[%c7_394, %c3_395] : memref<8x4xf32, #tpu.memory_space<smem>>
    %435 = vector.broadcast %434 : f32 to vector<2x128xf32>
    %436 = arith.mulf %433, %435 : vector<2x128xf32>
    %437 = arith.addf %431, %436 : vector<2x128xf32>
    %c7_396 = arith.constant 7 : index
    %438 = memref.load %arg7[%c7_396] : memref<8xf32, #tpu.memory_space<smem>>
    %439 = vector.broadcast %438 : f32 to vector<2x128xf32>
    %440 = arith.addf %437, %439 : vector<2x128xf32>
    %cst_397 = arith.constant 0.000000e+00 : f32
    %441 = vector.broadcast %cst_397 : f32 to vector<2x128xf32>
    %442 = arith.maximumf %440, %441 : vector<2x128xf32>
    %c7_398 = arith.constant 7 : index
    %443 = memref.load %arg6[%c7_398] : memref<8xf32, #tpu.memory_space<smem>>
    %444 = vector.broadcast %443 : f32 to vector<2x128xf32>
    %445 = arith.mulf %442, %444 : vector<2x128xf32>
    %446 = arith.addf %390, %445 : vector<2x128xf32>
    %c0_399 = arith.constant 0 : index
    %c0_400 = arith.constant 0 : index
    %c0_401 = arith.constant 0 : index
    %447 = vector.load %arg8[%c0_399, %c0_400, %c0_401] : memref<1x2x128xf32, #tpu.memory_space<vmem>>, vector<1x2x128xf32>
    %448 = vector.shape_cast %447 : vector<1x2x128xf32> to vector<2x128xf32>
    %449 = vector.shape_cast %446 : vector<2x128xf32> to vector<1x2x128xf32>
    tpu.vector_store %arg8[%c0_399, %c0_400, %c0_401], %449 {strides = array<i32>} : memref<1x2x128xf32, #tpu.memory_space<vmem>>, vector<1x2x128xf32>,
    %cst_402 = arith.constant dense<0.000000e+00> : vector<128xf32>
    %450 = vector.multi_reduction <add>, %446, %cst_402 [0] : vector<2x128xf32> to vector<128xf32>
    %451 = vector.shape_cast %450 : vector<128xf32> to vector<1x128xf32>
    %c0_403 = arith.constant 0 : index
    %c0_404 = arith.constant 0 : index
    %c0_405 = arith.constant 0 : index
    %c0_406 = arith.constant 0 : index
    %452 = vector.load %arg9[%c0_403, %c0_404, %c0_405, %c0_406] : memref<1x1x2x128xf32, #tpu.memory_space<vmem>>, vector<1x1x1x128xf32>
    %453 = vector.shape_cast %452 : vector<1x1x1x128xf32> to vector<1x128xf32>
    %454 = vector.shape_cast %451 : vector<1x128xf32> to vector<1x1x1x128xf32>
    tpu.vector_store %arg9[%c0_403, %c0_404, %c0_405, %c0_406], %454 {strides = array<i32>} : memref<1x1x2x128xf32, #tpu.memory_space<vmem>>, vector<1x1x1x128xf32>,
    %455 = arith.mulf %446, %446 : vector<2x128xf32>
    %cst_407 = arith.constant dense<0.000000e+00> : vector<128xf32>
    %456 = vector.multi_reduction <add>, %455, %cst_407 [0] : vector<2x128xf32> to vector<128xf32>
    %457 = vector.shape_cast %456 : vector<128xf32> to vector<1x128xf32>
    %c0_408 = arith.constant 0 : index
    %c0_409 = arith.constant 0 : index
    %c1_410 = arith.constant 1 : index
    %c0_411 = arith.constant 0 : index
    %458 = vector.load %arg9[%c0_408, %c0_409, %c1_410, %c0_411] : memref<1x1x2x128xf32, #tpu.memory_space<vmem>>, vector<1x1x1x128xf32>
    %459 = vector.shape_cast %458 : vector<1x1x1x128xf32> to vector<1x128xf32>
    %460 = vector.shape_cast %457 : vector<1x128xf32> to vector<1x1x1x128xf32>
    tpu.vector_store %arg9[%c0_408, %c0_409, %c1_410, %c0_411], %460 {strides = array<i32>} : memref<1x1x2x128xf32, #tpu.memory_space<vmem>>, vector<1x1x1x128xf32>,
    return
  }
  func.func @transform_0(%arg0: i32, %arg1: i32) -> (i32, i32, i32, i32) {
    %c0_i32 = arith.constant 0 : i32
    %c0_i32_0 = arith.constant 0 : i32
    %c0_i32_1 = arith.constant 0 : i32
    return %arg0, %c0_i32, %arg1, %c0_i32_0 : i32, i32, i32, i32
  }
  func.func @transform_1(%arg0: i32, %arg1: i32) -> (i32, i32, i32, i32) {
    %c0_i32 = arith.constant 0 : i32
    %c0_i32_0 = arith.constant 0 : i32
    %c0_i32_1 = arith.constant 0 : i32
    return %arg0, %c0_i32, %arg1, %c0_i32_0 : i32, i32, i32, i32
  }
  func.func @transform_2(%arg0: i32, %arg1: i32) -> (i32, i32) {
    %c0_i32 = arith.constant 0 : i32
    %c0_i32_0 = arith.constant 0 : i32
    %c0_i32_1 = arith.constant 0 : i32
    return %c0_i32, %c0_i32_0 : i32, i32
  }
  func.func @transform_3(%arg0: i32, %arg1: i32) -> (i32, i32) {
    %c0_i32 = arith.constant 0 : i32
    %c0_i32_0 = arith.constant 0 : i32
    %c0_i32_1 = arith.constant 0 : i32
    return %c0_i32, %c0_i32_0 : i32, i32
  }
  func.func @transform_4(%arg0: i32, %arg1: i32) -> i32 {
    %c0_i32 = arith.constant 0 : i32
    %c0_i32_0 = arith.constant 0 : i32
    return %c0_i32 : i32
  }
  func.func @transform_5(%arg0: i32, %arg1: i32) -> i32 {
    %c0_i32 = arith.constant 0 : i32
    %c0_i32_0 = arith.constant 0 : i32
    return %c0_i32 : i32
  }
  func.func @transform_6(%arg0: i32, %arg1: i32) -> (i32, i32, i32) {
    %c0_i32 = arith.constant 0 : i32
    %c0_i32_0 = arith.constant 0 : i32
    return %arg0, %arg1, %c0_i32 : i32, i32, i32
  }
  func.func @transform_7(%arg0: i32, %arg1: i32) -> (i32, i32, i32, i32) {
    %c0_i32 = arith.constant 0 : i32
    %c0_i32_0 = arith.constant 0 : i32
    %c0_i32_1 = arith.constant 0 : i32
    return %arg0, %arg1, %c0_i32, %c0_i32_0 : i32, i32, i32, i32
  }
}

</mosaic_0001>

<bundles_post_ra>
// kernel: attention_block_forward.5
= control target key start
LH: loop header
LB: loop body
LE: loop exit
PB: predicated region body
PF: predicated region fallthrough
CT: control target
= control target key end

     0   :  { %s966_s0 = inlined_call_operand.hbm [shape: f32[2,4,2,128], index: 0, kind: input, shape index: {}]   ;;  %s967_s1 = inlined_call_operand.hbm [shape: f32[2,2,128], index: 1, kind: input, shape index: {}]   ;;  %s968_s2 = inlined_call_operand.hbm [shape: f32[2], index: 2, kind: input, shape index: {}]   ;;  %s969_s3 = inlined_call_operand.hbm [shape: f32[2,4,2,128], index: 3, kind: output, shape index: {}]  }
   0x1   :  { %975 = sst [smem:[#allocation14_spill]] %s966_s0 }
   0x2   :  { %976 = sst [smem:[#allocation15_spill]] %s968_s2 }
   0x3   :  { %8 = vsyncpa [#allocation3], 0 }
   0x4   :  { %10 = vsyncpa [#allocation3 + $0x1], 0 }
   0x5   :  { %11 = vsyncpa [#allocation7], 0 }
   0x6   :  { %13 = vsyncpa [#allocation7 + $0x1], 0 }
   0x7   :  { %14 = vsyncpa [#allocation5], 0 }
   0x8   :  { %15 = vsyncpa [#allocation4], 0 }
   0x9   :  { %17 = vsyncpa [#allocation4 + $0x1], 0  ;;  %s729_s12 = smov 0   ;;  %s731_s13 = smov 0  }
   0xa   :  { %s733_s14 = smov 0   ;;  %s735_s15 = smov 0  }
   0xb   :  { %s737_s16 = smov 0   ;;  %s739_s17 = smov 0  }
   0xc LB: > { %s423_s18 = sadd.s32 4294967295, %s699_s17   ;;  %s424_s19 = sadd.s32 4294967294, %s699_s17   ;;  %s699_s17 = sphi %s739_s17, %s23_s17   ;;  %s695_s16 = sphi %s737_s16, %s995_s16   ;;  %s691_s15 = sphi %s735_s15, %s994_s15   ;;  %s687_s14 = sphi %s733_s14, %s993_s14   ;;  %s683_s13 = sphi %s731_s13, %s992_s13   ;;  %s679_s12 = sphi %s729_s12, %s991_s12  }
   0xd   : > { %s44_s20 = sadd.s32 1, %s687_s14  ;;  %p51_p0 = scmp.ne.s32.totalorder %s687_s14, %s683_s13 }
   0xe   : > { %p52_p1 = scmp.eq.s32.totalorder %s699_s17, 0  ;;  %p57_p2 = scmp.ne.s32.totalorder %s683_s13, %s679_s12 }
   0xf   : > { %p767_p3 = scmp.eq.s32.totalorder %s423_s18, 0  ;;  %p132_p4 = scmp.eq.s32.totalorder %s423_s18, 1 }
  0x10   : > { %p53_p5 = por %p52_p1, %p51_p0  ;;  %p138_p6 = scmp.eq.s32.totalorder %s424_s19, 1 }
  0x11   : > { %s977_s21 = scalar_select %p767_p3, 1, 0 }
  0x12   : > { %p773_p7 = por %p767_p3, %p57_p2  ;;  %p777_p8 = por %p132_p4, %p51_p0 }
  0x13   : > { %p781_p9 = por %p138_p6, %p57_p2  ;;  %p425_p10 = scmp.ge.s32.totalorder %s699_s17, 1 }
  0x14   : > { %s978_s22 = scalar_select %p773_p7, 1, 0 }
  0x15   : > { %s979_s23 = scalar_select %p777_p8, 1, 0 }
  0x16   : > { %s980_s24 = scalar_select %p781_p9, 1, 0 }
  0x17   : > { %p145_p11 = scmp.lt.s32.totalorder %s699_s17, 3  ;;  %p478_p1 = scmp.lt.s32.totalorder %s699_s17, 2 }
  0x18   : > { %s794_s26 = sand.u32 1, %s687_s14   ;;  %s35_s28 = sadd.s32 1, %s695_s16 }
  0x19   : > { %p788_p13 = pnand %p425_p10, %p145_p11  ;;  %p798_p4 = pnand %p478_p1, %p53_p5 }
  0x1a   : > { %s428_s29 = sshll.u32 %s794_s26, 3  ;;  %p37_p6 = scmp.ge.s32.totalorder %s35_s28, 2 }
  0x1b   : > { %s981_s25 = scalar_select %p788_p13, 1, 0 }
  0x1c   : > { %p462_p0 = pneg %p788_p13  ;;  %s983_s2 = sld [smem:[#allocation15_spill]] }
  0x1e   : > { %p463_p2 = pnand %p462_p0, %p767_p3 }
  0x20   : > { %p538_p11 = pneg %p463_p2 }
  0x22   : > { %s536_s5 = scalar_lea.hbm %s983_s2, 16 }
  0x23   : > { %p537_p10 = scmp.ne.s32.totalorder %s983_s2, %s536_s5  ;;  %p543_p5 = scmp.lt.u32.totalorder %s536_s5, %s983_s2 }
  0x25   : > { %p539_p12 = pnand %p538_p11, %p537_p10 }
  0x27   : > { %p540_p9 = pneg %p539_p12 }
  0x29   : > { %p545_p1 = pnand %p543_p5, %p540_p9 }
  0x2b   : > { %548 = shalt.err (!%p545_p1)
}
  0x2c   : > { %s701_s10 = smov [#allocation8]   ;;  %s997_s28 = smov (%p37_p6, %s35_s28), 0 }
  0x2d   : > { %465 = dma.hbm_to_smem (!%p463_p2), %s983_s2, 16, %s701_s10, [#allocation5]  }
  0x2e   : > { %s450_s19 = sshll.u32 %s695_s16, 7  ;;  %s39_s30 = ssub.s32 %s695_s16, %s997_s28 }
  0x2f   : > { %s984_s0 = sld [smem:[#allocation14_spill]]  ;;  %p42_p9 = scmp.eq.s32.totalorder %s39_s30, 0 }
  0x30   : > { %s171_s7 = scalar_lea.vmem [#allocation2], %s428_s29  ;;  %s168_s10 = scalar_lea.sflag [#allocation3], %s794_s26 }
  0x31   : > { %s179_s8 = sshll.u32 %s171_s7, 4  ;;  %p551_p0 = pneg %p798_p4  ;;  %s828_s8 = int_to_ptr.vmem [resolvable:$true] %s179_s8 }
  0x32   : > { %s833_s9 = scalar_select %p42_p9, %s687_s14, %s44_s20  }
  0x35   : > { %s826_s6 = scalar_lea.hbm %s984_s0, %s450_s19  ;;  %s554_s30 = scalar_lea.hbm %s984_s0, 256 }
  0x36   : > { %s549_s11 = scalar_lea.hbm %s826_s6, 128  ;;  %p555_p10 = scmp.lt.u32.totalorder %s826_s6, %s984_s0 }
  0x37   : > { %p550_p12 = scmp.ne.s32.totalorder %s826_s6, %s549_s11  ;;  %p556_p11 = scmp.lt.u32.totalorder %s554_s30, %s549_s11 }
  0x38   : > { %p558_p1 = scmp.lt.u32.totalorder %s549_s11, %s826_s6 }
  0x39   : > { %p552_p2 = pnand %p551_p0, %p550_p12  ;;  %p557_p5 = por %p556_p11, %p555_p10 }
  0x3b   : > { %p553_p6 = pneg %p552_p2  ;;  %p559_p9 = por %p558_p1, %p557_p5 }
  0x3d   : > { %p560_p8 = pnand %p559_p9, %p553_p6 }
  0x3f   : > { %563 = shalt.err (!%p560_p8)
}
  0x40   : > { %s564_s20 = scalar_lea.vmem %s828_s8, 128  ;;  %s702_s5 = smov [#allocation2]  }
  0x41   : > { %p565_p12 = scmp.ne.s32.totalorder %s828_s8, %s564_s20  ;;  %s569_s7 = sshll.u32 %s702_s5, 4  ;;  %s570_s7 = int_to_ptr.vmem [resolvable:$false] %s569_s7 }
  0x42   : > { %s571_s18 = scalar_lea.vmem %s570_s7, 256  ;;  %p572_p7 = scmp.lt.s32.totalorder %s828_s8, %s570_s7 }
  0x43   : > { %p567_p2 = pnand %p565_p12, %p551_p0  ;;  %p573_p10 = scmp.lt.s32.totalorder %s571_s18, %s564_s20 }
  0x45   : > { %p568_p3 = pneg %p567_p2  ;;  %p574_p11 = por %p573_p10, %p572_p7 }
  0x47   : > { %p575_p5 = pnand %p574_p11, %p568_p3 }
  0x49   : > { %578 = shalt.err (!%p575_p5)
}
  0x4a   : > { %s703_s11 = smov 32   ;;  %s704_s19 = smov 2  }
  0x4b   : > { %469 = dma.hbm_to_vmem [thread:$0]  (!%p798_p4), %s826_s6, 128, %s828_s8, %s168_s10, %s703_s11, %s703_s11, %s704_s19  }
  0x4c   : > { %s431_s30 = sshll.u32 %s794_s26, 1  ;;  %s432_s29 = sshll.u32 %s695_s16, 5 }
  0x4d   : > { %s868_s5 = scalar_lea.hbm %s967_s1, %s432_s29  ;;  %s193_s7 = scalar_lea.vmem [#allocation6], %s431_s30 }
  0x4e   : > { %s201_s18 = sshll.u32 %s193_s7, 4  ;;  %s190_s0 = scalar_lea.sflag [#allocation7], %s794_s26  ;;  %s202_s18 = int_to_ptr.vmem [resolvable:$true] %s201_s18 }
  0x4f   : > { %s579_s2 = scalar_lea.hbm %s868_s5, 32  ;;  %s584_s10 = scalar_lea.hbm %s967_s1, 64 }
  0x50   : > { %p580_p3 = scmp.ne.s32.totalorder %s868_s5, %s579_s2  ;;  %p585_p6 = scmp.lt.u32.totalorder %s868_s5, %s967_s1 }
  0x51   : > { %p586_p1 = scmp.lt.u32.totalorder %s584_s10, %s579_s2  ;;  %p588_p12 = scmp.lt.u32.totalorder %s579_s2, %s868_s5 }
  0x52   : > { %p582_p7 = pnand %p580_p3, %p551_p0 }
  0x53   : > { %p587_p9 = por %p586_p1, %p585_p6 }
  0x54   : > { %p583_p8 = pneg %p582_p7 }
  0x55   : > { %p589_p2 = por %p588_p12, %p587_p9 }
  0x57   : > { %p590_p10 = pnand %p589_p2, %p583_p8 }
  0x59   : > { %593 = shalt.err (!%p590_p10)
}
  0x5a   : > { %s594_s26 = scalar_lea.vmem %s202_s18, 32  ;;  %s705_s30 = smov [#allocation6]  }
  0x5b   : > { %p595_p11 = scmp.ne.s32.totalorder %s202_s18, %s594_s26  ;;  %s599_s29 = sshll.u32 %s705_s30, 4  ;;  %s600_s29 = int_to_ptr.vmem [resolvable:$false] %s599_s29 }
  0x5c   : > { %s601_s4 = scalar_lea.vmem %s600_s29, 64  ;;  %p602_p7 = scmp.lt.s32.totalorder %s202_s18, %s600_s29 }
  0x5d   : > { %p597_p5 = pnand %p595_p11, %p551_p0  ;;  %p603_p13 = scmp.lt.s32.totalorder %s601_s4, %s594_s26 }
  0x5f   : > { %p598_p3 = pneg %p597_p5  ;;  %p604_p1 = por %p603_p13, %p602_p7 }
  0x61   : > { %p605_p6 = pnand %p604_p1, %p598_p3 }
  0x63   : > { %608 = shalt.err (!%p605_p6)
}
  0x64   : > { %472 = dma.hbm_to_vmem [thread:$0]  (!%p798_p4), %s868_s5, 32, %s202_s18, %s190_s0  }
  0x65   : > { %p985_p8 = scmp.ne.s32.totalorder %s981_s25, 0 }
  0x66   : > { %s893_s2 = sand.u32 (!%p985_p8), 1, %s683_s13   ;;  %p986_p0 = scmp.ne.s32.totalorder (!%p985_p8), %s978_s22, 0 }
  0x67   : > { %210 = sbr.rel (%p985_p8) target bundleno = 165 (0xa5), region = 32  ;;  %s434_s20 = sshll.u32 (!%p985_p8), %s893_s2, 3 }
  0x68   : > { %s213_s7 = scalar_lea.sflag (!%p985_p8), [#allocation3], %s893_s2  ;;  %s216_s6 = scalar_lea.vmem (!%p985_p8), [#allocation2], %s434_s20 }
  0x6e   : > { %662 = dma.done.wait (%p986_p0), %s213_s7, 128  }
  0x6f   : > { %664 = vsyncadd (%p986_p0), %s213_s7, 4294967168  ;;  %s435_s0 = sshll.u32 %s893_s2, 1  ;;  %s222_s25 = scalar_lea.sflag [#allocation7], %s893_s2 }
  0x70   : > { %s225_s27 = scalar_lea.vmem [#allocation6], %s435_s0 }
  0x71   : > { %666 = dma.done.wait (%p986_p0), %s222_s25, 32  }
  0x72   : > { %668 = vsyncadd (%p986_p0), %s222_s25, 4294967264  ;;  %p987_p13 = scmp.ne.s32.totalorder %s977_s21, 0 }
  0x74   : > { %670 = dma.done.wait (%p987_p13), [#allocation5], 16  }
  0x75   : > { %672 = vsyncadd (%p987_p13), [#allocation5], 4294967280 }
  0x76   : > { %234 = sfence }
  0x77   : > { %s259_s5 = sld [smem:[#allocation8]]  ;;  %s438_s18 = sld [smem:[#allocation8 + $0x1]]  ;;  %v258_v0 = vld [vmem:[%s225_s27] sm:$0x3]  ;;  %v269_v8 = vld [vmem:[%s216_s6] sm:$0x3] }
  0x78   : > { %s257_s22 = scalar_lea.vmem [#allocation9], %s434_s20  ;;  %s451_s10 = sshll.u32 %s691_s15, 7  ;;  %v439_v9 = vld [vmem:[%s216_s6 + $0x2] sm:$0x3]  ;;  %v441_v10 = vld [vmem:[%s216_s6 + $0x4] sm:$0x3] }
  0x79   : > { %s302_s8 = sshll.u32 %s257_s22, 4  ;;  %v443_v11 = vld [vmem:[%s216_s6 + $0x6] sm:$0x3]  ;;  %s917_s19 = scalar_lea.hbm %s969_s3, %s451_s10  ;;  %s912_s8 = int_to_ptr.vmem [resolvable:$true] %s302_s8 }
  0x7a   : > { %s288_s15 = scalar_lea.sflag [#allocation4], %s893_s2  ;;  %s609_s26 = scalar_lea.vmem %s912_s8, 128 }
  0x7b   : > { %p610_p4 = scmp.ne.s32.totalorder %s912_s8, %s609_s26  ;;  %p988_p9 = scmp.ne.s32.totalorder %s979_s23, 0 }
  0x7c   : > { %s706_s30 = smov [#allocation9]  }
  0x7d   : > { %v260_v1 = vstv %s259_s5  ;;  %v263_v3 = vstv %s438_s18  ;;  %p611_p12 = pnand %p610_p4, %p988_p9  ;;  %s613_s29 = sshll.u32 %s706_s30, 4  ;;  %s614_s29 = int_to_ptr.vmem [resolvable:$false] %s613_s29 }
  0x7e   : > { %v261_v2 = vmul.f32 %v260_v1, %v258_v0  ;;  %s615_s4 = scalar_lea.vmem %s614_s29, 256  ;;  %p616_p10 = scmp.lt.s32.totalorder %s912_s8, %s614_s29 }
  0x7f   : > { %p612_p2 = pneg %p611_p12  ;;  %p617_p11 = scmp.lt.s32.totalorder %s615_s4, %s609_s26 }
  0x80   : > { %v264_v4 = vadd.f32 %v263_v3, %v261_v2 }
  0x81   : > { %p618_p5 = por %p617_p11, %p616_p10 }
  0x82   : > { %v265_v5 = vmul.f32 0.5, %v264_v4 }
  0x83   : > { %p619_p3 = pnand %p618_p5, %p612_p2 }
  0x84   : > { %534 = vtanh.f32 %v265_v5 }
  0x8e   : > { %v535_v6 = vpop.eup %534 }
  0x8f   : > { %v267_v7 = vmul.f32 0.5, %v535_v6 }
  0x91   : > { %v268_v12 = vadd.f32 0.5, %v267_v7 }
  0x93   : > { %v270_v13 = vmul.f32 %v269_v8, %v268_v12  ;;  %v274_v14 = vmul.f32 %v439_v9, %v268_v12  ;;  %v279_v15 = vmul.f32 %v441_v10, %v268_v12  ;;  %v284_v16 = vmul.f32 %v443_v11, %v268_v12 }
  0x95   : > { %271 = vst [vmem:[%s257_s22] sm:$0x3] %v270_v13  ;;  %440 = vst [vmem:[%s257_s22 + $0x2] sm:$0x3] %v274_v14 }
  0x96   : > { %442 = vst [vmem:[%s257_s22 + $0x4] sm:$0x3] %v279_v15  ;;  %444 = vst [vmem:[%s257_s22 + $0x6] sm:$0x3] %v284_v16 }
  0x97   : > { %622 = shalt.err (!%p619_p3)
}
  0x98   : > { %s623_s20 = scalar_lea.hbm %s917_s19, 128  ;;  %s627_s0 = scalar_lea.hbm %s969_s3, 256 }
  0x99   : > { %p624_p7 = scmp.ne.s32.totalorder %s917_s19, %s623_s20  ;;  %p628_p8 = scmp.lt.u32.totalorder %s917_s19, %s969_s3 }
  0x9a   : > { %p629_p0 = scmp.lt.u32.totalorder %s627_s0, %s623_s20  ;;  %p631_p4 = scmp.lt.u32.totalorder %s623_s20, %s917_s19 }
  0x9b   : > { %p625_p1 = pnand %p624_p7, %p988_p9 }
  0x9c   : > { %p630_p13 = por %p629_p0, %p628_p8 }
  0x9d   : > { %p626_p6 = pneg %p625_p1 }
  0x9e   : > { %p632_p12 = por %p631_p4, %p630_p13 }
  0xa0   : > { %p633_p2 = pnand %p632_p12, %p626_p6 }
  0xa2   : > { %636 = shalt.err (!%p633_p2)
}
  0xa3   : > { %s707_s5 = smov 32   ;;  %s708_s18 = smov 2  }
  0xa4   : > { %460 = dma.vmem_to_hbm [thread:$0]  (%p988_p9), %s912_s8, 128, %s917_s19, %s288_s15, %s707_s5, %s707_s5, %s708_s18  }
  0xa5 PF: > { %s317_s22 = sand.u32 1, %s679_s12   ;;  %p989_p10 = scmp.ne.s32.totalorder %s980_s24, 0 }
  0xa6   : > { %p990_p11 = scmp.ge.s32.totalorder %s699_s17, 2  ;;  %s318_s10 = scalar_lea.sflag [#allocation4], %s317_s22 }
  0xa8   : > { %p474_p5 = pnand %p990_p11, %p989_p10 }
  0xaa   : > { %674 = dma.done.wait (!%p474_p5), %s318_s10, 128  }
  0xab   : > { %676 = vsyncadd (!%p474_p5), %s318_s10, 4294967168  ;;  %s23_s17 = sadd.s32 1, %s699_s17   ;;  %s991_s12 = smov %s683_s13 }
  0xac   : > { %p20_p3 = scmp.ge.s32.totalorder %s23_s17, 4   ;;  %s992_s13 = smov %s687_s14 }
  0xad   : > { %s993_s14 = smov %s833_s9  ;;  %s994_s15 = smov %s695_s16 }
  0xae   : > { %s995_s16 = smov %s997_s28  ;;  %22 = sbr.rel (!%p20_p3) target bundleno = 12 (0xc), region = 101 }
  0xb5   :  { %323 = vsyncpa [#allocation3], 1 }
  0xb6   :  { %325 = vsyncpa [#allocation3 + $0x1], 1 }
  0xb7   :  { %326 = vsyncpa [#allocation7], 1 }
  0xb8   :  { %328 = vsyncpa [#allocation7 + $0x1], 1 }
  0xb9   :  { %329 = vsyncpa [#allocation4], 1 }
  0xba   :  { %331 = vsyncpa [#allocation4 + $0x1], 1 }
  0xbb   :  { %332 = vsyncpa [#allocation5], 1 }
  0xbc   :  { %334 = vsyncpa [#allocation5 + $0x1], 1 }

// kernel: attention_block_forward.3
= control target key start
LH: loop header
LB: loop body
LE: loop exit
PB: predicated region body
PF: predicated region fallthrough
CT: control target
= control target key end

     0   :  { %9 = vsyncpa [#allocation3], 0  ;;  %s1615_s0 = inlined_call_operand.hbm [shape: f32[2,4,2,128], index: 0, kind: input, shape index: {}]   ;;  %s1616_s1 = inlined_call_operand.hbm [shape: f32[2,4,2,128], index: 1, kind: input, shape index: {}]   ;;  %s1617_s2 = inlined_call_operand.hbm [shape: f32[2,1,20,128], index: 2, kind: output, shape index: {0}]   ;;  %s1618_s3 = inlined_call_operand.hbm [shape: f32[2,1,20,128], index: 3, kind: output, shape index: {1}]  }
   0x1   :  { %11 = vsyncpa [#allocation3 + $0x1], 0 }
   0x2   :  { %12 = vsyncpa [#allocation6], 0 }
   0x3   :  { %14 = vsyncpa [#allocation6 + $0x1], 0 }
   0x4   :  { %15 = vsyncpa [#allocation4], 0 }
   0x5   :  { %17 = vsyncpa [#allocation4 + $0x1], 0 }
   0x6   :  { %18 = vsyncpa [#allocation9], 0 }
   0x7   :  { %20 = vsyncpa [#allocation9 + $0x1], 0  ;;  %s1182_s12 = smov 0   ;;  %s1184_s13 = smov 0  }
   0x8   :  { %s1186_s14 = smov 0   ;;  %s1188_s15 = smov 0  }
   0x9   :  { %s1190_s16 = smov 0   ;;  %s1192_s17 = smov 0  }
   0xa LB: > { %s846_s18 = sadd.s32 4294967295, %s1152_s17   ;;  %s847_s19 = sadd.s32 4294967294, %s1152_s17   ;;  %s1152_s17 = sphi %s1192_s17, %s26_s17   ;;  %s1148_s16 = sphi %s1190_s16, %s1636_s16   ;;  %s1144_s15 = sphi %s1188_s15, %s1635_s15   ;;  %s1140_s14 = sphi %s1186_s14, %s1634_s14   ;;  %s1136_s13 = sphi %s1184_s13, %s1633_s13   ;;  %s1132_s12 = sphi %s1182_s12, %s1632_s12  }
   0xb   : > { %s38_s20 = sadd.s32 1, %s1148_s16  ;;  %s47_s21 = sadd.s32 1, %s1140_s14 }
   0xc   : > { %p40_p0 = scmp.ge.s32.totalorder %s38_s20, 2  ;;  %p54_p1 = scmp.ne.s32.totalorder %s1140_s14, %s1136_s13 }
   0xd   : > { %p55_p2 = scmp.eq.s32.totalorder %s1152_s17, 0  ;;  %p60_p3 = scmp.ne.s32.totalorder %s1136_s13, %s1132_s12 }
   0xe   : > { %s1638_s20 = smov (%p40_p0, %s38_s20), 0  ;;  %p61_p5 = scmp.eq.s32.totalorder %s846_s18, 0 }
   0xf   : > { %p1223_p4 = por %p55_p2, %p54_p1  ;;  %s42_s23 = ssub.s32 %s1148_s16, %s1638_s20 }
  0x10   : > { %p114_p6 = scmp.eq.s32.totalorder %s846_s18, 1  ;;  %p45_p7 = scmp.eq.s32.totalorder %s42_s23, 0 }
  0x11   : > { %p1229_p8 = por %p61_p5, %p60_p3  ;;  %p120_p10 = scmp.eq.s32.totalorder %s847_s19, 1 }
  0x12   : > { %p1233_p9 = por %p114_p6, %p54_p1  ;;  %p920_p13 = scmp.lt.s32.totalorder %s1152_s17, 2 }
  0x13   : > { %s1622_s24 = scalar_select %p1229_p8, 1, 0 }
  0x14   : > { %s1623_s25 = scalar_select %p1233_p9, 1, 0 }
  0x15   : > { %s1238_s26 = scalar_select %p45_p7, %s1140_s14, %s47_s21  }
  0x16   : > { %p1240_p11 = por %p120_p10, %p60_p3  ;;  %s1247_s28 = sand.u32 1, %s1140_s14  }
  0x17   : > { %s850_s29 = sshll.u32 %s1247_s28, 3  ;;  %s893_s30 = sshll.u32 %s1148_s16, 7 }
  0x18   : > { %s1624_s27 = scalar_select %p1240_p11, 1, 0 }
  0x19   : > { %s1256_s6 = scalar_lea.hbm %s1615_s0, %s893_s30  ;;  %s172_s7 = scalar_lea.vmem [#allocation2], %s850_s29 }
  0x1a   : > { %s180_s8 = sshll.u32 %s172_s7, 4  ;;  %p1264_p0 = pnand %p920_p13, %p1223_p4  ;;  %s1260_s8 = int_to_ptr.vmem [resolvable:$true] %s180_s8 }
  0x1b   : > { %s169_s10 = scalar_lea.sflag [#allocation3], %s1247_s28  ;;  %s974_s11 = scalar_lea.hbm %s1256_s6, 128 }
  0x1c   : > { %p975_p2 = scmp.ne.s32.totalorder %s1256_s6, %s974_s11  ;;  %p976_p3 = pneg %p1264_p0 }
  0x1d   : > { %s979_s21 = scalar_lea.hbm %s1615_s0, 256  ;;  %p980_p4 = scmp.lt.u32.totalorder %s1256_s6, %s1615_s0 }
  0x1e   : > { %p977_p5 = pnand %p976_p3, %p975_p2  ;;  %p981_p7 = scmp.lt.u32.totalorder %s979_s21, %s974_s11 }
  0x1f   : > { %p983_p13 = scmp.lt.u32.totalorder %s974_s11, %s1256_s6 }
  0x20   : > { %p978_p6 = pneg %p977_p5  ;;  %p982_p10 = por %p981_p7, %p980_p4 }
  0x22   : > { %p984_p12 = por %p983_p13, %p982_p10 }
  0x24   : > { %p985_p1 = pnand %p984_p12, %p978_p6 }
  0x26   : > { %988 = shalt.err (!%p985_p1)
}
  0x27   : > { %s989_s4 = scalar_lea.vmem %s1260_s8, 128  ;;  %s1154_s5 = smov [#allocation2]  }
  0x28   : > { %p990_p2 = scmp.ne.s32.totalorder %s1260_s8, %s989_s4  ;;  %s994_s7 = sshll.u32 %s1154_s5, 4  ;;  %s995_s7 = int_to_ptr.vmem [resolvable:$false] %s994_s7 }
  0x29   : > { %s996_s18 = scalar_lea.vmem %s995_s7, 256  ;;  %p997_p9 = scmp.lt.s32.totalorder %s1260_s8, %s995_s7 }
  0x2a   : > { %p992_p5 = pnand %p990_p2, %p976_p3  ;;  %p998_p4 = scmp.lt.s32.totalorder %s996_s18, %s989_s4 }
  0x2c   : > { %p993_p11 = pneg %p992_p5  ;;  %p999_p7 = por %p998_p4, %p997_p9 }
  0x2e   : > { %p1000_p10 = pnand %p999_p7, %p993_p11 }
  0x30   : > { %1003 = shalt.err (!%p1000_p10)
}
  0x31   : > { %s1155_s11 = smov 32   ;;  %s1156_s19 = smov 2  }
  0x32   : > { %909 = dma.hbm_to_vmem [thread:$0]  (!%p1264_p0), %s1256_s6, 128, %s1260_s8, %s169_s10, %s1155_s11, %s1155_s11, %s1156_s19  }
  0x33   : > { %p210_p9 = scmp.lt.s32.totalorder %s1152_s17, 3  ;;  %s1306_s23 = scalar_lea.hbm %s1616_s1, %s893_s30 }
  0x34   : > { %p1626_p11 = scmp.ge.s32.totalorder %s1152_s17, 1  ;;  %s194_s5 = scalar_lea.vmem [#allocation5], %s850_s29 }
  0x35   : > { %s202_s7 = sshll.u32 %s194_s5, 4  ;;  %s191_s6 = scalar_lea.sflag [#allocation6], %s1247_s28  ;;  %s1316_s7 = int_to_ptr.vmem [resolvable:$true] %s202_s7 }
  0x36   : > { %p1310_p12 = pnand %p1626_p11, %p210_p9  ;;  %s1004_s8 = scalar_lea.hbm %s1306_s23, 128 }
  0x37   : > { %p1005_p1 = scmp.ne.s32.totalorder %s1306_s23, %s1004_s8  ;;  %s1009_s18 = scalar_lea.hbm %s1616_s1, 256 }
  0x38   : > { %p1010_p2 = scmp.lt.u32.totalorder %s1306_s23, %s1616_s1  ;;  %p1011_p5 = scmp.lt.u32.totalorder %s1009_s18, %s1004_s8 }
  0x39   : > { %p1007_p6 = pnand %p1005_p1, %p976_p3  ;;  %p1013_p7 = scmp.lt.u32.totalorder %s1004_s8, %s1306_s23 }
  0x3a   : > { %p1012_p4 = por %p1011_p5, %p1010_p2 }
  0x3b   : > { %p1008_p13 = pneg %p1007_p6 }
  0x3c   : > { %p1014_p10 = por %p1013_p7, %p1012_p4 }
  0x3e   : > { %p1015_p9 = pnand %p1014_p10, %p1008_p13 }
  0x40   : > { %1018 = shalt.err (!%p1015_p9)
}
  0x41   : > { %s1019_s29 = scalar_lea.vmem %s1316_s7, 128  ;;  %s1157_s5 = smov [#allocation5]  }
  0x42   : > { %p1020_p11 = scmp.ne.s32.totalorder %s1316_s7, %s1019_s29  ;;  %s1024_s30 = sshll.u32 %s1157_s5, 4  ;;  %s1025_s30 = int_to_ptr.vmem [resolvable:$false] %s1024_s30 }
  0x43   : > { %s1026_s10 = scalar_lea.vmem %s1025_s30, 256  ;;  %p1027_p8 = scmp.lt.s32.totalorder %s1316_s7, %s1025_s30 }
  0x44   : > { %p1022_p1 = pnand %p1020_p11, %p976_p3  ;;  %p1028_p2 = scmp.lt.s32.totalorder %s1026_s10, %s1019_s29 }
  0x46   : > { %p1023_p6 = pneg %p1022_p1  ;;  %p1029_p5 = por %p1028_p2, %p1027_p8 }
  0x48   : > { %p1030_p4 = pnand %p1029_p5, %p1023_p6 }
  0x4a   : > { %1033 = shalt.err (!%p1030_p4)
}
  0x4b   : > { %912 = dma.hbm_to_vmem [thread:$0]  (!%p1264_p0), %s1306_s23, 128, %s1316_s7, %s191_s6, %s1155_s11, %s1155_s11, %s1156_s19  }
  0x4c   : > { %214 = sbr.rel (%p1310_p12) target bundleno = 200 (0xc8), region = 28  ;;  %s1350_s8 = sand.u32 (!%p1310_p12), 1, %s1136_s13  }
  0x4d   : > { %s857_s18 = sshll.u32 (!%p1310_p12), %s1350_s8, 3  ;;  %s217_s21 = scalar_lea.sflag (!%p1310_p12), [#allocation3], %s1350_s8 }
  0x4e   : > { %s1354_s9 = scalar_lea.vmem (!%p1310_p12), [#allocation2], %s857_s18  ;;  %p1628_p8 = scmp.ne.s32.totalorder (!%p1310_p12), %s1622_s24, 0 }
  0x53   : > { %1115 = dma.done.wait (%p1628_p8), %s217_s21, 128  }
  0x54   : > { %1117 = vsyncadd (%p1628_p8), %s217_s21, 4294967168  ;;  %s226_s28 = scalar_lea.sflag [#allocation6], %s1350_s8  ;;  %s1361_s11 = scalar_lea.vmem [#allocation5], %s857_s18 }
  0x55   : > { %1119 = dma.done.wait (%p1628_p8), %s226_s28, 128  }
  0x56   : > { %1121 = vsyncadd (%p1628_p8), %s226_s28, 4294967168  ;;  %vm263_vm0 = vcmask 1041408   ;;  %v262_v0 = vld [vmem:[%s1354_s9] sm:$0x3]  ;;  %v859_v2 = vld [vmem:[%s1354_s9 + $0x2] sm:$0x3] }
  0x57   : > { %v272_v1 = vld [vmem:[%s1354_s9] sm:$0x3]  ;;  %v264_v3 = vsel %vm263_vm0, %v262_v0, 0.0  ;;  %v284_v5 = vmul.f32 %v859_v2, %v262_v0  ;;  %v860_v6 = vld [vmem:[%s1354_s9 + $0x4] sm:$0x3]  ;;  %s895_s24 = smul.u32 24, %s1350_s8 }
  0x58   : > { %v273_v4 = vmul.f32 %v272_v1, %v262_v0  ;;  %v861_v7 = vld [vmem:[%s1354_s9 + $0x6] sm:$0x3]  ;;  %v265_v8 = vrot.slane %v264_v3, 4  ;;  %v295_v9 = vmul.f32 %v860_v6, %v262_v0  ;;  %v1374_v11 = vld [vmem:[%s1354_s9 + $0x2] sm:$0x3]  ;;  %s896_s23 = smul.u32 384, %s1144_s15 }
  0x59   : > { %v306_v10 = vmul.f32 %v861_v7, %v262_v0  ;;  %v324_v12 = vld [vmem:[%s1354_s9] sm:$0x3]  ;;  %v285_v14 = vsel %vm263_vm0, %v284_v5, 0.0  ;;  %v316_v15 = vsel %vm263_vm0, %v1374_v11, 0.0  ;;  %v863_v21 = vld [vmem:[%s1354_s9 + $0x2] sm:$0x3] }
  0x5a   : > { %v274_v13 = vsel %vm263_vm0, %v273_v4, 0.0  ;;  %v325_v16 = vmul.f32 %v1374_v11, %v324_v12  ;;  %v266_v17 = vadd.f32 %v265_v8, %v264_v3  ;;  %v286_v19 = vrot.slane %v285_v14, 4  ;;  %v864_v50 = vld [vmem:[%s1354_s9 + $0x4] sm:$0x3]  ;;  %v865_v59 = vld [vmem:[%s1354_s9 + $0x6] sm:$0x3]  ;;  %s1469_s22 = scalar_lea.hbm %s1617_s2, %s896_s23 }
  0x5b   : > { %v275_v18 = vrot.slane %v274_v13, 4  ;;  %v296_v20 = vsel %vm263_vm0, %v295_v9, 0.0  ;;  %v307_v23 = vsel %vm263_vm0, %v306_v10, 0.0  ;;  %v317_v24 = vrot.slane %v316_v15, 4  ;;  %s1393_s19 = scalar_lea.vmem [#allocation7], %s895_s24  ;;  %s1473_s29 = scalar_lea.vmem [#allocation8], %s895_s24 }
  0x5c   : > { %v297_v22 = vrot.slane %v296_v20, 4  ;;  %v326_v25 = vsel %vm263_vm0, %v325_v16, 0.0  ;;  %v267_v26 = vrot.slane %v266_v17, 2  ;;  %v287_v28 = vadd.f32 %v286_v19, %v285_v14  ;;  %v866_v0 = vld [vmem:[%s1354_s9 + $0x4] sm:$0x3]  ;;  %s682_s4 = sshll.u32 %s1393_s19, 4  ;;  %s1479_s4 = int_to_ptr.vmem [resolvable:$true] %s682_s4 }
  0x5d   : > { %v276_v27 = vadd.f32 %v275_v18, %v274_v13  ;;  %v308_v29 = vrot.slane %v307_v23, 4  ;;  %v318_v31 = vadd.f32 %v317_v24, %v316_v15  ;;  %v327_v32 = vrot.slane %v326_v25, 4  ;;  %v373_v1 = vld [vmem:[%s1354_s9] sm:$0x3]  ;;  %v867_v6 = vld [vmem:[%s1354_s9 + $0x2] sm:$0x3] }
  0x5e   : > { %v298_v30 = vadd.f32 %v297_v22, %v296_v20  ;;  %v335_v33 = vmul.f32 %v863_v21, %v1374_v11  ;;  %v268_v34 = vadd.f32 %v267_v26, %v266_v17  ;;  %v288_v36 = vrot.slane %v287_v28, 2  ;;  %v868_v7 = vld [vmem:[%s1354_s9 + $0x4] sm:$0x3]  ;;  %v869_v17 = vld [vmem:[%s1354_s9 + $0x6] sm:$0x3]  ;;  %s662_s5 = scalar_lea.sflag [#allocation4], %s1350_s8 }
  0x5f   : > { %v277_v35 = vrot.slane %v276_v27, 2  ;;  %v309_v37 = vadd.f32 %v308_v29, %v307_v23  ;;  %v319_v39 = vrot.slane %v318_v31, 2  ;;  %v328_v40 = vadd.f32 %v327_v32, %v326_v25  ;;  %s1034_s30 = scalar_lea.vmem %s1479_s4, 384  ;;  %p1629_p3 = scmp.ne.s32.totalorder %s1623_s25, 0 }
  0x60   : > { %v299_v38 = vrot.slane %v298_v30, 2  ;;  %v336_v41 = vsel %vm263_vm0, %v335_v33, 0.0  ;;  %v269_v42 = vrot.slane %v268_v34, 1  ;;  %v289_v44 = vadd.f32 %v288_v36, %v287_v28  ;;  %p1035_p0 = scmp.ne.s32.totalorder %s1479_s4, %s1034_s30  ;;  %s1158_s10 = smov [#allocation7]  }
  0x61   : > { %v278_v43 = vadd.f32 %v277_v35, %v276_v27  ;;  %v310_v45 = vrot.slane %v309_v37, 2  ;;  %v320_v47 = vadd.f32 %v319_v39, %v318_v31  ;;  %v329_v48 = vrot.slane %v328_v40, 2  ;;  %s1038_s18 = sshll.u32 %s1158_s10, 4  ;;  %s1039_s18 = int_to_ptr.vmem [resolvable:$false] %s1038_s18 }
  0x62   : > { %v300_v46 = vadd.f32 %v299_v38, %v298_v30  ;;  %v337_v49 = vrot.slane %v336_v41, 4  ;;  %v270_v51 = vadd.f32 %v269_v42, %v268_v34  ;;  %v290_v53 = vrot.slane %v289_v44, 1  ;;  %p1036_p12 = pnand %p1035_p0, %p1629_p3  ;;  %s1040_s21 = scalar_lea.vmem %s1039_s18, 768 }
  0x63   : > { %v279_v52 = vrot.slane %v278_v43, 1  ;;  %v311_v54 = vadd.f32 %v310_v45, %v309_v37  ;;  %v321_v56 = vrot.slane %v320_v47, 1  ;;  %v330_v57 = vadd.f32 %v329_v48, %v328_v40  ;;  %p1041_p7 = scmp.lt.s32.totalorder %s1479_s4, %s1039_s18  ;;  %p1042_p10 = scmp.lt.s32.totalorder %s1040_s21, %s1034_s30 }
  0x64   : > { %v301_v55 = vrot.slane %v300_v46, 1  ;;  %v338_v58 = vadd.f32 %v337_v49, %v336_v41  ;;  %271 = vst [vmem:[%s1393_s19] sm:$0x1] %v270_v51  ;;  %v291_v61 = vadd.f32 %v290_v53, %v289_v44  ;;  %v345_v63 = vmul.f32 %v864_v50, %v1374_v11  ;;  %v870_v41 = vld [vmem:[%s1354_s9 + $0x6] sm:$0x3]  ;;  %v422_v50 = vld [vmem:[%s1354_s9] sm:$0x3]  ;;  %p1037_p13 = pneg %p1036_p12 }
  0x65   : > { %v280_v60 = vadd.f32 %v279_v52, %v278_v43  ;;  %v312_v62 = vrot.slane %v311_v54, 1  ;;  %v322_v3 = vadd.f32 %v321_v56, %v320_v47  ;;  %v331_v4 = vrot.slane %v330_v57, 1  ;;  %p1043_p9 = por %p1042_p10, %p1041_p7 }
  0x66   : > { %v302_v2 = vadd.f32 %v301_v55, %v300_v46  ;;  %v339_v5 = vrot.slane %v338_v58, 2  ;;  %292 = vst [vmem:[%s1393_s19 + $0x5] sm:$0x1] %v291_v61  ;;  %v346_v9 = vsel %vm263_vm0, %v345_v63, 0.0  ;;  %v355_v10 = vmul.f32 %v865_v59, %v1374_v11  ;;  %v871_v55 = vld [vmem:[%s1354_s9 + $0x2] sm:$0x3] }
  0x67   : > { %281 = vst [vmem:[%s1393_s19 + $0x4] sm:$0x1] %v280_v60  ;;  %v313_v8 = vadd.f32 %v312_v62, %v311_v54  ;;  %v365_v12 = vsel %vm263_vm0, %v866_v0, 0.0  ;;  %323 = vst [vmem:[%s1393_s19 + $0x1] sm:$0x1] %v322_v3  ;;  %v332_v13 = vadd.f32 %v331_v4, %v330_v57  ;;  %v347_v15 = vrot.slane %v346_v9, 4  ;;  %p1044_p11 = pnand %p1043_p9, %p1037_p13 }
  0x68   : > { %303 = vst [vmem:[%s1393_s19 + $0x6] sm:$0x1] %v302_v2  ;;  %v340_v14 = vadd.f32 %v339_v5, %v338_v58  ;;  %v366_v16 = vrot.slane %v365_v12, 4  ;;  %v356_v18 = vsel %vm263_vm0, %v355_v10, 0.0  ;;  %v374_v19 = vmul.f32 %v866_v0, %v373_v1 }
  0x69   : > { %314 = vst [vmem:[%s1393_s19 + $0x7] sm:$0x1] %v313_v8  ;;  %v384_v20 = vmul.f32 %v867_v6, %v866_v0  ;;  %v394_v21 = vmul.f32 %v868_v7, %v866_v0  ;;  %333 = vst [vmem:[%s1393_s19 + $0x8] sm:$0x1] %v332_v13  ;;  %v348_v23 = vadd.f32 %v347_v15, %v346_v9  ;;  %v357_v11 = vrot.slane %v356_v18, 4 }
  0x6a   : > { %v341_v22 = vrot.slane %v340_v14, 1  ;;  %v367_v24 = vadd.f32 %v366_v16, %v365_v12  ;;  %v375_v25 = vsel %vm263_vm0, %v374_v19, 0.0  ;;  %v404_v28 = vmul.f32 %v869_v17, %v866_v0  ;;  %v872_v0 = vld [vmem:[%s1354_s9 + $0x4] sm:$0x3]  ;;  %v1429_v19 = vld [vmem:[%s1361_s11] sm:$0x3] }
  0x6b   : > { %v385_v26 = vsel %vm263_vm0, %v384_v20, 0.0  ;;  %v395_v27 = vsel %vm263_vm0, %v394_v21, 0.0  ;;  %v349_v30 = vrot.slane %v348_v23, 2  ;;  %v358_v31 = vadd.f32 %v357_v11, %v356_v18  ;;  %v471_v20 = vld [vmem:[%s1361_s11] sm:$0x3] }
  0x6c   : > { %v342_v29 = vadd.f32 %v341_v22, %v340_v14  ;;  %v368_v32 = vrot.slane %v367_v24, 2  ;;  %v376_v33 = vrot.slane %v375_v25, 4  ;;  %v386_v34 = vrot.slane %v385_v26, 4  ;;  %v873_v14 = vld [vmem:[%s1354_s9 + $0x6] sm:$0x3] }
  0x6d   : > { %v396_v35 = vrot.slane %v395_v27, 4  ;;  %v405_v36 = vsel %vm263_vm0, %v404_v28, 0.0  ;;  %v350_v37 = vadd.f32 %v349_v30, %v348_v23  ;;  %v359_v38 = vrot.slane %v358_v31, 2 }
  0x6e   : > { %343 = vst [vmem:[%s1393_s19 + $0x9] sm:$0x1] %v342_v29  ;;  %v369_v39 = vadd.f32 %v368_v32, %v367_v24  ;;  %v406_v40 = vrot.slane %v405_v36, 4  ;;  %v377_v42 = vadd.f32 %v376_v33, %v375_v25  ;;  %v387_v43 = vadd.f32 %v386_v34, %v385_v26  ;;  %v874_v24 = vld [vmem:[%s1361_s11 + $0x2] sm:$0x3] }
  0x6f   : > { %v397_v44 = vadd.f32 %v396_v35, %v395_v27  ;;  %v414_v45 = vsel %vm263_vm0, %v870_v41, 0.0  ;;  %v351_v46 = vrot.slane %v350_v37, 1  ;;  %v360_v47 = vadd.f32 %v359_v38, %v358_v31  ;;  %v875_v33 = vld [vmem:[%s1361_s11 + $0x4] sm:$0x3] }
  0x70   : > { %v370_v48 = vrot.slane %v369_v39, 1  ;;  %v407_v49 = vadd.f32 %v406_v40, %v405_v36  ;;  %v378_v51 = vrot.slane %v377_v42, 2  ;;  %v388_v52 = vrot.slane %v387_v43, 2 }
  0x71   : > { %v398_v53 = vrot.slane %v397_v44, 2  ;;  %v415_v54 = vrot.slane %v414_v45, 4  ;;  %v352_v56 = vadd.f32 %v351_v46, %v350_v37  ;;  %v361_v57 = vrot.slane %v360_v47, 1 }
  0x72   : > { %v371_v58 = vadd.f32 %v370_v48, %v369_v39  ;;  %v408_v59 = vrot.slane %v407_v49, 2  ;;  %v379_v60 = vadd.f32 %v378_v51, %v377_v42  ;;  %v389_v61 = vadd.f32 %v388_v52, %v387_v43 }
  0x73   : > { %v399_v62 = vadd.f32 %v398_v53, %v397_v44  ;;  %v416_v63 = vadd.f32 %v415_v54, %v414_v45  ;;  %353 = vst [vmem:[%s1393_s19 + $0xa] sm:$0x1] %v352_v56  ;;  %v362_v1 = vadd.f32 %v361_v57, %v360_v47  ;;  %v423_v3 = vmul.f32 %v870_v41, %v422_v50 }
  0x74   : > { %372 = vst [vmem:[%s1393_s19 + $0x2] sm:$0x1] %v371_v58  ;;  %v409_v2 = vadd.f32 %v408_v59, %v407_v49  ;;  %v433_v4 = vmul.f32 %v871_v55, %v870_v41  ;;  %v380_v5 = vrot.slane %v379_v60, 1  ;;  %v390_v6 = vrot.slane %v389_v61, 1 }
  0x75   : > { %v400_v7 = vrot.slane %v399_v62, 1  ;;  %v417_v8 = vrot.slane %v416_v63, 2  ;;  %363 = vst [vmem:[%s1393_s19 + $0xb] sm:$0x1] %v362_v1  ;;  %v424_v10 = vsel %vm263_vm0, %v423_v3, 0.0  ;;  %v443_v13 = vmul.f32 %v872_v0, %v870_v41 }
  0x76   : > { %v410_v9 = vrot.slane %v409_v2, 1  ;;  %v434_v12 = vsel %vm263_vm0, %v433_v4, 0.0  ;;  %v381_v15 = vadd.f32 %v380_v5, %v379_v60  ;;  %v391_v16 = vadd.f32 %v390_v6, %v389_v61  ;;  %v1452_v3 = vld [vmem:[%s1361_s11 + $0x2] sm:$0x3] }
  0x77   : > { %v401_v17 = vadd.f32 %v400_v7, %v399_v62  ;;  %v418_v18 = vadd.f32 %v417_v8, %v416_v63  ;;  %v425_v22 = vrot.slane %v424_v10, 4  ;;  %v435_v23 = vrot.slane %v434_v12, 4  ;;  %v876_v62 = vld [vmem:[%s1361_s11 + $0x6] sm:$0x3]  ;;  %v523_v8 = vld [vmem:[%s1361_s11] sm:$0x3] }
  0x78   : > { %v411_v21 = vadd.f32 %v410_v9, %v409_v2  ;;  %v444_v11 = vsel %vm263_vm0, %v443_v13, 0.0  ;;  %382 = vst [vmem:[%s1393_s19 + $0xc] sm:$0x1] %v381_v15  ;;  %392 = vst [vmem:[%s1393_s19 + $0xd] sm:$0x1] %v391_v16  ;;  %v453_v27 = vmul.f32 %v873_v14, %v870_v41  ;;  %v463_v28 = vsel %vm263_vm0, %v1429_v19, 0.0 }
  0x79   : > { %402 = vst [vmem:[%s1393_s19 + $0xe] sm:$0x1] %v401_v17  ;;  %v419_v25 = vrot.slane %v418_v18, 1  ;;  %v445_v26 = vrot.slane %v444_v11, 4  ;;  %v426_v29 = vadd.f32 %v425_v22, %v424_v10  ;;  %v436_v30 = vadd.f32 %v435_v23, %v434_v12  ;;  %v878_v9 = vld [vmem:[%s1361_s11 + $0x2] sm:$0x3] }
  0x7a   : > { %412 = vst [vmem:[%s1393_s19 + $0xf] sm:$0x1] %v411_v21  ;;  %v464_v31 = vrot.slane %v463_v28, 4  ;;  %v472_v32 = vmul.f32 %v471_v20, %v1429_v19  ;;  %v454_v36 = vsel %vm263_vm0, %v453_v27, 0.0  ;;  %v483_v37 = vmul.f32 %v874_v24, %v1429_v19  ;;  %v879_v20 = vld [vmem:[%s1361_s11 + $0x4] sm:$0x3] }
  0x7b   : > { %v420_v34 = vadd.f32 %v419_v25, %v418_v18  ;;  %v446_v35 = vadd.f32 %v445_v26, %v444_v11  ;;  %v427_v38 = vrot.slane %v426_v29, 2  ;;  %v437_v39 = vrot.slane %v436_v30, 2 }
  0x7c   : > { %v455_v40 = vrot.slane %v454_v36, 4  ;;  %v465_v41 = vadd.f32 %v464_v31, %v463_v28  ;;  %v473_v43 = vsel %vm263_vm0, %v472_v32, 0.0  ;;  %v484_v44 = vsel %vm263_vm0, %v483_v37, 0.0  ;;  %v880_v31 = vld [vmem:[%s1361_s11 + $0x6] sm:$0x3] }
  0x7d   : > { %421 = vst [vmem:[%s1393_s19 + $0x3] sm:$0x1] %v420_v34  ;;  %v447_v42 = vrot.slane %v446_v35, 2  ;;  %v494_v45 = vmul.f32 %v875_v33, %v1429_v19  ;;  %v428_v46 = vadd.f32 %v427_v38, %v426_v29  ;;  %v438_v47 = vadd.f32 %v437_v39, %v436_v30 }
  0x7e   : > { %v456_v48 = vadd.f32 %v455_v40, %v454_v36  ;;  %v466_v49 = vrot.slane %v465_v41, 2  ;;  %v474_v51 = vrot.slane %v473_v43, 4  ;;  %v485_v52 = vrot.slane %v484_v44, 4 }
  0x7f   : > { %v448_v50 = vadd.f32 %v447_v42, %v446_v35  ;;  %v495_v53 = vsel %vm263_vm0, %v494_v45, 0.0  ;;  %v429_v54 = vrot.slane %v428_v46, 1  ;;  %v439_v55 = vrot.slane %v438_v47, 1 }
  0x80   : > { %v457_v56 = vrot.slane %v456_v48, 2  ;;  %v467_v57 = vadd.f32 %v466_v49, %v465_v41  ;;  %v475_v59 = vadd.f32 %v474_v51, %v473_v43  ;;  %v486_v60 = vadd.f32 %v485_v52, %v484_v44 }
  0x81   : > { %v449_v58 = vrot.slane %v448_v50, 1  ;;  %v496_v61 = vrot.slane %v495_v53, 4  ;;  %v430_v63 = vadd.f32 %v429_v54, %v428_v46  ;;  %v440_v0 = vadd.f32 %v439_v55, %v438_v47 }
  0x82   : > { %v458_v1 = vadd.f32 %v457_v56, %v456_v48  ;;  %v468_v2 = vrot.slane %v467_v57, 1  ;;  %v476_v5 = vrot.slane %v475_v59, 2  ;;  %v487_v6 = vrot.slane %v486_v60, 2 }
  0x83   : > { %v450_v4 = vadd.f32 %v449_v58, %v448_v50  ;;  %v497_v7 = vadd.f32 %v496_v61, %v495_v53  ;;  %431 = vst [vmem:[%s1393_s19 + $0x10] sm:$0x1] %v430_v63  ;;  %441 = vst [vmem:[%s1393_s19 + $0x11] sm:$0x1] %v440_v0  ;;  %v505_v13 = vmul.f32 %v876_v62, %v1429_v19  ;;  %v515_v14 = vsel %vm263_vm0, %v1452_v3, 0.0 }
  0x84   : > { %v459_v10 = vrot.slane %v458_v1, 1  ;;  %v469_v12 = vadd.f32 %v468_v2, %v467_v57  ;;  %v477_v15 = vadd.f32 %v476_v5, %v475_v59  ;;  %v488_v16 = vadd.f32 %v487_v6, %v486_v60 }
  0x85   : > { %451 = vst [vmem:[%s1393_s19 + $0x12] sm:$0x1] %v450_v4  ;;  %v498_v17 = vrot.slane %v497_v7, 2  ;;  %v516_v18 = vrot.slane %v515_v14, 4  ;;  %v506_v19 = vsel %vm263_vm0, %v505_v13, 0.0  ;;  %v524_v22 = vmul.f32 %v1452_v3, %v523_v8 }
  0x86   : > { %v460_v21 = vadd.f32 %v459_v10, %v458_v1  ;;  %470 = vst [vmem:[%s1473_s29] sm:$0x1] %v469_v12  ;;  %v534_v23 = vmul.f32 %v878_v9, %v1452_v3  ;;  %v478_v11 = vrot.slane %v477_v15, 1  ;;  %v489_v24 = vrot.slane %v488_v16, 1 }
  0x87   : > { %v499_v25 = vadd.f32 %v498_v17, %v497_v7  ;;  %v507_v26 = vrot.slane %v506_v19, 4  ;;  %v517_v27 = vadd.f32 %v516_v18, %v515_v14  ;;  %v525_v28 = vsel %vm263_vm0, %v524_v22, 0.0 }
  0x88   : > { %461 = vst [vmem:[%s1393_s19 + $0x13] sm:$0x1] %v460_v21  ;;  %v535_v29 = vsel %vm263_vm0, %v534_v23, 0.0  ;;  %v544_v30 = vmul.f32 %v879_v20, %v1452_v3  ;;  %v479_v32 = vadd.f32 %v478_v11, %v477_v15  ;;  %v490_v33 = vadd.f32 %v489_v24, %v488_v16 }
  0x89   : > { %v500_v34 = vrot.slane %v499_v25, 1  ;;  %v508_v35 = vadd.f32 %v507_v26, %v506_v19 }
  0x8a   : > { %1047 = shalt.err (!%p1044_p11)
}
  0x8b   : > { %s1048_s9 = scalar_lea.hbm %s1469_s22, 384  ;;  %s1052_s19 = scalar_lea.hbm %s1617_s2, 768 }
  0x8c   : > { %p1049_p1 = scmp.ne.s32.totalorder %s1469_s22, %s1048_s9  ;;  %p1053_p5 = scmp.lt.u32.totalorder %s1469_s22, %s1617_s2 }
  0x8d   : > { %p1054_p4 = scmp.lt.u32.totalorder %s1052_s19, %s1048_s9  ;;  %p1056_p0 = scmp.lt.u32.totalorder %s1048_s9, %s1469_s22 }
  0x8e   : > { %p1050_p6 = pnand %p1049_p1, %p1629_p3 }
  0x8f   : > { %p1055_p8 = por %p1054_p4, %p1053_p5 }
  0x90   : > { %p1051_p2 = pneg %p1050_p6 }
  0x91   : > { %p1057_p12 = por %p1056_p0, %p1055_p8 }
  0x93   : > { %p1058_p13 = pnand %p1057_p12, %p1051_p2 }
  0x95   : > { %1061 = shalt.err (!%p1058_p13)
}
  0x96   : > { %s1159_s30 = smov 128   ;;  %s1160_s10 = smov 8   ;;  %v518_v36 = vrot.slane %v517_v27, 2  ;;  %v526_v37 = vrot.slane %v525_v28, 4  ;;  %v536_v38 = vrot.slane %v535_v29, 4  ;;  %v545_v39 = vsel %vm263_vm0, %v544_v30, 0.0 }
  0x97   : > { %902 = dma.vmem_to_hbm [thread:$0]  (%p1629_p3), %s1479_s4, 384, %s1469_s22, %s662_s5, %s1159_s30, %s1159_s30, %s1160_s10   ;;  %v501_v40 = vadd.f32 %v500_v34, %v499_v25  ;;  %v509_v41 = vrot.slane %v508_v35, 2  ;;  %v546_v42 = vrot.slane %v545_v39, 4  ;;  %v554_v43 = vmul.f32 %v880_v31, %v1452_v3 }
  0x98   : > { %480 = vst [vmem:[%s1473_s29 + $0x4] sm:$0x1] %v479_v32  ;;  %491 = vst [vmem:[%s1473_s29 + $0x5] sm:$0x1] %v490_v33  ;;  %v881_v44 = vld [vmem:[%s1361_s11 + $0x4] sm:$0x3]  ;;  %v519_v45 = vadd.f32 %v518_v36, %v517_v27  ;;  %v527_v46 = vadd.f32 %v526_v37, %v525_v28  ;;  %v537_v47 = vadd.f32 %v536_v38, %v535_v29  ;;  %s1560_s5 = scalar_lea.hbm %s1618_s3, %s896_s23 }
  0x99   : > { %v564_v48 = vsel %vm263_vm0, %v881_v44, 0.0  ;;  %v572_v49 = vld [vmem:[%s1361_s11] sm:$0x3]  ;;  %502 = vst [vmem:[%s1473_s29 + $0x6] sm:$0x1] %v501_v40  ;;  %v510_v50 = vadd.f32 %v509_v41, %v508_v35  ;;  %v547_v51 = vadd.f32 %v546_v42, %v545_v39  ;;  %v555_v52 = vsel %vm263_vm0, %v554_v43, 0.0 }
  0x9a   : > { %v565_v53 = vrot.slane %v564_v48, 4  ;;  %v520_v54 = vrot.slane %v519_v45, 1  ;;  %v528_v55 = vrot.slane %v527_v46, 2  ;;  %v538_v56 = vrot.slane %v537_v47, 2  ;;  %v882_v2 = vld [vmem:[%s1361_s11 + $0x2] sm:$0x3] }
  0x9b   : > { %v556_v57 = vrot.slane %v555_v52, 4  ;;  %v511_v58 = vrot.slane %v510_v50, 1  ;;  %v548_v59 = vrot.slane %v547_v51, 2  ;;  %v573_v61 = vmul.f32 %v881_v44, %v572_v49  ;;  %v883_v3 = vld [vmem:[%s1361_s11 + $0x4] sm:$0x3]  ;;  %s667_s18 = scalar_lea.sflag [#allocation9], %s1350_s8 }
  0x9c   : > { %v566_v60 = vadd.f32 %v565_v53, %v564_v48  ;;  %v521_v62 = vadd.f32 %v520_v54, %v519_v45  ;;  %v529_v63 = vadd.f32 %v528_v55, %v527_v46  ;;  %v539_v0 = vadd.f32 %v538_v56, %v537_v47  ;;  %v884_v19 = vld [vmem:[%s1361_s11 + $0x6] sm:$0x3]  ;;  %v621_v23 = vld [vmem:[%s1361_s11] sm:$0x3]  ;;  %v886_v31 = vld [vmem:[%s1361_s11 + $0x2] sm:$0x3] }
  0x9d   : > { %v557_v1 = vadd.f32 %v556_v57, %v555_v52  ;;  %v512_v4 = vadd.f32 %v511_v58, %v510_v50  ;;  %v549_v5 = vadd.f32 %v548_v59, %v547_v51  ;;  %v574_v7 = vsel %vm263_vm0, %v573_v61, 0.0  ;;  %v885_v22 = vld [vmem:[%s1361_s11 + $0x6] sm:$0x3]  ;;  %v887_v40 = vld [vmem:[%s1361_s11 + $0x4] sm:$0x3]  ;;  %s1161_s9 = smov [#allocation8]  }
  0x9e   : > { %v567_v6 = vrot.slane %v566_v60, 2  ;;  %522 = vst [vmem:[%s1473_s29 + $0x1] sm:$0x1] %v521_v62  ;;  %v530_v8 = vrot.slane %v529_v63, 1  ;;  %v540_v9 = vrot.slane %v539_v0, 1  ;;  %v575_v12 = vrot.slane %v574_v7, 4 }
  0x9f   : > { %v558_v10 = vrot.slane %v557_v1, 2  ;;  %513 = vst [vmem:[%s1473_s29 + $0x7] sm:$0x1] %v512_v4  ;;  %v550_v13 = vrot.slane %v549_v5, 1  ;;  %v583_v15 = vmul.f32 %v882_v2, %v881_v44  ;;  %v593_v16 = vmul.f32 %v883_v3, %v881_v44  ;;  %v888_v57 = vld [vmem:[%s1361_s11 + $0x6] sm:$0x3] }
  0xa0   : > { %v568_v14 = vadd.f32 %v567_v6, %v566_v60  ;;  %v531_v17 = vadd.f32 %v530_v8, %v529_v63  ;;  %v541_v18 = vadd.f32 %v540_v9, %v539_v0  ;;  %v576_v21 = vadd.f32 %v575_v12, %v574_v7  ;;  %s700_s11 = sshll.u32 %s1473_s29, 4  ;;  %s1066_s28 = sshll.u32 %s1161_s9, 4  ;;  %s1562_s11 = int_to_ptr.vmem [resolvable:$true] %s700_s11  ;;  %s1067_s28 = int_to_ptr.vmem [resolvable:$false] %s1066_s28 }
  0xa1   : > { %v559_v20 = vadd.f32 %v558_v10, %v557_v1  ;;  %v551_v11 = vadd.f32 %v550_v13, %v549_v5  ;;  %v584_v25 = vsel %vm263_vm0, %v583_v15, 0.0  ;;  %v594_v26 = vsel %vm263_vm0, %v593_v16, 0.0  ;;  %s1062_s21 = scalar_lea.vmem %s1562_s11, 384  ;;  %s1068_s15 = scalar_lea.vmem %s1067_s28, 768 }
  0xa2   : > { %v569_v24 = vrot.slane %v568_v14, 1  ;;  %532 = vst [vmem:[%s1473_s29 + $0x8] sm:$0x1] %v531_v17  ;;  %542 = vst [vmem:[%s1473_s29 + $0x9] sm:$0x1] %v541_v18  ;;  %v577_v28 = vrot.slane %v576_v21, 2  ;;  %v603_v33 = vmul.f32 %v884_v19, %v881_v44  ;;  %v622_v35 = vmul.f32 %v885_v22, %v621_v23  ;;  %p1063_p7 = scmp.ne.s32.totalorder %s1562_s11, %s1062_s21  ;;  %p1069_p11 = scmp.lt.s32.totalorder %s1562_s11, %s1067_s28 }
  0xa3   : > { %v560_v27 = vrot.slane %v559_v20, 1  ;;  %v585_v29 = vrot.slane %v584_v25, 4  ;;  %v595_v30 = vrot.slane %v594_v26, 4  ;;  %552 = vst [vmem:[%s1473_s29 + $0xa] sm:$0x1] %v551_v11  ;;  %v613_v34 = vsel %vm263_vm0, %v885_v22, 0.0  ;;  %p1070_p1 = scmp.lt.s32.totalorder %s1068_s15, %s1062_s21 }
  0xa4   : > { %v570_v32 = vadd.f32 %v569_v24, %v568_v14  ;;  %v578_v37 = vadd.f32 %v577_v28, %v576_v21  ;;  %v604_v41 = vsel %vm263_vm0, %v603_v33, 0.0  ;;  %v614_v42 = vrot.slane %v613_v34, 4  ;;  %p1064_p10 = pnand %p1063_p7, %p1629_p3 }
  0xa5   : > { %v561_v36 = vadd.f32 %v560_v27, %v559_v20  ;;  %v586_v38 = vadd.f32 %v585_v29, %v584_v25  ;;  %v596_v39 = vadd.f32 %v595_v30, %v594_v26  ;;  %v623_v43 = vsel %vm263_vm0, %v622_v35, 0.0  ;;  %p1071_p6 = por %p1070_p1, %p1069_p11 }
  0xa6   : > { %571 = vst [vmem:[%s1473_s29 + $0x2] sm:$0x1] %v570_v32  ;;  %v632_v45 = vmul.f32 %v886_v31, %v885_v22  ;;  %v579_v46 = vrot.slane %v578_v37, 1  ;;  %v605_v48 = vrot.slane %v604_v41, 4  ;;  %v615_v49 = vadd.f32 %v614_v42, %v613_v34  ;;  %p1065_p9 = pneg %p1064_p10 }
  0xa7   : > { %562 = vst [vmem:[%s1473_s29 + $0xb] sm:$0x1] %v561_v36  ;;  %v587_v47 = vrot.slane %v586_v38, 2  ;;  %v597_v44 = vrot.slane %v596_v39, 2  ;;  %v624_v50 = vrot.slane %v623_v43, 4  ;;  %v642_v52 = vmul.f32 %v887_v40, %v885_v22 }
  0xa8   : > { %v633_v51 = vsel %vm263_vm0, %v632_v45, 0.0  ;;  %v580_v53 = vadd.f32 %v579_v46, %v578_v37  ;;  %v606_v56 = vadd.f32 %v605_v48, %v604_v41  ;;  %v616_v58 = vrot.slane %v615_v49, 2  ;;  %p1072_p2 = pnand %p1071_p6, %p1065_p9 }
  0xa9   : > { %v588_v54 = vadd.f32 %v587_v47, %v586_v38  ;;  %v598_v55 = vadd.f32 %v597_v44, %v596_v39  ;;  %v625_v59 = vadd.f32 %v624_v50, %v623_v43  ;;  %v634_v60 = vrot.slane %v633_v51, 4 }
  0xaa   : > { %v643_v61 = vsel %vm263_vm0, %v642_v52, 0.0  ;;  %581 = vst [vmem:[%s1473_s29 + $0xc] sm:$0x1] %v580_v53  ;;  %v607_v0 = vrot.slane %v606_v56, 2  ;;  %v617_v2 = vadd.f32 %v616_v58, %v615_v49  ;;  %v652_v5 = vmul.f32 %v888_v57, %v885_v22 }
  0xab   : > { %v589_v62 = vrot.slane %v588_v54, 1  ;;  %v599_v63 = vrot.slane %v598_v55, 1  ;;  %v644_v1 = vrot.slane %v643_v61, 4  ;;  %v626_v3 = vrot.slane %v625_v59, 2 }
  0xac   : > { %v635_v4 = vadd.f32 %v634_v60, %v633_v51  ;;  %v608_v8 = vadd.f32 %v607_v0, %v606_v56  ;;  %v618_v10 = vrot.slane %v617_v2, 1  ;;  %v653_v14 = vsel %vm263_vm0, %v652_v5, 0.0 }
  0xad   : > { %v590_v6 = vadd.f32 %v589_v62, %v588_v54  ;;  %v600_v7 = vadd.f32 %v599_v63, %v598_v55  ;;  %v645_v9 = vadd.f32 %v644_v1, %v643_v61  ;;  %v627_v12 = vadd.f32 %v626_v3, %v625_v59 }
  0xae   : > { %v636_v13 = vrot.slane %v635_v4, 2  ;;  %v609_v15 = vrot.slane %v608_v8, 1  ;;  %v654_v17 = vrot.slane %v653_v14, 4  ;;  %v619_v18 = vadd.f32 %v618_v10, %v617_v2 }
  0xaf   : > { %591 = vst [vmem:[%s1473_s29 + $0xd] sm:$0x1] %v590_v6  ;;  %601 = vst [vmem:[%s1473_s29 + $0xe] sm:$0x1] %v600_v7  ;;  %v646_v16 = vrot.slane %v645_v9, 2  ;;  %v628_v20 = vrot.slane %v627_v12, 1 }
  0xb0   : > { %v637_v21 = vadd.f32 %v636_v13, %v635_v4  ;;  %v610_v19 = vadd.f32 %v609_v15, %v608_v8  ;;  %v655_v23 = vadd.f32 %v654_v17, %v653_v14  ;;  %620 = vst [vmem:[%s1473_s29 + $0x3] sm:$0x1] %v619_v18 }
  0xb1   : > { %v647_v22 = vadd.f32 %v646_v16, %v645_v9  ;;  %v629_v11 = vadd.f32 %v628_v20, %v627_v12 }
  0xb2   : > { %v638_v24 = vrot.slane %v637_v21, 1  ;;  %611 = vst [vmem:[%s1473_s29 + $0xf] sm:$0x1] %v610_v19  ;;  %v656_v26 = vrot.slane %v655_v23, 2 }
  0xb3   : > { %v648_v25 = vrot.slane %v647_v22, 1  ;;  %630 = vst [vmem:[%s1473_s29 + $0x10] sm:$0x1] %v629_v11 }
  0xb4   : > { %v639_v27 = vadd.f32 %v638_v24, %v637_v21  ;;  %v657_v29 = vadd.f32 %v656_v26, %v655_v23 }
  0xb5   : > { %v649_v28 = vadd.f32 %v648_v25, %v647_v22 }
  0xb6   : > { %640 = vst [vmem:[%s1473_s29 + $0x11] sm:$0x1] %v639_v27  ;;  %v658_v30 = vrot.slane %v657_v29, 1 }
  0xb7   : > { %650 = vst [vmem:[%s1473_s29 + $0x12] sm:$0x1] %v649_v28 }
  0xb8   : > { %v659_v31 = vadd.f32 %v658_v30, %v657_v29 }
  0xba   : > { %660 = vst [vmem:[%s1473_s29 + $0x13] sm:$0x1] %v659_v31 }
  0xbb   : > { %1075 = shalt.err (!%p1072_p2)
}
  0xbc   : > { %s1076_s23 = scalar_lea.hbm %s1560_s5, 384  ;;  %s1080_s19 = scalar_lea.hbm %s1618_s3, 768 }
  0xbd   : > { %p1077_p5 = scmp.ne.s32.totalorder %s1560_s5, %s1076_s23  ;;  %p1081_p0 = scmp.lt.u32.totalorder %s1560_s5, %s1618_s3 }
  0xbe   : > { %p1082_p12 = scmp.lt.u32.totalorder %s1080_s19, %s1076_s23  ;;  %p1084_p7 = scmp.lt.u32.totalorder %s1076_s23, %s1560_s5 }
  0xbf   : > { %p1078_p4 = pnand %p1077_p5, %p1629_p3 }
  0xc0   : > { %p1083_p13 = por %p1082_p12, %p1081_p0 }
  0xc1   : > { %p1079_p8 = pneg %p1078_p4 }
  0xc2   : > { %p1085_p10 = por %p1084_p7, %p1083_p13 }
  0xc4   : > { %p1086_p9 = pnand %p1085_p10, %p1079_p8 }
  0xc6   : > { %1089 = shalt.err (!%p1086_p9)
}
  0xc7   : > { %903 = dma.vmem_to_hbm [thread:$0]  (%p1629_p3), %s1562_s11, 384, %s1560_s5, %s667_s18, %s1159_s30, %s1159_s30, %s1160_s10  }
  0xc8 PF: > { %s715_s4 = sand.u32 1, %s1132_s12   ;;  %p1630_p11 = scmp.ne.s32.totalorder %s1624_s27, 0 }
  0xc9   : > { %p1631_p1 = scmp.ge.s32.totalorder %s1152_s17, 2  ;;  %s716_s22 = scalar_lea.sflag [#allocation4], %s715_s4 }
  0xcb   : > { %p914_p6 = pnand %p1631_p1, %p1630_p11 }
  0xcd   : > { %1123 = dma.done.wait (!%p914_p6), %s716_s22, 384  }
  0xce   : > { %1125 = vsyncadd (!%p914_p6), %s716_s22, 4294966912  ;;  %s725_s25 = scalar_lea.sflag [#allocation9], %s715_s4 }
  0xcf   : > { %1127 = dma.done.wait (!%p914_p6), %s725_s25, 384  }
  0xd0   : > { %1129 = vsyncadd (!%p914_p6), %s725_s25, 4294966912  ;;  %s26_s17 = sadd.s32 1, %s1152_s17   ;;  %s1632_s12 = smov %s1136_s13 }
  0xd1   : > { %p23_p2 = scmp.ge.s32.totalorder %s26_s17, 4   ;;  %s1633_s13 = smov %s1140_s14 }
  0xd2   : > { %s1634_s14 = smov %s1238_s26  ;;  %s1635_s15 = smov %s1148_s16 }
  0xd3   : > { %s1636_s16 = smov %s1638_s20  ;;  %25 = sbr.rel (!%p23_p2) target bundleno = 10 (0xa), region = 109 }
  0xda   :  { %730 = vsyncpa [#allocation3], 1 }
  0xdb   :  { %732 = vsyncpa [#allocation3 + $0x1], 1 }
  0xdc   :  { %733 = vsyncpa [#allocation6], 1 }
  0xdd   :  { %735 = vsyncpa [#allocation6 + $0x1], 1 }
  0xde   :  { %736 = vsyncpa [#allocation4], 1 }
  0xdf   :  { %738 = vsyncpa [#allocation4 + $0x1], 1 }
  0xe0   :  { %739 = vsyncpa [#allocation9], 1 }
  0xe1   :  { %741 = vsyncpa [#allocation9 + $0x1], 1 }

// kernel: attention_block_forward.4
= control target key start
LH: loop header
LB: loop body
LE: loop exit
PB: predicated region body
PF: predicated region fallthrough
CT: control target
= control target key end

     0   :  { %s2172_s0 = inlined_call_operand.hbm [shape: f32[2,4,2,128], index: 0, kind: input, shape index: {}]   ;;  %s2173_s1 = inlined_call_operand.hbm [shape: f32[2,4,2,128], index: 1, kind: input, shape index: {}]   ;;  %s2174_s2 = inlined_call_operand.hbm [shape: f32[8,4], index: 2, kind: input, shape index: {}]   ;;  %s2175_s3 = inlined_call_operand.hbm [shape: f32[8,4], index: 3, kind: input, shape index: {}]   ;;  %s2176_s4 = inlined_call_operand.hbm [shape: f32[8], index: 4, kind: input, shape index: {}]   ;;  %s2177_s5 = inlined_call_operand.hbm [shape: f32[8], index: 5, kind: input, shape index: {}]   ;;  %s2178_s6 = inlined_call_operand.hbm [shape: f32[2,2,128], index: 6, kind: output, shape index: {0}]   ;;  %s2179_s7 = inlined_call_operand.hbm [shape: f32[2,1,2,128], index: 7, kind: output, shape index: {1}]  }
   0x1   :  { %2187 = sst [smem:[#allocation25_spill]] %s2172_s0 }
   0x2   :  { %2188 = sst [smem:[#allocation26_spill]] %s2174_s2 }
   0x3   :  { %2189 = sst [smem:[#allocation27_spill]] %s2175_s3 }
   0x4   :  { %2190 = sst [smem:[#allocation28_spill]] %s2176_s4 }
   0x5   :  { %2191 = sst [smem:[#allocation29_spill]] %s2177_s5 }
   0x6   :  { %13 = vsyncpa [#allocation3], 0 }
   0x7   :  { %15 = vsyncpa [#allocation3 + $0x1], 0 }
   0x8   :  { %16 = vsyncpa [#allocation7], 0 }
   0x9   :  { %18 = vsyncpa [#allocation7 + $0x1], 0 }
   0xa   :  { %19 = vsyncpa [#allocation5], 0 }
   0xb   :  { %20 = vsyncpa [#allocation10], 0 }
   0xc   :  { %21 = vsyncpa [#allocation13], 0 }
   0xd   :  { %22 = vsyncpa [#allocation4], 0 }
   0xe   :  { %24 = vsyncpa [#allocation4 + $0x1], 0 }
   0xf   :  { %25 = vsyncpa [#allocation16], 0 }
  0x10   :  { %27 = vsyncpa [#allocation16 + $0x1], 0  ;;  %s1494_s24 = smov 0   ;;  %s1496_s25 = smov 0  }
  0x11   :  { %s1498_s26 = smov 0   ;;  %s1500_s27 = smov 0  }
  0x12   :  { %s1502_s28 = smov 0   ;;  %s1504_s29 = smov 0  }
  0x13 LB: > { %s972_s30 = sadd.s32 4294967295, %s1442_s29   ;;  %s973_s8 = sadd.s32 4294967294, %s1442_s29   ;;  %s1442_s29 = sphi %s1504_s29, %s33_s29   ;;  %s1438_s28 = sphi %s1502_s28, %s2219_s28   ;;  %s1434_s27 = sphi %s1500_s27, %s2218_s27   ;;  %s1430_s26 = sphi %s1498_s26, %s2217_s26   ;;  %s1426_s25 = sphi %s1496_s25, %s2216_s25   ;;  %s1422_s24 = sphi %s1494_s24, %s2215_s24  }
  0x14   : > { %p67_p0 = scmp.ne.s32.totalorder %s1426_s25, %s1422_s24  ;;  %p1528_p1 = scmp.eq.s32.totalorder %s972_s30, 0 }
  0x15   : > { %p1532_p2 = scmp.eq.s32.totalorder %s972_s30, 1  ;;  %p211_p3 = scmp.eq.s32.totalorder %s973_s8, 1 }
  0x16   : > { %s2192_s9 = scalar_select %p1528_p1, 1, 0 }
  0x17   : > { %p1538_p4 = por %p1528_p1, %p67_p0  ;;  %p974_p5 = scmp.ge.s32.totalorder %s1442_s29, 1 }
  0x18   : > { %p1543_p6 = por %p211_p3, %p67_p0  ;;  %p246_p7 = scmp.lt.s32.totalorder %s1442_s29, 3 }
  0x19   : > { %s2194_s11 = scalar_select %p1538_p4, 1, 0 }
  0x1a   : > { %s2195_s12 = scalar_select %p1543_p6, 1, 0 }
  0x1b   : > { %p1548_p8 = pnand %p974_p5, %p246_p7  ;;  %s2198_s3 = sld [smem:[#allocation27_spill]] }
  0x1d   : > { %p1109_p10 = pneg %p1548_p8 }
  0x1f   : > { %p1557_p11 = pnand %p1109_p10, %p1528_p1 }
  0x21   : > { %s1200_s17 = scalar_lea.hbm %s2198_s3, 128  ;;  %p1202_p13 = pneg %p1557_p11 }
  0x22   : > { %p1201_p12 = scmp.ne.s32.totalorder %s2198_s3, %s1200_s17  ;;  %p1207_p5 = scmp.lt.u32.totalorder %s1200_s17, %s2198_s3 }
  0x24   : > { %p1203_p0 = pnand %p1202_p13, %p1201_p12 }
  0x26   : > { %p1204_p3 = pneg %p1203_p0 }
  0x28   : > { %p1209_p7 = pnand %p1207_p5, %p1204_p3 }
  0x2a   : > { %1212 = shalt.err (!%p1209_p7)
}
  0x2b   : > { %s1444_s22 = smov [#allocation9]   ;;  %s2199_s2 = sld [smem:[#allocation26_spill]] }
  0x2c   : > { %1115 = dma.hbm_to_smem (!%p1557_p11), %s2198_s3, 128, %s1444_s22, [#allocation10]  }
  0x31   : > { %s1213_s16 = scalar_lea.hbm %s2199_s2, 128 }
  0x32   : > { %p1214_p10 = scmp.ne.s32.totalorder %s2199_s2, %s1213_s16  ;;  %p1220_p3 = scmp.lt.u32.totalorder %s1213_s16, %s2199_s2 }
  0x34   : > { %p1216_p12 = pnand %p1214_p10, %p1202_p13 }
  0x36   : > { %p1217_p0 = pneg %p1216_p12 }
  0x38   : > { %p1222_p5 = pnand %p1220_p3, %p1217_p0 }
  0x3a   : > { %1225 = shalt.err (!%p1222_p5)
}
  0x3b   : > { %s1445_s21 = smov [#allocation8]   ;;  %s2200_s4 = sld [smem:[#allocation28_spill]] }
  0x3c   : > { %1112 = dma.hbm_to_smem (!%p1557_p11), %s2199_s2, 128, %s1445_s21, [#allocation5]  }
  0x41   : > { %s1226_s15 = scalar_lea.hbm %s2200_s4, 16 }
  0x42   : > { %p1227_p7 = scmp.ne.s32.totalorder %s2200_s4, %s1226_s15  ;;  %p1233_p0 = scmp.lt.u32.totalorder %s1226_s15, %s2200_s4 }
  0x44   : > { %p1229_p10 = pnand %p1227_p7, %p1202_p13 }
  0x46   : > { %p1230_p12 = pneg %p1229_p10 }
  0x48   : > { %p1235_p3 = pnand %p1233_p0, %p1230_p12 }
  0x4a   : > { %1238 = shalt.err (!%p1235_p3)
}
  0x4b   : > { %s1446_s20 = smov [#allocation11]   ;;  %s2201_s5 = sld [smem:[#allocation29_spill]] }
  0x4c   : > { %1118 = dma.hbm_to_smem (!%p1557_p11), %s2200_s4, 16, %s1446_s20, [#allocation10]  }
  0x51   : > { %s1239_s8 = scalar_lea.hbm %s2201_s5, 16 }
  0x52   : > { %p1240_p5 = scmp.ne.s32.totalorder %s2201_s5, %s1239_s8  ;;  %p1246_p12 = scmp.lt.u32.totalorder %s1239_s8, %s2201_s5 }
  0x54   : > { %p1242_p7 = pnand %p1240_p5, %p1202_p13 }
  0x56   : > { %p1243_p10 = pneg %p1242_p7 }
  0x58   : > { %p1248_p0 = pnand %p1246_p12, %p1243_p10 }
  0x5a   : > { %1251 = shalt.err (!%p1248_p0)
}
  0x5b   : > { %s1447_s17 = smov [#allocation12]   ;;  %s45_s22 = sadd.s32 1, %s1438_s28 }
  0x5c   : > { %1121 = dma.hbm_to_smem (!%p1557_p11), %s2201_s5, 16, %s1447_s17, [#allocation13]  }
  0x5d   : > { %s54_s23 = sadd.s32 1, %s1430_s26  ;;  %p47_p13 = scmp.ge.s32.totalorder %s45_s22, 2 }
  0x5e   : > { %p61_p3 = scmp.ne.s32.totalorder %s1430_s26, %s1426_s25  ;;  %p62_p5 = scmp.eq.s32.totalorder %s1442_s29, 0 }
  0x5f   : > { %p1140_p7 = scmp.lt.s32.totalorder %s1442_s29, 2  ;;  %s2221_s22 = smov (%p47_p13, %s45_s22), 0 }
  0x60   : > { %2202 = sst [smem:[#allocation24_spill]] %s2221_s22  ;;  %p63_p10 = por %p62_p5, %p61_p3 }
  0x61   : > { %p1641_p12 = por %p1532_p2, %p61_p3  ;;  %s49_s30 = ssub.s32 %s1438_s28, %s2221_s22 }
  0x62   : > { %s1648_s8 = sand.u32 1, %s1430_s26   ;;  %p52_p11 = scmp.eq.s32.totalorder %s49_s30, 0 }
  0x63   : > { %s2203_s14 = scalar_select %p1641_p12, 1, 0 }
  0x64   : > { %s2180_s18 = sshll.u32 %s1648_s8, 3  ;;  %s2181_s19 = sshll.u32 %s1438_s28, 7 }
  0x65   : > { %s1653_s15 = scalar_select %p52_p11, %s1430_s26, %s54_s23  }
  0x66   : > { %s2204_s0 = sld [smem:[#allocation25_spill]]  ;;  %s299_s20 = scalar_lea.vmem [#allocation2], %s2180_s18 }
  0x67   : > { %s307_s21 = sshll.u32 %s299_s20, 4  ;;  %p1666_p2 = pnand %p1140_p7, %p63_p10  ;;  %s1670_s21 = int_to_ptr.vmem [resolvable:$true] %s307_s21 }
  0x69   : > { %p1254_p13 = pneg %p1666_p2 }
  0x6c   : > { %s1660_s10 = scalar_lea.hbm %s2204_s0, %s2181_s19  ;;  %s1257_s18 = scalar_lea.hbm %s2204_s0, 256 }
  0x6d   : > { %s1252_s16 = scalar_lea.hbm %s1660_s10, 128  ;;  %p1258_p7 = scmp.lt.u32.totalorder %s1660_s10, %s2204_s0 }
  0x6e   : > { %p1253_p0 = scmp.ne.s32.totalorder %s1660_s10, %s1252_s16  ;;  %p1259_p10 = scmp.lt.u32.totalorder %s1257_s18, %s1252_s16 }
  0x6f   : > { %p1261_p9 = scmp.lt.u32.totalorder %s1252_s16, %s1660_s10 }
  0x70   : > { %p1255_p3 = pnand %p1254_p13, %p1253_p0  ;;  %p1260_p11 = por %p1259_p10, %p1258_p7 }
  0x72   : > { %p1256_p5 = pneg %p1255_p3  ;;  %p1262_p6 = por %p1261_p9, %p1260_p11 }
  0x74   : > { %p1263_p12 = pnand %p1262_p6, %p1256_p5 }
  0x76   : > { %1266 = shalt.err (!%p1263_p12)
}
  0x77   : > { %s1267_s23 = scalar_lea.vmem %s1670_s21, 128  ;;  %s1448_s17 = smov [#allocation2]  }
  0x78   : > { %p1268_p0 = scmp.ne.s32.totalorder %s1670_s21, %s1267_s23  ;;  %s1272_s20 = sshll.u32 %s1448_s17, 4  ;;  %s1273_s20 = int_to_ptr.vmem [resolvable:$false] %s1272_s20 }
  0x79   : > { %s1274_s2 = scalar_lea.vmem %s1273_s20, 256  ;;  %p1275_p4 = scmp.lt.s32.totalorder %s1670_s21, %s1273_s20 }
  0x7a   : > { %p1270_p3 = pnand %p1268_p0, %p1254_p13  ;;  %p1276_p7 = scmp.lt.s32.totalorder %s1274_s2, %s1267_s23 }
  0x7c   : > { %p1271_p1 = pneg %p1270_p3  ;;  %p1277_p10 = por %p1276_p7, %p1275_p4 }
  0x7e   : > { %p1278_p9 = pnand %p1277_p10, %p1271_p1 }
  0x80   : > { %1281 = shalt.err (!%p1278_p9)
}
  0x81   : > { %s1449_s18 = smov 32   ;;  %s1450_s19 = smov 2  }
  0x82   : > { %s2206_s16 = scalar_lea.sflag [#allocation3], %s1648_s8  ;;  %s2207_s23 = sshll.u32 %s1438_s28, 7 }
  0x83   : > { %1125 = dma.hbm_to_vmem [thread:$0]  (!%p1666_p2), %s1660_s10, 128, %s1670_s21, %s2206_s16, %s1449_s18, %s1449_s18, %s1450_s19  }
  0x84   : > { %s1708_s2 = scalar_lea.hbm %s2173_s1, %s2207_s23  ;;  %s2208_s0 = sshll.u32 %s1648_s8, 3 }
  0x85   : > { %s321_s3 = scalar_lea.vmem [#allocation6], %s2208_s0  ;;  %s318_s5 = scalar_lea.sflag [#allocation7], %s1648_s8 }
  0x86   : > { %s329_s4 = sshll.u32 %s321_s3, 4  ;;  %s1282_s22 = scalar_lea.hbm %s1708_s2, 128  ;;  %s1712_s4 = int_to_ptr.vmem [resolvable:$true] %s329_s4 }
  0x87   : > { %p1283_p1 = scmp.ne.s32.totalorder %s1708_s2, %s1282_s22  ;;  %s1287_s16 = scalar_lea.hbm %s2173_s1, 256 }
  0x88   : > { %p1288_p12 = scmp.lt.u32.totalorder %s1708_s2, %s2173_s1  ;;  %p1289_p5 = scmp.lt.u32.totalorder %s1287_s16, %s1282_s22 }
  0x89   : > { %p1285_p4 = pnand %p1283_p1, %p1254_p13  ;;  %p1291_p0 = scmp.lt.u32.totalorder %s1282_s22, %s1708_s2 }
  0x8a   : > { %p1290_p11 = por %p1289_p5, %p1288_p12 }
  0x8b   : > { %p1286_p6 = pneg %p1285_p4 }
  0x8c   : > { %p1292_p3 = por %p1291_p0, %p1290_p11 }
  0x8e   : > { %p1293_p7 = pnand %p1292_p3, %p1286_p6 }
  0x90   : > { %1296 = shalt.err (!%p1293_p7)
}
  0x91   : > { %s1297_s0 = scalar_lea.vmem %s1712_s4, 128  ;;  %s1451_s3 = smov [#allocation6]  }
  0x92   : > { %p1298_p10 = scmp.ne.s32.totalorder %s1712_s4, %s1297_s0  ;;  %s1302_s20 = sshll.u32 %s1451_s3, 4  ;;  %s1303_s20 = int_to_ptr.vmem [resolvable:$false] %s1302_s20 }
  0x93   : > { %s1304_s10 = scalar_lea.vmem %s1303_s20, 256  ;;  %p1305_p4 = scmp.lt.s32.totalorder %s1712_s4, %s1303_s20 }
  0x94   : > { %p1300_p9 = pnand %p1298_p10, %p1254_p13  ;;  %p1306_p12 = scmp.lt.s32.totalorder %s1304_s10, %s1297_s0 }
  0x96   : > { %p1301_p1 = pneg %p1300_p9  ;;  %p1307_p5 = por %p1306_p12, %p1305_p4 }
  0x98   : > { %p1308_p11 = pnand %p1307_p5, %p1301_p1 }
  0x9a   : > { %1311 = shalt.err (!%p1308_p11)
}
  0x9b   : > { %1128 = dma.hbm_to_vmem [thread:$0]  (!%p1666_p2), %s1708_s2, 128, %s1712_s4, %s318_s5, %s1449_s18, %s1449_s18, %s1450_s19  }
  0x9c   : > { %341 = sbr.rel (%p1548_p8) target bundleno = 292 (0x124), region = 44  ;;  %s1746_s22 = sand.u32 (!%p1548_p8), 1, %s1426_s25  }
  0x9d   : > { %s987_s21 = sshll.u32 (!%p1548_p8), %s1746_s22, 3  ;;  %s344_s16 = scalar_lea.sflag (!%p1548_p8), [#allocation3], %s1746_s22 }
  0x9e   : > { %s1750_s30 = scalar_lea.vmem (!%p1548_p8), [#allocation2], %s987_s21  ;;  %p2209_p13 = scmp.ne.s32.totalorder (!%p1548_p8), %s2194_s11, 0 }
  0xa3   : > { %1393 = dma.done.wait (%p2209_p13), %s344_s16, 128  }
  0xa4   : > { %1395 = vsyncadd (%p2209_p13), %s344_s16, 4294967168  ;;  %s353_s4 = scalar_lea.sflag [#allocation7], %s1746_s22  ;;  %s1757_s5 = scalar_lea.vmem [#allocation6], %s987_s21 }
  0xa5   : > { %1397 = dma.done.wait (%p2209_p13), %s353_s4, 128  }
  0xa6   : > { %1399 = vsyncadd (%p2209_p13), %s353_s4, 4294967168  ;;  %p2210_p8 = scmp.ne.s32.totalorder %s2192_s9, 0 }
  0xa8   : > { %1401 = dma.done.wait (%p2210_p8), [#allocation5], 128  }
  0xa9   : > { %1403 = vsyncadd (%p2210_p8), [#allocation5], 4294967168 }
  0xaa   : > { %1405 = dma.done.wait (%p2210_p8), [#allocation10], 144  }
  0xab   : > { %1407 = vsyncadd (%p2210_p8), [#allocation10], 4294967152 }
  0xac   : > { %1409 = dma.done.wait (%p2210_p8), [#allocation13], 16  }
  0xad   : > { %1411 = vsyncadd (%p2210_p8), [#allocation13], 4294967280 }
  0xae   : > { %377 = sfence }
  0xaf   : > { %s415_s11 = sld [smem:[#allocation8]]  ;;  %s996_s13 = sld [smem:[#allocation8 + $0x1]]  ;;  %v1776_v0 = vld [vmem:[%s1750_s30] sm:$0x3]  ;;  %v1785_v2 = vld [vmem:[%s1750_s30 + $0x2] sm:$0x3] }
  0xb0   : > { %s998_s8 = sld [smem:[#allocation8 + $0x2]]  ;;  %s1000_s18 = sld [smem:[#allocation8 + $0x3]]  ;;  %v1788_v3 = vld [vmem:[%s1750_s30 + $0x4] sm:$0x3]  ;;  %v1796_v7 = vld [vmem:[%s1750_s30 + $0x6] sm:$0x3] }
  0xb1   : > { %s437_s19 = sld [smem:[#allocation9]]  ;;  %s1778_s2 = sld [smem:[#allocation9 + $0x1]]  ;;  %v1805_v11 = vld [vmem:[%s1757_s5] sm:$0x3]  ;;  %v1818_v16 = vld [vmem:[%s1757_s5 + $0x2] sm:$0x3] }
  0xb2   : > { %s1780_s23 = sld [smem:[#allocation9 + $0x2]]  ;;  %s1782_s17 = sld [smem:[#allocation9 + $0x3]]  ;;  %v1827_v20 = vld [vmem:[%s1757_s5 + $0x4] sm:$0x3]  ;;  %v1837_v24 = vld [vmem:[%s1757_s5 + $0x6] sm:$0x3] }
  0xb3   : > { %s1791_s9 = sld [smem:[#allocation8 + $0x80]]  ;;  %s1793_s0 = sld [smem:[#allocation8 + $0x81]]  ;;  %vm740_vm0 = vcmask 1041408  }
  0xb4   : > { %s1798_s3 = sld [smem:[#allocation8 + $0x82]]  ;;  %s1800_s20 = sld [smem:[#allocation8 + $0x83]] }
  0xb5   : > { %v416_v1 = vstv %s415_s11  ;;  %v421_v5 = vstv %s996_s13  ;;  %s1807_s10 = sld [smem:[#allocation9 + $0x80]]  ;;  %s1809_s21 = sld [smem:[#allocation9 + $0x81]] }
  0xb6   : > { %v417_v4 = vmul.f32 %v416_v1, %v1776_v0  ;;  %v427_v6 = vstv %s998_s8  ;;  %v422_v8 = vmul.f32 %v1785_v2, %v421_v5  ;;  %v433_v10 = vstv %s1000_s18  ;;  %s1811_s16 = sld [smem:[#allocation9 + $0x82]]  ;;  %s1813_s30 = sld [smem:[#allocation9 + $0x83]] }
  0xb7   : > { %v428_v9 = vmul.f32 %v1788_v3, %v427_v6  ;;  %v438_v12 = vstv %s437_s19  ;;  %v434_v14 = vmul.f32 %v1796_v7, %v433_v10  ;;  %v444_v17 = vstv %s1778_s2  ;;  %s1822_s4 = sld [smem:[#allocation8 + $0x100]]  ;;  %s1824_s11 = sld [smem:[#allocation8 + $0x101]] }
  0xb8   : > { %v423_v13 = vadd.f32 %v422_v8, %v417_v4  ;;  %v439_v15 = vmul.f32 %v438_v12, %v1805_v11  ;;  %v450_v18 = vstv %s1780_s23  ;;  %v456_v21 = vstv %s1782_s17  ;;  %s1832_s13 = sld [smem:[#allocation8 + $0x102]]  ;;  %s1834_s8 = sld [smem:[#allocation8 + $0x103]] }
  0xb9   : > { %v467_v22 = vstv %s1791_s9  ;;  %v470_v23 = vstv %s1793_s0  ;;  %s1843_s18 = sld [smem:[#allocation9 + $0x100]]  ;;  %s1845_s19 = sld [smem:[#allocation9 + $0x101]]  ;;  %v445_v30 = vmul.f32 %v1818_v16, %v444_v17  ;;  %v451_v37 = vmul.f32 %v1827_v20, %v450_v18 }
  0xba   : > { %v429_v19 = vadd.f32 %v428_v9, %v423_v13  ;;  %v468_v25 = vmul.f32 %v467_v22, %v1776_v0  ;;  %v471_v26 = vmul.f32 %v1785_v2, %v470_v23  ;;  %v474_v27 = vstv %s1798_s3  ;;  %s1848_s2 = sld [smem:[#allocation12]]  ;;  %s1854_s5 = sld [smem:[#allocation12 + $0x1]] }
  0xbb   : > { %v478_v28 = vstv %s1800_s20  ;;  %v475_v31 = vmul.f32 %v1788_v3, %v474_v27  ;;  %v482_v32 = vstv %s1807_s10  ;;  %v486_v35 = vstv %s1809_s21  ;;  %s1856_s23 = sld [smem:[#allocation9 + $0x102]]  ;;  %s1861_s17 = sld [smem:[#allocation9 + $0x103]] }
  0xbc   : > { %v435_v29 = vadd.f32 %v434_v14, %v429_v19  ;;  %v472_v33 = vadd.f32 %v471_v26, %v468_v25  ;;  %v479_v34 = vmul.f32 %v1796_v7, %v478_v28  ;;  %v457_v38 = vmul.f32 %v1837_v24, %v456_v21  ;;  %s1863_s9 = sld [smem:[#allocation8 + $0x180]]  ;;  %s1868_s0 = sld [smem:[#allocation8 + $0x181]] }
  0xbd   : > { %v483_v39 = vmul.f32 %v482_v32, %v1805_v11  ;;  %v487_v41 = vmul.f32 %v1818_v16, %v486_v35  ;;  %v490_v42 = vstv %s1811_s16  ;;  %v494_v43 = vstv %s1813_s30  ;;  %s1873_s3 = sld [smem:[#allocation8 + $0x182]]  ;;  %s1875_s20 = sld [smem:[#allocation8 + $0x183]] }
  0xbe   : > { %v440_v36 = vadd.f32 %v439_v15, %v435_v29  ;;  %v476_v40 = vadd.f32 %v475_v31, %v472_v33  ;;  %v506_v45 = vstv %s1822_s4  ;;  %v509_v46 = vstv %s1824_s11  ;;  %s1883_s10 = sld [smem:[#allocation9 + $0x180]]  ;;  %s1885_s21 = sld [smem:[#allocation9 + $0x181]] }
  0xbf   : > { %v513_v47 = vstv %s1832_s13  ;;  %v507_v49 = vmul.f32 %v506_v45, %v1776_v0  ;;  %v510_v50 = vmul.f32 %v1785_v2, %v509_v46  ;;  %v491_v53 = vmul.f32 %v1827_v20, %v490_v42  ;;  %s1887_s16 = sld [smem:[#allocation11]]  ;;  %s1894_s30 = sld [smem:[#allocation12 + $0x2]] }
  0xc0   : > { %v446_v44 = vadd.f32 %v445_v30, %v440_v36  ;;  %v480_v48 = vadd.f32 %v479_v34, %v476_v40  ;;  %v514_v51 = vmul.f32 %v1788_v3, %v513_v47  ;;  %v517_v54 = vstv %s1834_s8  ;;  %s1896_s4 = sld [smem:[#allocation9 + $0x182]]  ;;  %s1899_s11 = sld [smem:[#allocation9 + $0x183]] }
  0xc1   : > { %v521_v55 = vstv %s1843_s18  ;;  %v511_v57 = vadd.f32 %v510_v50, %v507_v49  ;;  %v518_v58 = vmul.f32 %v1796_v7, %v517_v54  ;;  %v525_v59 = vstv %s1845_s19  ;;  %s1905_s13 = sld [smem:[#allocation8 + $0x200]]  ;;  %s1907_s8 = sld [smem:[#allocation8 + $0x201]] }
  0xc2   : > { %v452_v52 = vadd.f32 %v451_v37, %v446_v44  ;;  %v484_v56 = vadd.f32 %v483_v39, %v480_v48  ;;  %v460_v60 = vstv %s1848_s2  ;;  %v495_v61 = vmul.f32 %v1837_v24, %v494_v43  ;;  %s1911_s18 = sld [smem:[#allocation8 + $0x202]]  ;;  %s1917_s19 = sld [smem:[#allocation8 + $0x203]] }
  0xc3   : > { %v522_v62 = vmul.f32 %v521_v55, %v1805_v11  ;;  %v515_v4 = vadd.f32 %v514_v51, %v511_v57  ;;  %v529_v5 = vstv %s1856_s23  ;;  %v498_v6 = vstv %s1854_s5  ;;  %s1919_s2 = sld [smem:[#allocation9 + $0x200]]  ;;  %s1921_s5 = sld [smem:[#allocation11 + $0x1]] }
  0xc4   : > { %v458_v63 = vadd.f32 %v457_v38, %v452_v52  ;;  %v488_v1 = vadd.f32 %v487_v41, %v484_v56  ;;  %v526_v8 = vmul.f32 %v1818_v16, %v525_v59  ;;  %v533_v9 = vstv %s1861_s17  ;;  %s1927_s23 = sld [smem:[#allocation9 + $0x201]]  ;;  %s1931_s17 = sld [smem:[#allocation11 + $0x2]] }
  0xc5   : > { %v545_v10 = vstv %s1863_s9  ;;  %v519_v13 = vadd.f32 %v518_v58, %v515_v4  ;;  %v548_v15 = vstv %s1868_s0  ;;  %v530_v17 = vmul.f32 %v1827_v20, %v529_v5  ;;  %s1936_s9 = sld [smem:[#allocation12 + $0x3]]  ;;  %s1938_s0 = sld [smem:[#allocation9 + $0x202]] }
  0xc6   : > { %v492_v12 = vadd.f32 %v491_v53, %v488_v1  ;;  %v546_v14 = vmul.f32 %v545_v10, %v1776_v0  ;;  %v549_v18 = vmul.f32 %v1785_v2, %v548_v15  ;;  %v552_v19 = vstv %s1873_s3  ;;  %s1942_s3 = sld [smem:[#allocation9 + $0x203]]  ;;  %p2211_p6 = scmp.ne.s32.totalorder %s2203_s14, 0 }
  0xc7   : > { %v556_v21 = vstv %s1875_s20  ;;  %v461_v22 = vadd.f32 %v460_v60, %v458_v63  ;;  %v523_v25 = vadd.f32 %v522_v62, %v519_v13  ;;  %v553_v26 = vmul.f32 %v1788_v3, %v552_v19  ;;  %s1944_s20 = sld [smem:[#allocation8 + $0x280]] }
  0xc8   : > { %v496_v23 = vadd.f32 %v495_v61, %v492_v12  ;;  %v550_v27 = vadd.f32 %v549_v18, %v546_v14  ;;  %v557_v28 = vmul.f32 %v1796_v7, %v556_v21  ;;  %v560_v29 = vstv %s1883_s10  ;;  %s1948_s10 = sld [smem:[#allocation8 + $0x281]] }
  0xc9   : > { %v564_v30 = vstv %s1885_s21  ;;  %v464_v31 = vstv %s1887_s16  ;;  %v527_v33 = vadd.f32 %v526_v8, %v523_v25  ;;  %v534_v34 = vmul.f32 %v1837_v24, %v533_v9  ;;  %s1950_s21 = sld [smem:[#allocation8 + $0x282]]  ;;  %s1958_s16 = sld [smem:[#allocation8 + $0x283]] }
  0xca   : > { %v499_v32 = vadd.f32 %v498_v6, %v496_v23  ;;  %v537_v35 = vstv %s1894_s30  ;;  %v554_v36 = vadd.f32 %v553_v26, %v550_v27  ;;  %v561_v37 = vmul.f32 %v560_v29, %v1805_v11  ;;  %s1960_s30 = sld [smem:[#allocation9 + $0x280]] }
  0xcb   : > { %v568_v38 = vstv %s1896_s4  ;;  %v462_v39 = vmax.f32 %v461_v22, 0.0  ;;  %v531_v40 = vadd.f32 %v530_v17, %v527_v33  ;;  %v565_v41 = vmul.f32 %v1818_v16, %v564_v30  ;;  %s1963_s4 = sld [smem:[#allocation11 + $0x3]] }
  0xcc   : > { %v572_v42 = vstv %s1899_s11  ;;  %v500_v43 = vmax.f32 %v499_v32, 0.0  ;;  %v558_v44 = vadd.f32 %v557_v28, %v554_v36  ;;  %v584_v45 = vstv %s1905_s13  ;;  %s1969_s11 = sld [smem:[#allocation12 + $0x4]]  ;;  %s1971_s13 = sld [smem:[#allocation9 + $0x281]] }
  0xcd   : > { %v587_v46 = vstv %s1907_s8  ;;  %v535_v47 = vadd.f32 %v534_v34, %v531_v40  ;;  %v569_v48 = vmul.f32 %v1827_v20, %v568_v38  ;;  %v585_v49 = vmul.f32 %v584_v45, %v1776_v0  ;;  %s1975_s8 = sld [smem:[#allocation9 + $0x282]] }
  0xce   : > { %v588_v50 = vmul.f32 %v1785_v2, %v587_v46  ;;  %v562_v51 = vadd.f32 %v561_v37, %v558_v44  ;;  %v591_v52 = vstv %s1911_s18  ;;  %v595_v53 = vstv %s1917_s19  ;;  %s1979_s18 = sld [smem:[#allocation9 + $0x283]]  ;;  %s1983_s19 = sld [smem:[#allocation8 + $0x300]] }
  0xcf   : > { %v599_v54 = vstv %s1919_s2  ;;  %v502_v55 = vstv %s1921_s5  ;;  %v538_v56 = vadd.f32 %v537_v35, %v535_v47  ;;  %v592_v58 = vmul.f32 %v1788_v3, %v591_v52  ;;  %s1985_s2 = sld [smem:[#allocation8 + $0x301]]  ;;  %s1990_s5 = sld [smem:[#allocation8 + $0x302]] }
  0xd0   : > { %v589_v57 = vadd.f32 %v588_v50, %v585_v49  ;;  %v566_v59 = vadd.f32 %v565_v41, %v562_v51  ;;  %v573_v60 = vmul.f32 %v1837_v24, %v572_v42  ;;  %v596_v61 = vmul.f32 %v1796_v7, %v595_v53 }
  0xd1   : > { %v603_v62 = vstv %s1927_s23  ;;  %v465_v63 = vmul.f32 %v464_v31, %v462_v39  ;;  %v541_v1 = vstv %s1931_s17  ;;  %v600_v5 = vmul.f32 %v599_v54, %v1805_v11  ;;  %s1995_s23 = sld [smem:[#allocation8 + $0x303]]  ;;  %s2000_s17 = sld [smem:[#allocation9 + $0x300]] }
  0xd2   : > { %v593_v4 = vadd.f32 %v592_v58, %v589_v57  ;;  %v503_v6 = vmul.f32 %v502_v55, %v500_v43  ;;  %v570_v8 = vadd.f32 %v569_v48, %v566_v59  ;;  %v576_v9 = vstv %s1936_s9  ;;  %s2002_s9 = sld [smem:[#allocation9 + $0x301]] }
  0xd3   : > { %v607_v10 = vstv %s1938_s0  ;;  %v539_v12 = vmax.f32 %v538_v56, 0.0  ;;  %v604_v14 = vmul.f32 %v1818_v16, %v603_v62  ;;  %v611_v15 = vstv %s1942_s3  ;;  %s2009_s0 = sld [smem:[#allocation9 + $0x302]]  ;;  %s2013_s3 = sld [smem:[#allocation12 + $0x5]] }
  0xd4   : > { %v597_v13 = vadd.f32 %v596_v61, %v593_v4  ;;  %v574_v17 = vadd.f32 %v573_v60, %v570_v8  ;;  %v623_v18 = vstv %s1944_s20  ;;  %v626_v19 = vstv %s1948_s10  ;;  %s2015_s20 = sld [smem:[#allocation9 + $0x303]]  ;;  %s2019_s10 = sld [smem:[#allocation8 + $0x380]] }
  0xd5   : > { %v630_v21 = vstv %s1950_s21  ;;  %v608_v23 = vmul.f32 %v1827_v20, %v607_v10  ;;  %v624_v25 = vmul.f32 %v623_v18, %v1776_v0  ;;  %v627_v26 = vmul.f32 %v1785_v2, %v626_v19  ;;  %s2021_s21 = sld [smem:[#allocation8 + $0x381]] }
  0xd6   : > { %v601_v22 = vadd.f32 %v600_v5, %v597_v13  ;;  %v577_v27 = vadd.f32 %v576_v9, %v574_v17  ;;  %v631_v28 = vmul.f32 %v1788_v3, %v630_v21  ;;  %v634_v29 = vstv %s1958_s16  ;;  %s2025_s16 = sld [smem:[#allocation8 + $0x382]] }
  0xd7   : > { %v638_v30 = vstv %s1960_s30  ;;  %v612_v32 = vmul.f32 %v1837_v24, %v611_v15  ;;  %v628_v33 = vadd.f32 %v627_v26, %v624_v25  ;;  %v635_v34 = vmul.f32 %v1796_v7, %v634_v29  ;;  %s2031_s30 = sld [smem:[#allocation8 + $0x383]] }
  0xd8   : > { %v605_v31 = vadd.f32 %v604_v14, %v601_v22  ;;  %v504_v35 = vadd.f32 %v503_v6, %v465_v63  ;;  %v580_v36 = vstv %s1963_s4  ;;  %v615_v37 = vstv %s1969_s11  ;;  %s2033_s4 = sld [smem:[#allocation9 + $0x380]]  ;;  %s2037_s11 = sld [smem:[#allocation11 + $0x4]] }
  0xd9   : > { %v642_v38 = vstv %s1971_s13  ;;  %v632_v40 = vadd.f32 %v631_v28, %v628_v33  ;;  %v639_v41 = vmul.f32 %v638_v30, %v1805_v11  ;;  %v646_v42 = vstv %s1975_s8  ;;  %s2042_s13 = sld [smem:[#allocation9 + $0x381]]  ;;  %s2047_s8 = sld [smem:[#allocation12 + $0x6]] }
  0xda   : > { %v609_v39 = vadd.f32 %v608_v23, %v605_v31  ;;  %v542_v43 = vmul.f32 %v541_v1, %v539_v12  ;;  %v578_v44 = vmax.f32 %v577_v27, 0.0  ;;  %v643_v45 = vmul.f32 %v1818_v16, %v642_v38 }
  0xdb   : > { %v650_v46 = vstv %s1979_s18  ;;  %v636_v48 = vadd.f32 %v635_v34, %v632_v40  ;;  %v662_v49 = vstv %s1983_s19  ;;  %v665_v50 = vstv %s1985_s2  ;;  %s2049_s18 = sld [smem:[#allocation9 + $0x382]]  ;;  %s2053_s19 = sld [smem:[#allocation11 + $0x5]] }
  0xdc   : > { %v613_v47 = vadd.f32 %v612_v32, %v609_v39  ;;  %v647_v51 = vmul.f32 %v1827_v20, %v646_v42  ;;  %v663_v52 = vmul.f32 %v662_v49, %v1776_v0  ;;  %v666_v53 = vmul.f32 %v1785_v2, %v665_v50  ;;  %s2058_s2 = sld [smem:[#allocation9 + $0x383]] }
  0xdd   : > { %v669_v54 = vstv %s1990_s5  ;;  %v640_v56 = vadd.f32 %v639_v41, %v636_v48  ;;  %v673_v58 = vstv %s1995_s23  ;;  %v677_v61 = vstv %s2000_s17  ;;  %s1066_s5 = sld [smem:[#allocation11 + $0x6]]  ;;  %s1075_s23 = sld [smem:[#allocation12 + $0x7]] }
  0xde   : > { %v616_v55 = vadd.f32 %v615_v37, %v613_v47  ;;  %v670_v57 = vmul.f32 %v1788_v3, %v669_v54  ;;  %v667_v59 = vadd.f32 %v666_v53, %v663_v52  ;;  %v674_v60 = vmul.f32 %v1796_v7, %v673_v58  ;;  %s1076_s17 = sld [smem:[#allocation11 + $0x7]] }
  0xdf   : > { %v681_v62 = vstv %s2002_s9  ;;  %v543_v63 = vadd.f32 %v542_v43, %v504_v35  ;;  %v644_v1 = vadd.f32 %v643_v45, %v640_v56  ;;  %v651_v4 = vmul.f32 %v1837_v24, %v650_v46  ;;  %s993_s9 = sshll.u32 %s1746_s22, 1 }
  0xe0   : > { %v581_v5 = vmul.f32 %v580_v36, %v578_v44  ;;  %v671_v6 = vadd.f32 %v670_v57, %v667_v59  ;;  %v678_v8 = vmul.f32 %v677_v61, %v1805_v11  ;;  %v685_v9 = vstv %s2009_s0  ;;  %s1079_s0 = sshll.u32 %s1434_s27, 5 }
  0xe1   : > { %v617_v10 = vmax.f32 %v616_v55, 0.0  ;;  %v648_v12 = vadd.f32 %v647_v51, %v644_v1  ;;  %v654_v13 = vstv %s2013_s3  ;;  %v682_v14 = vmul.f32 %v1818_v16, %v681_v62  ;;  %s406_s3 = scalar_lea.vmem [#allocation14], %s993_s9 }
  0xe2   : > { %v675_v15 = vadd.f32 %v674_v60, %v671_v6  ;;  %v689_v17 = vstv %s2015_s20  ;;  %v701_v18 = vstv %s2019_s10  ;;  %v704_v19 = vstv %s2021_s21  ;;  %s778_s20 = sshll.u32 %s406_s3, 4  ;;  %s2090_s20 = int_to_ptr.vmem [resolvable:$true] %s778_s20 }
  0xe3   : > { %v652_v21 = vadd.f32 %v651_v4, %v648_v12  ;;  %v686_v22 = vmul.f32 %v1827_v20, %v685_v9  ;;  %v702_v23 = vmul.f32 %v701_v18, %v1776_v0  ;;  %v705_v25 = vmul.f32 %v1785_v2, %v704_v19 }
  0xe4   : > { %v679_v26 = vadd.f32 %v678_v8, %v675_v15  ;;  %v708_v27 = vstv %s2025_s16  ;;  %v712_v28 = vstv %s2031_s30  ;;  %v716_v29 = vstv %s2033_s4  ;;  %s2088_s16 = scalar_lea.hbm %s2178_s6, %s1079_s0  ;;  %s759_s30 = scalar_lea.sflag [#allocation4], %s1746_s22 }
  0xe5   : > { %v655_v30 = vadd.f32 %v654_v13, %v652_v21  ;;  %v706_v31 = vadd.f32 %v705_v25, %v702_v23  ;;  %v709_v32 = vmul.f32 %v1788_v3, %v708_v27  ;;  %v713_v33 = vmul.f32 %v1796_v7, %v712_v28  ;;  %s1312_s4 = scalar_lea.vmem %s2090_s20, 32 }
  0xe6   : > { %v619_v34 = vstv %s2037_s11  ;;  %v683_v35 = vadd.f32 %v682_v14, %v679_v26  ;;  %v690_v36 = vmul.f32 %v1837_v24, %v689_v17  ;;  %v720_v0 = vstv %s2042_s13  ;;  %p1313_p2 = scmp.ne.s32.totalorder %s2090_s20, %s1312_s4  ;;  %s1452_s11 = smov [#allocation14]  }
  0xe7   : > { %v710_v2 = vadd.f32 %v709_v32, %v706_v31  ;;  %v717_v37 = vmul.f32 %v716_v29, %v1805_v11  ;;  %v582_v38 = vadd.f32 %v581_v5, %v543_v63  ;;  %v693_v40 = vstv %s2047_s8  ;;  %s1316_s13 = sshll.u32 %s1452_s11, 4  ;;  %s1317_s13 = int_to_ptr.vmem [resolvable:$false] %s1316_s13 }
  0xe8   : > { %v687_v39 = vadd.f32 %v686_v22, %v683_v35  ;;  %v724_v41 = vstv %s2049_s18  ;;  %v620_v42 = vmul.f32 %v619_v34, %v617_v10  ;;  %v656_v3 = vmax.f32 %v655_v30, 0.0  ;;  %p1314_p0 = pnand %p1313_p2, %p2211_p6  ;;  %s1318_s8 = scalar_lea.vmem %s1317_s13, 64 }
  0xe9   : > { %v714_v43 = vadd.f32 %v713_v33, %v710_v2  ;;  %v721_v7 = vmul.f32 %v1818_v16, %v720_v0  ;;  %v658_v44 = vstv %s2053_s19  ;;  %v728_v46 = vstv %s2058_s2  ;;  %p1319_p7 = scmp.lt.s32.totalorder %s2090_s20, %s1317_s13  ;;  %p1320_p10 = scmp.lt.s32.totalorder %s1318_s8, %s1312_s4 }
  0xea   : > { %v691_v45 = vadd.f32 %v690_v36, %v687_v39  ;;  %v725_v48 = vmul.f32 %v1827_v20, %v724_v41  ;;  %v621_v11 = vadd.f32 %v620_v42, %v582_v38  ;;  %v659_v50 = vmul.f32 %v658_v44, %v656_v3  ;;  %p1315_p3 = pneg %p1314_p0 }
  0xeb   : > { %v718_v47 = vadd.f32 %v717_v37, %v714_v43  ;;  %v729_v52 = vmul.f32 %v1837_v24, %v728_v46  ;;  %v697_v54 = vstv %s1066_s5  ;;  %v732_v16 = vstv %s1075_s23  ;;  %p1321_p9 = por %p1320_p10, %p1319_p7 }
  0xec   : > { %v694_v49 = vadd.f32 %v693_v40, %v691_v45  ;;  %v660_v56 = vadd.f32 %v659_v50, %v621_v11  ;;  %v736_v20 = vstv %s1076_s17 }
  0xed   : > { %v722_v51 = vadd.f32 %v721_v7, %v718_v47  ;;  %p1322_p1 = pnand %p1321_p9, %p1315_p3 }
  0xee   : > { %v695_v53 = vmax.f32 %v694_v49, 0.0 }
  0xef   : > { %v726_v55 = vadd.f32 %v725_v48, %v722_v51 }
  0xf0   : > { %v698_v57 = vmul.f32 %v697_v54, %v695_v53 }
  0xf1   : > { %v730_v58 = vadd.f32 %v729_v52, %v726_v55 }
  0xf2   : > { %v699_v60 = vadd.f32 %v698_v57, %v660_v56 }
  0xf3   : > { %v733_v59 = vadd.f32 %v732_v16, %v730_v58 }
  0xf5   : > { %v734_v61 = vmax.f32 %v733_v59, 0.0 }
  0xf7   : > { %v737_v24 = vmul.f32 %v736_v20, %v734_v61 }
  0xf9   : > { %v738_v62 = vadd.f32 %v737_v24, %v699_v60 }
  0xfb   : > { %739 = vst [vmem:[%s406_s3] sm:$0x3] %v738_v62  ;;  %v741_v63 = vsel %vm740_vm0, %v738_v62, 0.0  ;;  %v749_v1 = vmul.f32 %v738_v62, %v738_v62 }
  0xfc   : > { %v742_v4 = vrot.slane %v741_v63, 4 }
  0xfd   : > { %1325 = shalt.err (!%p1322_p1)
}
  0xfe   : > { %s1326_s18 = scalar_lea.hbm %s2088_s16, 32  ;;  %s1330_s5 = scalar_lea.hbm %s2178_s6, 64 }
  0xff   : > { %p1327_p4 = scmp.ne.s32.totalorder %s2088_s16, %s1326_s18  ;;  %p1331_p11 = scmp.lt.u32.totalorder %s2088_s16, %s2178_s6 }
 0x100   : > { %p1332_p13 = scmp.lt.u32.totalorder %s1330_s5, %s1326_s18  ;;  %p1334_p2 = scmp.lt.u32.totalorder %s1326_s18, %s2088_s16 }
 0x101   : > { %p1328_p12 = pnand %p1327_p4, %p2211_p6 }
 0x102   : > { %p1333_p8 = por %p1332_p13, %p1331_p11 }
 0x103   : > { %p1329_p5 = pneg %p1328_p12 }
 0x104   : > { %p1335_p0 = por %p1334_p2, %p1333_p8 }
 0x106   : > { %p1336_p3 = pnand %p1335_p0, %p1329_p5 }
 0x108   : > { %1339 = shalt.err (!%p1336_p3)
}
 0x109   : > { %1105 = dma.vmem_to_hbm [thread:$0]  (%p2211_p6), %s2090_s20, 32, %s2088_s16, %s759_s30   ;;  %v750_v5 = vsel %vm740_vm0, %v749_v1, 0.0  ;;  %v743_v6 = vadd.f32 %v742_v4, %v741_v63 }
 0x10a   : > { %v751_v8 = vrot.slane %v750_v5, 4  ;;  %s413_s3 = scalar_lea.vmem [#allocation15], %s993_s9  ;;  %s2123_s16 = scalar_lea.hbm %s2179_s7, %s1079_s0 }
 0x10b   : > { %v744_v9 = vrot.slane %v743_v6, 2  ;;  %s792_s10 = sshll.u32 %s413_s3, 4  ;;  %s764_s30 = scalar_lea.sflag [#allocation16], %s1746_s22  ;;  %s2125_s10 = int_to_ptr.vmem [resolvable:$true] %s792_s10 }
 0x10c   : > { %v752_v10 = vadd.f32 %v751_v8, %v750_v5  ;;  %s1340_s4 = scalar_lea.vmem %s2125_s10, 32  ;;  %s1453_s9 = smov [#allocation15]  }
 0x10d   : > { %v745_v12 = vadd.f32 %v744_v9, %v743_v6  ;;  %p1341_p7 = scmp.ne.s32.totalorder %s2125_s10, %s1340_s4  ;;  %s1344_s11 = sshll.u32 %s1453_s9, 4  ;;  %s1345_s11 = int_to_ptr.vmem [resolvable:$false] %s1344_s11 }
 0x10e   : > { %v753_v13 = vrot.slane %v752_v10, 2  ;;  %s1346_s27 = scalar_lea.vmem %s1345_s11, 64  ;;  %p1347_p1 = scmp.lt.s32.totalorder %s2125_s10, %s1345_s11 }
 0x10f   : > { %v746_v14 = vrot.slane %v745_v12, 1  ;;  %p1342_p10 = pnand %p1341_p7, %p2211_p6  ;;  %p1348_p4 = scmp.lt.s32.totalorder %s1346_s27, %s1340_s4 }
 0x110   : > { %v754_v15 = vadd.f32 %v753_v13, %v752_v10 }
 0x111   : > { %v747_v17 = vadd.f32 %v746_v14, %v745_v12  ;;  %p1343_p9 = pneg %p1342_p10  ;;  %p1349_p12 = por %p1348_p4, %p1347_p1 }
 0x112   : > { %v755_v18 = vrot.slane %v754_v15, 1 }
 0x113   : > { %748 = vst [vmem:[%s413_s3] sm:$0x1] %v747_v17  ;;  %p1350_p5 = pnand %p1349_p12, %p1343_p9 }
 0x114   : > { %v756_v19 = vadd.f32 %v755_v18, %v754_v15 }
 0x116   : > { %757 = vst [vmem:[%s413_s3 + $0x1] sm:$0x1] %v756_v19 }
 0x117   : > { %1353 = shalt.err (!%p1350_p5)
}
 0x118   : > { %s1354_s22 = scalar_lea.hbm %s2123_s16, 32  ;;  %s1358_s8 = scalar_lea.hbm %s2179_s7, 64 }
 0x119   : > { %p1355_p11 = scmp.ne.s32.totalorder %s2123_s16, %s1354_s22  ;;  %p1359_p2 = scmp.lt.u32.totalorder %s2123_s16, %s2179_s7 }
 0x11a   : > { %p1360_p0 = scmp.lt.u32.totalorder %s1358_s8, %s1354_s22  ;;  %p1362_p7 = scmp.lt.u32.totalorder %s1354_s22, %s2123_s16 }
 0x11b   : > { %p1356_p13 = pnand %p1355_p11, %p2211_p6 }
 0x11c   : > { %p1361_p3 = por %p1360_p0, %p1359_p2 }
 0x11d   : > { %p1357_p8 = pneg %p1356_p13 }
 0x11e   : > { %p1363_p10 = por %p1362_p7, %p1361_p3 }
 0x120   : > { %p1364_p9 = pnand %p1363_p10, %p1357_p8 }
 0x122   : > { %1367 = shalt.err (!%p1364_p9)
}
 0x123   : > { %1106 = dma.vmem_to_hbm [thread:$0]  (%p2211_p6), %s2125_s10, 32, %s2123_s16, %s764_s30  }
 0x124 PF: > { %s804_s2 = sand.u32 1, %s1422_s24   ;;  %p2212_p1 = scmp.ne.s32.totalorder %s2195_s12, 0 }
 0x125   : > { %p2213_p4 = scmp.ge.s32.totalorder %s1442_s29, 2  ;;  %s805_s5 = scalar_lea.sflag [#allocation4], %s804_s2 }
 0x127   : > { %p1130_p12 = pnand %p2213_p4, %p2212_p1 }
 0x129   : > { %1413 = dma.done.wait (!%p1130_p12), %s805_s5, 32  }
 0x12a   : > { %1415 = vsyncadd (!%p1130_p12), %s805_s5, 4294967264  ;;  %s814_s23 = scalar_lea.sflag [#allocation16], %s804_s2 }
 0x12b   : > { %1417 = dma.done.wait (!%p1130_p12), %s814_s23, 32  }
 0x12c   : > { %1419 = vsyncadd (!%p1130_p12), %s814_s23, 4294967264  ;;  %s33_s29 = sadd.s32 1, %s1442_s29   ;;  %s2214_s14 = sld [smem:[#allocation24_spill]] }
 0x12d   : > { %p30_p5 = scmp.ge.s32.totalorder %s33_s29, 4   ;;  %s2215_s24 = smov %s1426_s25 }
 0x12e   : > { %s2216_s25 = smov %s1430_s26  ;;  %s2217_s26 = smov %s1653_s15 }
 0x12f   : > { %s2218_s27 = smov %s1438_s28  ;;  %32 = sbr.rel (!%p30_p5) target bundleno = 19 (0x13), region = 142 }
 0x132   : > { %s2219_s28 = smov %s2214_s14 }
 0x136   :  { %819 = vsyncpa [#allocation3], 1 }
 0x137   :  { %821 = vsyncpa [#allocation3 + $0x1], 1 }
 0x138   :  { %822 = vsyncpa [#allocation7], 1 }
 0x139   :  { %824 = vsyncpa [#allocation7 + $0x1], 1 }
 0x13a   :  { %825 = vsyncpa [#allocation4], 1 }
 0x13b   :  { %827 = vsyncpa [#allocation4 + $0x1], 1 }
 0x13c   :  { %828 = vsyncpa [#allocation16], 1 }
 0x13d   :  { %830 = vsyncpa [#allocation16 + $0x1], 1 }
 0x13e   :  { %831 = vsyncpa [#allocation5], 1 }
 0x13f   :  { %833 = vsyncpa [#allocation5 + $0x1], 1 }
 0x140   :  { %834 = vsyncpa [#allocation10], 1 }
 0x141   :  { %835 = vsyncpa [#allocation13], 1 }

</bundles_post_ra>
